<compile_context>
chip_gen: v6e
topology: v6e:2x2x1
jax: 0.10.0
libtpu: 0.0.40
codegen_flags: <defaults>
</compile_context>

<pallas_src>
import jax
import jax.numpy as jnp
from jax import lax
from jax.experimental import pallas as pl
from jax.experimental.pallas import tpu as pltpu


def _vmem_capacity_bytes(default=64 << 20):
    """Physical VMEM of the attached TPU; conservative default if unavailable."""
    try:
        info = pltpu.get_tpu_info()
        cap = getattr(info, "vmem_capacity_bytes", None)
        if cap:
            return int(cap)
    except Exception:
        pass
    return default


def _pick_td(C, D, H, W, itemsize, budget_bytes):
    """Largest depth tile TD (divisor of D) whose input slab fits `budget_bytes`
    and whose derived block shapes satisfy TPU (8, 128) tiling rules."""
    legal = []
    for td in range(1, D + 1):
        if D % td:
            continue
        if td == D or (td % 8 == 0 and (td * W) % 128 == 0 and (td * H) % 128 == 0):
            legal.append(td)
    fitting = [td for td in legal if C * td * H * W * itemsize <= budget_bytes]
    if fitting:
        return max(fitting)
    # Nothing legal fits the budget (e.g. D has no divisor that is a multiple of
    # 8): fall back to the smallest legal tile; the vmem_limit below is derived
    # from the actual working set so this stays as small as the shape allows.
    return min(legal)


def _make_kernel(C, D, H, W, F, TD):
    HW = H * W
    WH = W + H

    def kernel(vol_ref, mcat_ref, wyz_ref, wcat_ref, bxz_ref, bxy_ref,
               xy_ref, xz_ref, yzp_ref, yz_acc_ref, sel_ref):
        d = pl.program_id(2)

        @pl.when(d == 0)
        def _init():
            yz_acc_ref[...] = jnp.zeros_like(yz_acc_ref)

        x = vol_ref[0].astype(jnp.float32)                 # (C, TD, HW)

        # yz plane: ONE accumulator read-modify-write per grid step.
        yz_acc_ref[...] += jnp.sum(x, axis=1)              # (C, HW)

        # Batched H-mean / W-mean selection on the MXU with M = C*TD.
        # Reshape is layout-preserving when TD % 8 == 0 (guaranteed by _pick_td
        # except in the TD == D fallback, where it is still correct).
        x2 = x.reshape(C * TD, HW)
        sel = mcat_ref[...].astype(jnp.float32)            # (HW, W+H), 0/1 values
        xhw = jnp.dot(x2, sel, preferred_element_type=jnp.float32)   # (C*TD, W+H)
        sel_ref[...] = xhw.reshape(C, TD, WH)

        wcat = wcat_ref[...]                               # (2F, C), scales folded
        bxz = bxz_ref[...]                                 # (F, 1)
        bxy = bxy_ref[...]                                 # (F, 1)

        def emit(ld):
            s = sel_ref[:, ld, :]                          # (C, W+H)
            o = jnp.dot(wcat, s, preferred_element_type=jnp.float32)  # (2F, W+H)
            xz_ref[0, :, pl.ds(ld * W, W)] = (o[:F, :W] + bxz).astype(xz_ref.dtype)
            xy_ref[0, :, pl.ds(ld * H, H)] = (o[F:, W:] + bxy).astype(xy_ref.dtype)

        if TD <= 16:
            # Small tile: static unroll keeps full LLO scheduling visibility.
            for ld in range(TD):
                emit(ld)
        else:
            # Large tile: bounded vreg live ranges via fori_loop with small unroll.
            def body(ld, carry):
                emit(ld)
                return carry
            lax.fori_loop(0, TD, body, 0, unroll=4)

        @pl.when(d == pl.num_programs(2) - 1)
        def _finalize():
            # 1x1 conv of the D-sum (1/D already folded into wyz); the bias and
            # the cross-split sum are added by a tiny XLA epilogue in the wrapper.
            yzp_ref[0, 0] = jnp.dot(wyz_ref[...], yz_acc_ref[...],
                                    preferred_element_type=jnp.float32)

    return kernel


def triplane_gen(spatial_volume, params, *, slab_budget_bytes=None,
                 prefer_single_buffer_residents=True):
    """spatial_volume: (N, C, D, H, W). params: dict of 1x1-conv weights/biases.

    Returns (xy_feat, xz_feat, yz_feat) just like TriplaneGen.forward.
    """
    N, C, D, H, W = spatial_volume.shape
    F = params["w_yz"].shape[0]
    HW = H * W
    out_dtype = spatial_volume.dtype
    itemsize = jnp.dtype(out_dtype).itemsize
    f32 = jnp.float32

    cap = _vmem_capacity_bytes()
    if slab_budget_bytes is None:
        # Generation-aware: ~1/8 of physical VMEM per (single) input slab buffer,
        # leaving room for double-buffering, outputs, residents and scratch.
        slab_budget_bytes = max(2 << 20, cap // 8)

    TD = _pick_td(C, D, H, W, itemsize, slab_budget_bytes)
    n_d = D // TD

    # Optional depth split so both v7x TensorCores have parallel work when the
    # batch axis alone cannot feed them.  Per-split yz partial sums are combined
    # outside the kernel.
    split = 2 if (N % 2 == 1 and n_d % 2 == 0 and n_d >= 2) else 1
    npd = n_d // split

    # Lane-dense input view: free reshape in HBM (array is contiguous).
    vol = spatial_volume.reshape(N, C, D, HW)

    # Fold the mean scales into the f32 conv weights (exact semantics, just a
    # different but equivalent fp rounding order).  xz/xy weights are merged so
    # the per-slice channel mix is a single matmul.
    w_yz_s = (params["w_yz"] / D).astype(f32)                          # (F, C)
    w_cat = jnp.concatenate([params["w_xz"] / H,
                             params["w_xy"] / W], axis=0).astype(f32)  # (2F, C)
    b_xz = params["b_xz"].reshape(F, 1).astype(f32)
    b_xy = params["b_xy"].reshape(F, 1).astype(f32)

    # Concatenated 0/1 selection matrix (bf16, exact): contracting the flattened
    # H*W lane axis with it computes the H-sum (first W cols) and W-sum (last H
    # cols) on the MXU — no cross-lane XLU reduce and half the resident bytes.
    hw_idx = jnp.arange(HW)
    m_h = (hw_idx[:, None] % W) == jnp.arange(W)[None, :]              # (HW, W)
    m_w = (hw_idx[:, None] // W) == jnp.arange(H)[None, :]             # (HW, H)
    m_cat = jnp.concatenate([m_h, m_w], axis=1).astype(jnp.bfloat16)   # (HW, W+H)

    out_shapes = (
        jax.ShapeDtypeStruct((N, F, D * H), out_dtype),        # xy (flattened)
        jax.ShapeDtypeStruct((N, F, D * W), out_dtype),        # xz (flattened)
        jax.ShapeDtypeStruct((split, N, F, HW), f32),          # yz partial convs
    )

    # Advisory cost estimate: this kernel is HBM streaming of the volume plus the
    # selection matmuls.
    flops = (2 * N * D * C * HW * (W + H)            # batched mean-selection matmul
             + 2 * N * D * (2 * F) * C * (W + H)     # merged per-slice 1x1 convs
             + 2 * N * split * F * C * HW)           # yz 1x1 conv per split
    resident_bytes = (HW * (W + H) * 2 + F * C * 4 + 2 * F * C * 4 + 2 * F * 4)
    bytes_accessed = (itemsize * N * C * D * HW
                      + itemsize * N * F * D * (H + W)
                      + 4 * split * N * F * HW
                      + resident_bytes)
    cost = pl.CostEstimate(flops=flops, transcendentals=0,
                           bytes_accessed=bytes_accessed)

    kernel = _make_kernel(C, D, H, W, F, TD)

    def build(single_buffer_residents):
        def resident(shape):
            idx = lambda n, s, d: (0,) * len(shape)
            if single_buffer_residents:
                # Constant index map -> no benefit from double buffering.
                return pl.BlockSpec(shape, idx, pipeline_mode=pl.Buffered(1))
            return pl.BlockSpec(shape, idx)

        in_specs = [
            pl.BlockSpec((1, C, TD, HW), lambda n, s, d: (n, 0, s * npd + d, 0)),
            resident((HW, W + H)),       # m_cat (bf16)
            resident((F, C)),            # w_yz (scaled)
            resident((2 * F, C)),        # [w_xz; w_xy] (scaled)
            resident((F, 1)),            # b_xz
            resident((F, 1)),            # b_xy
        ]
        out_specs = [
            pl.BlockSpec((1, F, TD * H), lambda n, s, d: (n, 0, s * npd + d)),
            pl.BlockSpec((1, F, TD * W), lambda n, s, d: (n, 0, s * npd + d)),
            pl.BlockSpec((1, 1, F, HW), lambda n, s, d: (s, n, 0, 0)),
        ]
        grid_spec = pltpu.PrefetchScalarGridSpec(
            num_scalar_prefetch=0,
            grid=(N, split, npd),
            in_specs=in_specs,
            out_specs=out_specs,
            scratch_shapes=[pltpu.VMEM((C, HW), f32),            # yz D-sum accumulator
                            pltpu.VMEM((C, TD, W + H), f32)])    # per-tile H/W sums

        # Working set: double-buffered streamed blocks + residents + scratch.
        res_bufs = 1 if single_buffer_residents else 2
        ws = (2 * C * TD * HW * itemsize
              + 2 * F * TD * (H + W) * itemsize
              + 2 * F * HW * 4
              + res_bufs * resident_bytes
              + C * HW * 4
              + C * TD * (W + H) * 4)
        vmem_limit = int(min(max(4 << 20, int(ws * 1.5) + (2 << 20)),
                             (cap * 3) // 4))

        return pl.pallas_call(
            kernel,
            out_shape=out_shapes,
            grid_spec=grid_spec,
            compiler_params=pltpu.CompilerParams(
                dimension_semantics=("parallel", "parallel", "arbitrary"),
                vmem_limit_bytes=vmem_limit),
            cost_estimate=cost,
        )

    args = (vol, m_cat, w_yz_s, w_cat, b_xz, b_xy)
    if prefer_single_buffer_residents:
        try:
            xy, xz, yzp = build(True)(*args)
        except Exception:
            # Older JAX without BlockSpec.pipeline_mode / Buffered(1) support.
            xy, xz, yzp = build(False)(*args)
    else:
        xy, xz, yzp = build(False)(*args)

    # Tiny XLA epilogue: combine per-split yz partial convs, add bias, cast.
    yz = yzp.sum(axis=0) + params["b_yz"].astype(f32)[None, :, None]
    yz = yz.astype(out_dtype).reshape(N, F, H, W)
    xy = xy.reshape(N, F, D, H)
    xz = xz.reshape(N, F, D, W)
    return xy, xz, yz


def make_params(key, n_channels, feat_dim):
    """Deterministic synthetic weights for the three 1x1 Conv2d layers.

    PyTorch Conv2d weight shape is (out_c, in_c, 1, 1); since ker_size=1 we
    store them as (out_c, in_c) matmul weights.
    """
    ks = jax.random.split(key, 6)
    scale = 1.0 / jnp.sqrt(n_channels)
    return {
        "w_yz": (jax.random.normal(ks[0], (feat_dim, n_channels)) * scale).astype(jnp.float32),
        "b_yz": (jax.random.normal(ks[1], (feat_dim,)) * scale).astype(jnp.float32),
        "w_xz": (jax.random.normal(ks[2], (feat_dim, n_channels)) * scale).astype(jnp.float32),
        "b_xz": (jax.random.normal(ks[3], (feat_dim,)) * scale).astype(jnp.float32),
        "w_xy": (jax.random.normal(ks[4], (feat_dim, n_channels)) * scale).astype(jnp.float32),
        "b_xy": (jax.random.normal(ks[5], (feat_dim,)) * scale).astype(jnp.float32),
    }


def triplane_gen_ref(spatial_volume, params):
    """Pure-JAX reference mirroring the PyTorch forward."""
    vol = spatial_volume
    yz = jnp.mean(vol, axis=2)  # (N, C, H, W)
    xz = jnp.mean(vol, axis=3)  # (N, C, D, W)
    xy = jnp.mean(vol, axis=4)  # (N, C, D, H)

    def conv1x1(w, b, x):
        return jnp.einsum("oc,nchw->nohw", w, x) + b[None, :, None, None]

    yz = conv1x1(params["w_yz"], params["b_yz"], yz)
    xz = conv1x1(params["w_xz"], params["b_xz"], xz)
    xy = conv1x1(params["w_xy"], params["b_xy"], xy)
    return xy, xz, yz


def _check(out, ref):
    for a, b in zip(out, ref):
        assert a.shape == b.shape, (a.shape, b.shape)
        assert jnp.allclose(a, b, atol=1e-4, rtol=1e-4)


if __name__ == "__main__":
    N, C, D, H, W = 2, 4, 16, 16, 16
    feat_dim = 8

    key = jax.random.PRNGKey(0)
    k_vol, k_par = jax.random.split(key)
    spatial_volume = jax.random.normal(k_vol, (N, C, D, H, W), dtype=jnp.float32)
    params = make_params(k_par, C, feat_dim)

    # Case 1: small slab budget so the depth axis is actually tiled (TD=8 -> two
    # d-steps), exercising the accumulator init/finalize path.  N=2 -> no split.
    xy, xz, yz = triplane_gen(spatial_volume, params, slab_budget_bytes=48 * 1024)
    jax.block_until_ready((xy, xz, yz))
    xy_r, xz_r, yz_r = triplane_gen_ref(spatial_volume, params)
    assert xy.shape == (N, feat_dim, D, H)
    assert xz.shape == (N, feat_dim, D, W)
    assert yz.shape == (N, feat_dim, H, W)
    _check((xy, xz, yz), (xy_r, xz_r, yz_r))

    # Case 2: N=1 triggers the extra "split" parallel grid axis (dual-TensorCore
    # path on v7x) with per-split yz partial sums combined outside the kernel.
    vol1 = spatial_volume[:1]
    out1 = triplane_gen(vol1, params, slab_budget_bytes=48 * 1024)
    jax.block_until_ready(out1)
    _check(out1, triplane_gen_ref(vol1, params))

    print("KERNEL_OK")
</pallas_src>

<mosaic_0001>
module attributes {stable_mosaic.version = 11 : i64} {
  func.func @kernel(%arg0: i32, %arg1: i32, %arg2: i32, %arg3: memref<1x4x8x256xf32, #tpu.memory_space<vmem>>, %arg4: memref<256x32xbf16, #tpu.memory_space<vmem>>, %arg5: memref<8x4xf32, #tpu.memory_space<vmem>>, %arg6: memref<16x4xf32, #tpu.memory_space<vmem>>, %arg7: memref<8x1xf32, #tpu.memory_space<vmem>>, %arg8: memref<8x1xf32, #tpu.memory_space<vmem>>, %arg9: memref<1x8x128xf32, #tpu.memory_space<vmem>>, %arg10: memref<1x8x128xf32, #tpu.memory_space<vmem>>, %arg11: memref<1x1x8x256xf32, #tpu.memory_space<vmem>>, %arg12: memref<4x256xf32, #tpu.memory_space<vmem>>, %arg13: memref<4x8x32xf32, #tpu.memory_space<vmem>>) attributes {dimension_semantics = [#tpu.dimension_semantics<parallel>, #tpu.dimension_semantics<parallel>, #tpu.dimension_semantics<arbitrary>], iteration_bounds = array<i64: 2, 1, 2>, scalar_prefetch = 0 : i64, scratch_operands = 2 : i64, tpu.core_type = #tpu.core_type<tc>, window_params = [{transform_indices = @transform_0, window_bounds = array<i64: 1, 4, 8, 256>}, {pipeline_mode = #tpu.pipeline_mode<synchronous>, transform_indices = @transform_1, window_bounds = array<i64: 256, 32>}, {pipeline_mode = #tpu.pipeline_mode<synchronous>, transform_indices = @transform_2, window_bounds = array<i64: 8, 4>}, {pipeline_mode = #tpu.pipeline_mode<synchronous>, transform_indices = @transform_3, window_bounds = array<i64: 16, 4>}, {pipeline_mode = #tpu.pipeline_mode<synchronous>, transform_indices = @transform_4, window_bounds = array<i64: 8, 1>}, {pipeline_mode = #tpu.pipeline_mode<synchronous>, transform_indices = @transform_5, window_bounds = array<i64: 8, 1>}, {transform_indices = @transform_6, window_bounds = array<i64: 1, 8, 128>}, {transform_indices = @transform_7, window_bounds = array<i64: 1, 8, 128>}, {transform_indices = @transform_8, window_bounds = array<i64: 1, 1, 8, 256>}]} {
    %c0_i32 = arith.constant 0 : i32
    %0 = arith.cmpi eq, %arg2, %c0_i32 : i32
    %1 = arith.extui %0 : i1 to i32
    %c0_i32_0 = arith.constant 0 : i32
    %2 = arith.cmpi ne, %1, %c0_i32_0 : i32
    scf.if %2 {
      %cst_87 = arith.constant 0.000000e+00 : f32
      %141 = vector.broadcast %cst_87 : f32 to vector<4x256xf32>
      %c0_88 = arith.constant 0 : index
      %c0_89 = arith.constant 0 : index
      %142 = vector.load %arg12[%c0_88, %c0_89] : memref<4x256xf32, #tpu.memory_space<vmem>>, vector<4x256xf32>
      tpu.vector_store %arg12[%c0_88, %c0_89], %141 {strides = array<i32>} : memref<4x256xf32, #tpu.memory_space<vmem>>, vector<4x256xf32>,
    } else {
    }
    %c0 = arith.constant 0 : index
    %c0_1 = arith.constant 0 : index
    %c0_2 = arith.constant 0 : index
    %c0_3 = arith.constant 0 : index
    %3 = vector.load %arg3[%c0, %c0_1, %c0_2, %c0_3] : memref<1x4x8x256xf32, #tpu.memory_space<vmem>>, vector<1x4x8x256xf32>
    %4 = vector.shape_cast %3 : vector<1x4x8x256xf32> to vector<4x8x256xf32>
    %c0_4 = arith.constant 0 : index
    %c0_5 = arith.constant 0 : index
    %5 = vector.load %arg12[%c0_4, %c0_5] : memref<4x256xf32, #tpu.memory_space<vmem>>, vector<4x256xf32>
    %cst = arith.constant dense<0.000000e+00> : vector<4x256xf32>
    %6 = vector.multi_reduction <add>, %4, %cst [1] : vector<4x8x256xf32> to vector<4x256xf32>
    %7 = arith.addf %5, %6 : vector<4x256xf32>
    %c0_6 = arith.constant 0 : index
    %c0_7 = arith.constant 0 : index
    %8 = vector.load %arg12[%c0_6, %c0_7] : memref<4x256xf32, #tpu.memory_space<vmem>>, vector<4x256xf32>
    tpu.vector_store %arg12[%c0_6, %c0_7], %7 {strides = array<i32>} : memref<4x256xf32, #tpu.memory_space<vmem>>, vector<4x256xf32>,
    %9 = vector.shape_cast %4 : vector<4x8x256xf32> to vector<32x256xf32>
    %c0_8 = arith.constant 0 : index
    %c0_9 = arith.constant 0 : index
    %10 = vector.load %arg4[%c0_8, %c0_9] : memref<256x32xbf16, #tpu.memory_space<vmem>>, vector<256x32xbf16>
    %11 = arith.extf %10 : vector<256x32xbf16> to vector<256x32xf32>
    %cst_10 = arith.constant dense<0.000000e+00> : vector<32x32xf32>
    %12 = tpu.matmul %9, %11, %cst_10 {dimension_numbers = #tpu.dot_dimension_numbers<[1], [0], [0], [1], [0, 0, 1, 1], [], []>} : vector<32x256xf32>, vector<256x32xf32>, vector<32x32xf32> -> vector<32x32xf32>
    %13 = vector.shape_cast %12 : vector<32x32xf32> to vector<4x8x32xf32>
    %c0_11 = arith.constant 0 : index
    %c0_12 = arith.constant 0 : index
    %c0_13 = arith.constant 0 : index
    %14 = vector.load %arg13[%c0_11, %c0_12, %c0_13] : memref<4x8x32xf32, #tpu.memory_space<vmem>>, vector<4x8x32xf32>
    tpu.vector_store %arg13[%c0_11, %c0_12, %c0_13], %13 {strides = array<i32>} : memref<4x8x32xf32, #tpu.memory_space<vmem>>, vector<4x8x32xf32>,
    %c0_14 = arith.constant 0 : index
    %c0_15 = arith.constant 0 : index
    %15 = vector.load %arg6[%c0_14, %c0_15] : memref<16x4xf32, #tpu.memory_space<vmem>>, vector<16x4xf32>
    %c0_16 = arith.constant 0 : index
    %c0_17 = arith.constant 0 : index
    %16 = vector.load %arg7[%c0_16, %c0_17] : memref<8x1xf32, #tpu.memory_space<vmem>>, vector<8x1xf32>
    %c0_18 = arith.constant 0 : index
    %c0_19 = arith.constant 0 : index
    %17 = vector.load %arg8[%c0_18, %c0_19] : memref<8x1xf32, #tpu.memory_space<vmem>>, vector<8x1xf32>
    %c0_20 = arith.constant 0 : index
    %c0_21 = arith.constant 0 : index
    %c0_22 = arith.constant 0 : index
    %18 = vector.load %arg13[%c0_20, %c0_21, %c0_22] : memref<4x8x32xf32, #tpu.memory_space<vmem>>, vector<4x1x32xf32>
    %19 = vector.shape_cast %18 : vector<4x1x32xf32> to vector<4x32xf32>
    %cst_23 = arith.constant dense<0.000000e+00> : vector<16x32xf32>
    %20 = tpu.matmul %15, %19, %cst_23 {dimension_numbers = #tpu.dot_dimension_numbers<[1], [0], [0], [1], [0, 0, 1, 1], [], []>} : vector<16x4xf32>, vector<4x32xf32>, vector<16x32xf32> -> vector<16x32xf32>
    %21 = vector.extract_strided_slice %20 {offsets = [0, 0], sizes = [8, 16], strides = [1, 1]} : vector<16x32xf32> to vector<8x16xf32>
    %22 = vector.broadcast %16 : vector<8x1xf32> to vector<8x16xf32>
    %23 = arith.addf %21, %22 : vector<8x16xf32>
    %c0_24 = arith.constant 0 : index
    %c0_25 = arith.constant 0 : index
    %c0_26 = arith.constant 0 : index
    %24 = vector.load %arg10[%c0_24, %c0_25, %c0_26] : memref<1x8x128xf32, #tpu.memory_space<vmem>>, vector<1x8x16xf32>
    %25 = vector.shape_cast %24 : vector<1x8x16xf32> to vector<8x16xf32>
    %26 = vector.shape_cast %23 : vector<8x16xf32> to vector<1x8x16xf32>
    tpu.vector_store %arg10[%c0_24, %c0_25, %c0_26], %26 {strides = array<i32>} : memref<1x8x128xf32, #tpu.memory_space<vmem>>, vector<1x8x16xf32>,
    %27 = vector.extract_strided_slice %20 {offsets = [8, 16], sizes = [8, 16], strides = [1, 1]} : vector<16x32xf32> to vector<8x16xf32>
    %28 = vector.broadcast %17 : vector<8x1xf32> to vector<8x16xf32>
    %29 = arith.addf %27, %28 : vector<8x16xf32>
    %c0_27 = arith.constant 0 : index
    %c0_28 = arith.constant 0 : index
    %c0_29 = arith.constant 0 : index
    %30 = vector.load %arg9[%c0_27, %c0_28, %c0_29] : memref<1x8x128xf32, #tpu.memory_space<vmem>>, vector<1x8x16xf32>
    %31 = vector.shape_cast %30 : vector<1x8x16xf32> to vector<8x16xf32>
    %32 = vector.shape_cast %29 : vector<8x16xf32> to vector<1x8x16xf32>
    tpu.vector_store %arg9[%c0_27, %c0_28, %c0_29], %32 {strides = array<i32>} : memref<1x8x128xf32, #tpu.memory_space<vmem>>, vector<1x8x16xf32>,
    %c0_30 = arith.constant 0 : index
    %c1 = arith.constant 1 : index
    %c0_31 = arith.constant 0 : index
    %33 = vector.load %arg13[%c0_30, %c1, %c0_31] : memref<4x8x32xf32, #tpu.memory_space<vmem>>, vector<4x1x32xf32>
    %34 = vector.shape_cast %33 : vector<4x1x32xf32> to vector<4x32xf32>
    %cst_32 = arith.constant dense<0.000000e+00> : vector<16x32xf32>
    %35 = tpu.matmul %15, %34, %cst_32 {dimension_numbers = #tpu.dot_dimension_numbers<[1], [0], [0], [1], [0, 0, 1, 1], [], []>} : vector<16x4xf32>, vector<4x32xf32>, vector<16x32xf32> -> vector<16x32xf32>
    %36 = vector.extract_strided_slice %35 {offsets = [0, 0], sizes = [8, 16], strides = [1, 1]} : vector<16x32xf32> to vector<8x16xf32>
    %37 = vector.broadcast %16 : vector<8x1xf32> to vector<8x16xf32>
    %38 = arith.addf %36, %37 : vector<8x16xf32>
    %c0_33 = arith.constant 0 : index
    %c0_34 = arith.constant 0 : index
    %c16 = arith.constant 16 : index
    %39 = vector.load %arg10[%c0_33, %c0_34, %c16] : memref<1x8x128xf32, #tpu.memory_space<vmem>>, vector<1x8x16xf32>
    %40 = vector.shape_cast %39 : vector<1x8x16xf32> to vector<8x16xf32>
    %41 = vector.shape_cast %38 : vector<8x16xf32> to vector<1x8x16xf32>
    tpu.vector_store %arg10[%c0_33, %c0_34, %c16], %41 {strides = array<i32>} : memref<1x8x128xf32, #tpu.memory_space<vmem>>, vector<1x8x16xf32>,
    %42 = vector.extract_strided_slice %35 {offsets = [8, 16], sizes = [8, 16], strides = [1, 1]} : vector<16x32xf32> to vector<8x16xf32>
    %43 = vector.broadcast %17 : vector<8x1xf32> to vector<8x16xf32>
    %44 = arith.addf %42, %43 : vector<8x16xf32>
    %c0_35 = arith.constant 0 : index
    %c0_36 = arith.constant 0 : index
    %c16_37 = arith.constant 16 : index
    %45 = vector.load %arg9[%c0_35, %c0_36, %c16_37] : memref<1x8x128xf32, #tpu.memory_space<vmem>>, vector<1x8x16xf32>
    %46 = vector.shape_cast %45 : vector<1x8x16xf32> to vector<8x16xf32>
    %47 = vector.shape_cast %44 : vector<8x16xf32> to vector<1x8x16xf32>
    tpu.vector_store %arg9[%c0_35, %c0_36, %c16_37], %47 {strides = array<i32>} : memref<1x8x128xf32, #tpu.memory_space<vmem>>, vector<1x8x16xf32>,
    %c0_38 = arith.constant 0 : index
    %c2 = arith.constant 2 : index
    %c0_39 = arith.constant 0 : index
    %48 = vector.load %arg13[%c0_38, %c2, %c0_39] : memref<4x8x32xf32, #tpu.memory_space<vmem>>, vector<4x1x32xf32>
    %49 = vector.shape_cast %48 : vector<4x1x32xf32> to vector<4x32xf32>
    %cst_40 = arith.constant dense<0.000000e+00> : vector<16x32xf32>
    %50 = tpu.matmul %15, %49, %cst_40 {dimension_numbers = #tpu.dot_dimension_numbers<[1], [0], [0], [1], [0, 0, 1, 1], [], []>} : vector<16x4xf32>, vector<4x32xf32>, vector<16x32xf32> -> vector<16x32xf32>
    %51 = vector.extract_strided_slice %50 {offsets = [0, 0], sizes = [8, 16], strides = [1, 1]} : vector<16x32xf32> to vector<8x16xf32>
    %52 = vector.broadcast %16 : vector<8x1xf32> to vector<8x16xf32>
    %53 = arith.addf %51, %52 : vector<8x16xf32>
    %c0_41 = arith.constant 0 : index
    %c0_42 = arith.constant 0 : index
    %c32 = arith.constant 32 : index
    %54 = vector.load %arg10[%c0_41, %c0_42, %c32] : memref<1x8x128xf32, #tpu.memory_space<vmem>>, vector<1x8x16xf32>
    %55 = vector.shape_cast %54 : vector<1x8x16xf32> to vector<8x16xf32>
    %56 = vector.shape_cast %53 : vector<8x16xf32> to vector<1x8x16xf32>
    tpu.vector_store %arg10[%c0_41, %c0_42, %c32], %56 {strides = array<i32>} : memref<1x8x128xf32, #tpu.memory_space<vmem>>, vector<1x8x16xf32>,
    %57 = vector.extract_strided_slice %50 {offsets = [8, 16], sizes = [8, 16], strides = [1, 1]} : vector<16x32xf32> to vector<8x16xf32>
    %58 = vector.broadcast %17 : vector<8x1xf32> to vector<8x16xf32>
    %59 = arith.addf %57, %58 : vector<8x16xf32>
    %c0_43 = arith.constant 0 : index
    %c0_44 = arith.constant 0 : index
    %c32_45 = arith.constant 32 : index
    %60 = vector.load %arg9[%c0_43, %c0_44, %c32_45] : memref<1x8x128xf32, #tpu.memory_space<vmem>>, vector<1x8x16xf32>
    %61 = vector.shape_cast %60 : vector<1x8x16xf32> to vector<8x16xf32>
    %62 = vector.shape_cast %59 : vector<8x16xf32> to vector<1x8x16xf32>
    tpu.vector_store %arg9[%c0_43, %c0_44, %c32_45], %62 {strides = array<i32>} : memref<1x8x128xf32, #tpu.memory_space<vmem>>, vector<1x8x16xf32>,
    %c0_46 = arith.constant 0 : index
    %c3 = arith.constant 3 : index
    %c0_47 = arith.constant 0 : index
    %63 = vector.load %arg13[%c0_46, %c3, %c0_47] : memref<4x8x32xf32, #tpu.memory_space<vmem>>, vector<4x1x32xf32>
    %64 = vector.shape_cast %63 : vector<4x1x32xf32> to vector<4x32xf32>
    %cst_48 = arith.constant dense<0.000000e+00> : vector<16x32xf32>
    %65 = tpu.matmul %15, %64, %cst_48 {dimension_numbers = #tpu.dot_dimension_numbers<[1], [0], [0], [1], [0, 0, 1, 1], [], []>} : vector<16x4xf32>, vector<4x32xf32>, vector<16x32xf32> -> vector<16x32xf32>
    %66 = vector.extract_strided_slice %65 {offsets = [0, 0], sizes = [8, 16], strides = [1, 1]} : vector<16x32xf32> to vector<8x16xf32>
    %67 = vector.broadcast %16 : vector<8x1xf32> to vector<8x16xf32>
    %68 = arith.addf %66, %67 : vector<8x16xf32>
    %c0_49 = arith.constant 0 : index
    %c0_50 = arith.constant 0 : index
    %c48 = arith.constant 48 : index
    %69 = vector.load %arg10[%c0_49, %c0_50, %c48] : memref<1x8x128xf32, #tpu.memory_space<vmem>>, vector<1x8x16xf32>
    %70 = vector.shape_cast %69 : vector<1x8x16xf32> to vector<8x16xf32>
    %71 = vector.shape_cast %68 : vector<8x16xf32> to vector<1x8x16xf32>
    tpu.vector_store %arg10[%c0_49, %c0_50, %c48], %71 {strides = array<i32>} : memref<1x8x128xf32, #tpu.memory_space<vmem>>, vector<1x8x16xf32>,
    %72 = vector.extract_strided_slice %65 {offsets = [8, 16], sizes = [8, 16], strides = [1, 1]} : vector<16x32xf32> to vector<8x16xf32>
    %73 = vector.broadcast %17 : vector<8x1xf32> to vector<8x16xf32>
    %74 = arith.addf %72, %73 : vector<8x16xf32>
    %c0_51 = arith.constant 0 : index
    %c0_52 = arith.constant 0 : index
    %c48_53 = arith.constant 48 : index
    %75 = vector.load %arg9[%c0_51, %c0_52, %c48_53] : memref<1x8x128xf32, #tpu.memory_space<vmem>>, vector<1x8x16xf32>
    %76 = vector.shape_cast %75 : vector<1x8x16xf32> to vector<8x16xf32>
    %77 = vector.shape_cast %74 : vector<8x16xf32> to vector<1x8x16xf32>
    tpu.vector_store %arg9[%c0_51, %c0_52, %c48_53], %77 {strides = array<i32>} : memref<1x8x128xf32, #tpu.memory_space<vmem>>, vector<1x8x16xf32>,
    %c0_54 = arith.constant 0 : index
    %c4 = arith.constant 4 : index
    %c0_55 = arith.constant 0 : index
    %78 = vector.load %arg13[%c0_54, %c4, %c0_55] : memref<4x8x32xf32, #tpu.memory_space<vmem>>, vector<4x1x32xf32>
    %79 = vector.shape_cast %78 : vector<4x1x32xf32> to vector<4x32xf32>
    %cst_56 = arith.constant dense<0.000000e+00> : vector<16x32xf32>
    %80 = tpu.matmul %15, %79, %cst_56 {dimension_numbers = #tpu.dot_dimension_numbers<[1], [0], [0], [1], [0, 0, 1, 1], [], []>} : vector<16x4xf32>, vector<4x32xf32>, vector<16x32xf32> -> vector<16x32xf32>
    %81 = vector.extract_strided_slice %80 {offsets = [0, 0], sizes = [8, 16], strides = [1, 1]} : vector<16x32xf32> to vector<8x16xf32>
    %82 = vector.broadcast %16 : vector<8x1xf32> to vector<8x16xf32>
    %83 = arith.addf %81, %82 : vector<8x16xf32>
    %c0_57 = arith.constant 0 : index
    %c0_58 = arith.constant 0 : index
    %c64 = arith.constant 64 : index
    %84 = vector.load %arg10[%c0_57, %c0_58, %c64] : memref<1x8x128xf32, #tpu.memory_space<vmem>>, vector<1x8x16xf32>
    %85 = vector.shape_cast %84 : vector<1x8x16xf32> to vector<8x16xf32>
    %86 = vector.shape_cast %83 : vector<8x16xf32> to vector<1x8x16xf32>
    tpu.vector_store %arg10[%c0_57, %c0_58, %c64], %86 {strides = array<i32>} : memref<1x8x128xf32, #tpu.memory_space<vmem>>, vector<1x8x16xf32>,
    %87 = vector.extract_strided_slice %80 {offsets = [8, 16], sizes = [8, 16], strides = [1, 1]} : vector<16x32xf32> to vector<8x16xf32>
    %88 = vector.broadcast %17 : vector<8x1xf32> to vector<8x16xf32>
    %89 = arith.addf %87, %88 : vector<8x16xf32>
    %c0_59 = arith.constant 0 : index
    %c0_60 = arith.constant 0 : index
    %c64_61 = arith.constant 64 : index
    %90 = vector.load %arg9[%c0_59, %c0_60, %c64_61] : memref<1x8x128xf32, #tpu.memory_space<vmem>>, vector<1x8x16xf32>
    %91 = vector.shape_cast %90 : vector<1x8x16xf32> to vector<8x16xf32>
    %92 = vector.shape_cast %89 : vector<8x16xf32> to vector<1x8x16xf32>
    tpu.vector_store %arg9[%c0_59, %c0_60, %c64_61], %92 {strides = array<i32>} : memref<1x8x128xf32, #tpu.memory_space<vmem>>, vector<1x8x16xf32>,
    %c0_62 = arith.constant 0 : index
    %c5 = arith.constant 5 : index
    %c0_63 = arith.constant 0 : index
    %93 = vector.load %arg13[%c0_62, %c5, %c0_63] : memref<4x8x32xf32, #tpu.memory_space<vmem>>, vector<4x1x32xf32>
    %94 = vector.shape_cast %93 : vector<4x1x32xf32> to vector<4x32xf32>
    %cst_64 = arith.constant dense<0.000000e+00> : vector<16x32xf32>
    %95 = tpu.matmul %15, %94, %cst_64 {dimension_numbers = #tpu.dot_dimension_numbers<[1], [0], [0], [1], [0, 0, 1, 1], [], []>} : vector<16x4xf32>, vector<4x32xf32>, vector<16x32xf32> -> vector<16x32xf32>
    %96 = vector.extract_strided_slice %95 {offsets = [0, 0], sizes = [8, 16], strides = [1, 1]} : vector<16x32xf32> to vector<8x16xf32>
    %97 = vector.broadcast %16 : vector<8x1xf32> to vector<8x16xf32>
    %98 = arith.addf %96, %97 : vector<8x16xf32>
    %c0_65 = arith.constant 0 : index
    %c0_66 = arith.constant 0 : index
    %c80 = arith.constant 80 : index
    %99 = vector.load %arg10[%c0_65, %c0_66, %c80] : memref<1x8x128xf32, #tpu.memory_space<vmem>>, vector<1x8x16xf32>
    %100 = vector.shape_cast %99 : vector<1x8x16xf32> to vector<8x16xf32>
    %101 = vector.shape_cast %98 : vector<8x16xf32> to vector<1x8x16xf32>
    tpu.vector_store %arg10[%c0_65, %c0_66, %c80], %101 {strides = array<i32>} : memref<1x8x128xf32, #tpu.memory_space<vmem>>, vector<1x8x16xf32>,
    %102 = vector.extract_strided_slice %95 {offsets = [8, 16], sizes = [8, 16], strides = [1, 1]} : vector<16x32xf32> to vector<8x16xf32>
    %103 = vector.broadcast %17 : vector<8x1xf32> to vector<8x16xf32>
    %104 = arith.addf %102, %103 : vector<8x16xf32>
    %c0_67 = arith.constant 0 : index
    %c0_68 = arith.constant 0 : index
    %c80_69 = arith.constant 80 : index
    %105 = vector.load %arg9[%c0_67, %c0_68, %c80_69] : memref<1x8x128xf32, #tpu.memory_space<vmem>>, vector<1x8x16xf32>
    %106 = vector.shape_cast %105 : vector<1x8x16xf32> to vector<8x16xf32>
    %107 = vector.shape_cast %104 : vector<8x16xf32> to vector<1x8x16xf32>
    tpu.vector_store %arg9[%c0_67, %c0_68, %c80_69], %107 {strides = array<i32>} : memref<1x8x128xf32, #tpu.memory_space<vmem>>, vector<1x8x16xf32>,
    %c0_70 = arith.constant 0 : index
    %c6 = arith.constant 6 : index
    %c0_71 = arith.constant 0 : index
    %108 = vector.load %arg13[%c0_70, %c6, %c0_71] : memref<4x8x32xf32, #tpu.memory_space<vmem>>, vector<4x1x32xf32>
    %109 = vector.shape_cast %108 : vector<4x1x32xf32> to vector<4x32xf32>
    %cst_72 = arith.constant dense<0.000000e+00> : vector<16x32xf32>
    %110 = tpu.matmul %15, %109, %cst_72 {dimension_numbers = #tpu.dot_dimension_numbers<[1], [0], [0], [1], [0, 0, 1, 1], [], []>} : vector<16x4xf32>, vector<4x32xf32>, vector<16x32xf32> -> vector<16x32xf32>
    %111 = vector.extract_strided_slice %110 {offsets = [0, 0], sizes = [8, 16], strides = [1, 1]} : vector<16x32xf32> to vector<8x16xf32>
    %112 = vector.broadcast %16 : vector<8x1xf32> to vector<8x16xf32>
    %113 = arith.addf %111, %112 : vector<8x16xf32>
    %c0_73 = arith.constant 0 : index
    %c0_74 = arith.constant 0 : index
    %c96 = arith.constant 96 : index
    %114 = vector.load %arg10[%c0_73, %c0_74, %c96] : memref<1x8x128xf32, #tpu.memory_space<vmem>>, vector<1x8x16xf32>
    %115 = vector.shape_cast %114 : vector<1x8x16xf32> to vector<8x16xf32>
    %116 = vector.shape_cast %113 : vector<8x16xf32> to vector<1x8x16xf32>
    tpu.vector_store %arg10[%c0_73, %c0_74, %c96], %116 {strides = array<i32>} : memref<1x8x128xf32, #tpu.memory_space<vmem>>, vector<1x8x16xf32>,
    %117 = vector.extract_strided_slice %110 {offsets = [8, 16], sizes = [8, 16], strides = [1, 1]} : vector<16x32xf32> to vector<8x16xf32>
    %118 = vector.broadcast %17 : vector<8x1xf32> to vector<8x16xf32>
    %119 = arith.addf %117, %118 : vector<8x16xf32>
    %c0_75 = arith.constant 0 : index
    %c0_76 = arith.constant 0 : index
    %c96_77 = arith.constant 96 : index
    %120 = vector.load %arg9[%c0_75, %c0_76, %c96_77] : memref<1x8x128xf32, #tpu.memory_space<vmem>>, vector<1x8x16xf32>
    %121 = vector.shape_cast %120 : vector<1x8x16xf32> to vector<8x16xf32>
    %122 = vector.shape_cast %119 : vector<8x16xf32> to vector<1x8x16xf32>
    tpu.vector_store %arg9[%c0_75, %c0_76, %c96_77], %122 {strides = array<i32>} : memref<1x8x128xf32, #tpu.memory_space<vmem>>, vector<1x8x16xf32>,
    %c0_78 = arith.constant 0 : index
    %c7 = arith.constant 7 : index
    %c0_79 = arith.constant 0 : index
    %123 = vector.load %arg13[%c0_78, %c7, %c0_79] : memref<4x8x32xf32, #tpu.memory_space<vmem>>, vector<4x1x32xf32>
    %124 = vector.shape_cast %123 : vector<4x1x32xf32> to vector<4x32xf32>
    %cst_80 = arith.constant dense<0.000000e+00> : vector<16x32xf32>
    %125 = tpu.matmul %15, %124, %cst_80 {dimension_numbers = #tpu.dot_dimension_numbers<[1], [0], [0], [1], [0, 0, 1, 1], [], []>} : vector<16x4xf32>, vector<4x32xf32>, vector<16x32xf32> -> vector<16x32xf32>
    %126 = vector.extract_strided_slice %125 {offsets = [0, 0], sizes = [8, 16], strides = [1, 1]} : vector<16x32xf32> to vector<8x16xf32>
    %127 = vector.broadcast %16 : vector<8x1xf32> to vector<8x16xf32>
    %128 = arith.addf %126, %127 : vector<8x16xf32>
    %c0_81 = arith.constant 0 : index
    %c0_82 = arith.constant 0 : index
    %c112 = arith.constant 112 : index
    %129 = vector.load %arg10[%c0_81, %c0_82, %c112] : memref<1x8x128xf32, #tpu.memory_space<vmem>>, vector<1x8x16xf32>
    %130 = vector.shape_cast %129 : vector<1x8x16xf32> to vector<8x16xf32>
    %131 = vector.shape_cast %128 : vector<8x16xf32> to vector<1x8x16xf32>
    tpu.vector_store %arg10[%c0_81, %c0_82, %c112], %131 {strides = array<i32>} : memref<1x8x128xf32, #tpu.memory_space<vmem>>, vector<1x8x16xf32>,
    %132 = vector.extract_strided_slice %125 {offsets = [8, 16], sizes = [8, 16], strides = [1, 1]} : vector<16x32xf32> to vector<8x16xf32>
    %133 = vector.broadcast %17 : vector<8x1xf32> to vector<8x16xf32>
    %134 = arith.addf %132, %133 : vector<8x16xf32>
    %c0_83 = arith.constant 0 : index
    %c0_84 = arith.constant 0 : index
    %c112_85 = arith.constant 112 : index
    %135 = vector.load %arg9[%c0_83, %c0_84, %c112_85] : memref<1x8x128xf32, #tpu.memory_space<vmem>>, vector<1x8x16xf32>
    %136 = vector.shape_cast %135 : vector<1x8x16xf32> to vector<8x16xf32>
    %137 = vector.shape_cast %134 : vector<8x16xf32> to vector<1x8x16xf32>
    tpu.vector_store %arg9[%c0_83, %c0_84, %c112_85], %137 {strides = array<i32>} : memref<1x8x128xf32, #tpu.memory_space<vmem>>, vector<1x8x16xf32>,
    %c1_i32 = arith.constant 1 : i32
    %138 = arith.cmpi eq, %arg2, %c1_i32 : i32
    %139 = arith.extui %138 : i1 to i32
    %c0_i32_86 = arith.constant 0 : i32
    %140 = arith.cmpi ne, %139, %c0_i32_86 : i32
    scf.if %140 {
      %c0_87 = arith.constant 0 : index
      %c0_88 = arith.constant 0 : index
      %141 = vector.load %arg5[%c0_87, %c0_88] : memref<8x4xf32, #tpu.memory_space<vmem>>, vector<8x4xf32>
      %c0_89 = arith.constant 0 : index
      %c0_90 = arith.constant 0 : index
      %142 = vector.load %arg12[%c0_89, %c0_90] : memref<4x256xf32, #tpu.memory_space<vmem>>, vector<4x256xf32>
      %cst_91 = arith.constant dense<0.000000e+00> : vector<8x256xf32>
      %143 = tpu.matmul %141, %142, %cst_91 {dimension_numbers = #tpu.dot_dimension_numbers<[1], [0], [0], [1], [0, 0, 1, 1], [], []>} : vector<8x4xf32>, vector<4x256xf32>, vector<8x256xf32> -> vector<8x256xf32>
      %c0_92 = arith.constant 0 : index
      %c0_93 = arith.constant 0 : index
      %c0_94 = arith.constant 0 : index
      %c0_95 = arith.constant 0 : index
      %144 = vector.load %arg11[%c0_92, %c0_93, %c0_94, %c0_95] : memref<1x1x8x256xf32, #tpu.memory_space<vmem>>, vector<1x1x8x256xf32>
      %145 = vector.shape_cast %144 : vector<1x1x8x256xf32> to vector<8x256xf32>
      %146 = vector.shape_cast %143 : vector<8x256xf32> to vector<1x1x8x256xf32>
      tpu.vector_store %arg11[%c0_92, %c0_93, %c0_94, %c0_95], %146 {strides = array<i32>} : memref<1x1x8x256xf32, #tpu.memory_space<vmem>>, vector<1x1x8x256xf32>,
    } else {
    }
    return
  }
  func.func @transform_0(%arg0: i32, %arg1: i32, %arg2: i32) -> (i32, i32, i32, i32) {
    %c2_i32 = arith.constant 2 : i32
    %0 = arith.muli %arg1, %c2_i32 : i32
    %1 = arith.addi %0, %arg2 : i32
    %c0_i32 = arith.constant 0 : i32
    %c0_i32_0 = arith.constant 0 : i32
    %c0_i32_1 = arith.constant 0 : i32
    return %arg0, %c0_i32, %1, %c0_i32_0 : i32, i32, i32, i32
  }
  func.func @transform_1(%arg0: i32, %arg1: i32, %arg2: i32) -> (i32, i32) {
    %c0_i32 = arith.constant 0 : i32
    %c0_i32_0 = arith.constant 0 : i32
    %c0_i32_1 = arith.constant 0 : i32
    return %c0_i32, %c0_i32_0 : i32, i32
  }
  func.func @transform_2(%arg0: i32, %arg1: i32, %arg2: i32) -> (i32, i32) {
    %c0_i32 = arith.constant 0 : i32
    %c0_i32_0 = arith.constant 0 : i32
    %c0_i32_1 = arith.constant 0 : i32
    return %c0_i32, %c0_i32_0 : i32, i32
  }
  func.func @transform_3(%arg0: i32, %arg1: i32, %arg2: i32) -> (i32, i32) {
    %c0_i32 = arith.constant 0 : i32
    %c0_i32_0 = arith.constant 0 : i32
    %c0_i32_1 = arith.constant 0 : i32
    return %c0_i32, %c0_i32_0 : i32, i32
  }
  func.func @transform_4(%arg0: i32, %arg1: i32, %arg2: i32) -> (i32, i32) {
    %c0_i32 = arith.constant 0 : i32
    %c0_i32_0 = arith.constant 0 : i32
    %c0_i32_1 = arith.constant 0 : i32
    return %c0_i32, %c0_i32_0 : i32, i32
  }
  func.func @transform_5(%arg0: i32, %arg1: i32, %arg2: i32) -> (i32, i32) {
    %c0_i32 = arith.constant 0 : i32
    %c0_i32_0 = arith.constant 0 : i32
    %c0_i32_1 = arith.constant 0 : i32
    return %c0_i32, %c0_i32_0 : i32, i32
  }
  func.func @transform_6(%arg0: i32, %arg1: i32, %arg2: i32) -> (i32, i32, i32) {
    %c2_i32 = arith.constant 2 : i32
    %0 = arith.muli %arg1, %c2_i32 : i32
    %1 = arith.addi %0, %arg2 : i32
    %c0_i32 = arith.constant 0 : i32
    %c0_i32_0 = arith.constant 0 : i32
    return %arg0, %c0_i32, %1 : i32, i32, i32
  }
  func.func @transform_7(%arg0: i32, %arg1: i32, %arg2: i32) -> (i32, i32, i32) {
    %c2_i32 = arith.constant 2 : i32
    %0 = arith.muli %arg1, %c2_i32 : i32
    %1 = arith.addi %0, %arg2 : i32
    %c0_i32 = arith.constant 0 : i32
    %c0_i32_0 = arith.constant 0 : i32
    return %arg0, %c0_i32, %1 : i32, i32, i32
  }
  func.func @transform_8(%arg0: i32, %arg1: i32, %arg2: i32) -> (i32, i32, i32, i32) {
    %c0_i32 = arith.constant 0 : i32
    %c0_i32_0 = arith.constant 0 : i32
    %c0_i32_1 = arith.constant 0 : i32
    return %arg1, %arg0, %c0_i32, %c0_i32_0 : i32, i32, i32, i32
  }
}

module attributes {stable_mosaic.version = 11 : i64} {
  func.func @kernel(%arg0: i32, %arg1: i32, %arg2: i32, %arg3: memref<1x4x8x256xf32, #tpu.memory_space<vmem>>, %arg4: memref<256x32xbf16, #tpu.memory_space<vmem>>, %arg5: memref<8x4xf32, #tpu.memory_space<vmem>>, %arg6: memref<16x4xf32, #tpu.memory_space<vmem>>, %arg7: memref<8x1xf32, #tpu.memory_space<vmem>>, %arg8: memref<8x1xf32, #tpu.memory_space<vmem>>, %arg9: memref<1x8x128xf32, #tpu.memory_space<vmem>>, %arg10: memref<1x8x128xf32, #tpu.memory_space<vmem>>, %arg11: memref<1x1x8x256xf32, #tpu.memory_space<vmem>>, %arg12: memref<4x256xf32, #tpu.memory_space<vmem>>, %arg13: memref<4x8x32xf32, #tpu.memory_space<vmem>>) attributes {dimension_semantics = [#tpu.dimension_semantics<parallel>, #tpu.dimension_semantics<parallel>, #tpu.dimension_semantics<arbitrary>], iteration_bounds = array<i64: 2, 1, 2>, scalar_prefetch = 0 : i64, scratch_operands = 2 : i64, tpu.core_type = #tpu.core_type<tc>, window_params = [{transform_indices = @transform_0, window_bounds = array<i64: 1, 4, 8, 256>}, {pipeline_mode = #tpu.pipeline_mode<synchronous>, transform_indices = @transform_1, window_bounds = array<i64: 256, 32>}, {pipeline_mode = #tpu.pipeline_mode<synchronous>, transform_indices = @transform_2, window_bounds = array<i64: 8, 4>}, {pipeline_mode = #tpu.pipeline_mode<synchronous>, transform_indices = @transform_3, window_bounds = array<i64: 16, 4>}, {pipeline_mode = #tpu.pipeline_mode<synchronous>, transform_indices = @transform_4, window_bounds = array<i64: 8, 1>}, {pipeline_mode = #tpu.pipeline_mode<synchronous>, transform_indices = @transform_5, window_bounds = array<i64: 8, 1>}, {transform_indices = @transform_6, window_bounds = array<i64: 1, 8, 128>}, {transform_indices = @transform_7, window_bounds = array<i64: 1, 8, 128>}, {transform_indices = @transform_8, window_bounds = array<i64: 1, 1, 8, 256>}]} {
    %c0_i32 = arith.constant 0 : i32
    %0 = arith.cmpi eq, %arg2, %c0_i32 : i32
    %1 = arith.extui %0 : i1 to i32
    %c0_i32_0 = arith.constant 0 : i32
    %2 = arith.cmpi ne, %1, %c0_i32_0 : i32
    scf.if %2 {
      %cst_87 = arith.constant 0.000000e+00 : f32
      %141 = vector.broadcast %cst_87 : f32 to vector<4x256xf32>
      %c0_88 = arith.constant 0 : index
      %c0_89 = arith.constant 0 : index
      %142 = vector.load %arg12[%c0_88, %c0_89] : memref<4x256xf32, #tpu.memory_space<vmem>>, vector<4x256xf32>
      tpu.vector_store %arg12[%c0_88, %c0_89], %141 {strides = array<i32>} : memref<4x256xf32, #tpu.memory_space<vmem>>, vector<4x256xf32>,
    } else {
    }
    %c0 = arith.constant 0 : index
    %c0_1 = arith.constant 0 : index
    %c0_2 = arith.constant 0 : index
    %c0_3 = arith.constant 0 : index
    %3 = vector.load %arg3[%c0, %c0_1, %c0_2, %c0_3] : memref<1x4x8x256xf32, #tpu.memory_space<vmem>>, vector<1x4x8x256xf32>
    %4 = vector.shape_cast %3 : vector<1x4x8x256xf32> to vector<4x8x256xf32>
    %c0_4 = arith.constant 0 : index
    %c0_5 = arith.constant 0 : index
    %5 = vector.load %arg12[%c0_4, %c0_5] : memref<4x256xf32, #tpu.memory_space<vmem>>, vector<4x256xf32>
    %cst = arith.constant dense<0.000000e+00> : vector<4x256xf32>
    %6 = vector.multi_reduction <add>, %4, %cst [1] : vector<4x8x256xf32> to vector<4x256xf32>
    %7 = arith.addf %5, %6 : vector<4x256xf32>
    %c0_6 = arith.constant 0 : index
    %c0_7 = arith.constant 0 : index
    %8 = vector.load %arg12[%c0_6, %c0_7] : memref<4x256xf32, #tpu.memory_space<vmem>>, vector<4x256xf32>
    tpu.vector_store %arg12[%c0_6, %c0_7], %7 {strides = array<i32>} : memref<4x256xf32, #tpu.memory_space<vmem>>, vector<4x256xf32>,
    %9 = vector.shape_cast %4 : vector<4x8x256xf32> to vector<32x256xf32>
    %c0_8 = arith.constant 0 : index
    %c0_9 = arith.constant 0 : index
    %10 = vector.load %arg4[%c0_8, %c0_9] : memref<256x32xbf16, #tpu.memory_space<vmem>>, vector<256x32xbf16>
    %11 = arith.extf %10 : vector<256x32xbf16> to vector<256x32xf32>
    %cst_10 = arith.constant dense<0.000000e+00> : vector<32x32xf32>
    %12 = tpu.matmul %9, %11, %cst_10 {dimension_numbers = #tpu.dot_dimension_numbers<[1], [0], [0], [1], [0, 0, 1, 1], [], []>} : vector<32x256xf32>, vector<256x32xf32>, vector<32x32xf32> -> vector<32x32xf32>
    %13 = vector.shape_cast %12 : vector<32x32xf32> to vector<4x8x32xf32>
    %c0_11 = arith.constant 0 : index
    %c0_12 = arith.constant 0 : index
    %c0_13 = arith.constant 0 : index
    %14 = vector.load %arg13[%c0_11, %c0_12, %c0_13] : memref<4x8x32xf32, #tpu.memory_space<vmem>>, vector<4x8x32xf32>
    tpu.vector_store %arg13[%c0_11, %c0_12, %c0_13], %13 {strides = array<i32>} : memref<4x8x32xf32, #tpu.memory_space<vmem>>, vector<4x8x32xf32>,
    %c0_14 = arith.constant 0 : index
    %c0_15 = arith.constant 0 : index
    %15 = vector.load %arg6[%c0_14, %c0_15] : memref<16x4xf32, #tpu.memory_space<vmem>>, vector<16x4xf32>
    %c0_16 = arith.constant 0 : index
    %c0_17 = arith.constant 0 : index
    %16 = vector.load %arg7[%c0_16, %c0_17] : memref<8x1xf32, #tpu.memory_space<vmem>>, vector<8x1xf32>
    %c0_18 = arith.constant 0 : index
    %c0_19 = arith.constant 0 : index
    %17 = vector.load %arg8[%c0_18, %c0_19] : memref<8x1xf32, #tpu.memory_space<vmem>>, vector<8x1xf32>
    %c0_20 = arith.constant 0 : index
    %c0_21 = arith.constant 0 : index
    %c0_22 = arith.constant 0 : index
    %18 = vector.load %arg13[%c0_20, %c0_21, %c0_22] : memref<4x8x32xf32, #tpu.memory_space<vmem>>, vector<4x1x32xf32>
    %19 = vector.shape_cast %18 : vector<4x1x32xf32> to vector<4x32xf32>
    %cst_23 = arith.constant dense<0.000000e+00> : vector<16x32xf32>
    %20 = tpu.matmul %15, %19, %cst_23 {dimension_numbers = #tpu.dot_dimension_numbers<[1], [0], [0], [1], [0, 0, 1, 1], [], []>} : vector<16x4xf32>, vector<4x32xf32>, vector<16x32xf32> -> vector<16x32xf32>
    %21 = vector.extract_strided_slice %20 {offsets = [0, 0], sizes = [8, 16], strides = [1, 1]} : vector<16x32xf32> to vector<8x16xf32>
    %22 = vector.broadcast %16 : vector<8x1xf32> to vector<8x16xf32>
    %23 = arith.addf %21, %22 : vector<8x16xf32>
    %c0_24 = arith.constant 0 : index
    %c0_25 = arith.constant 0 : index
    %c0_26 = arith.constant 0 : index
    %24 = vector.load %arg10[%c0_24, %c0_25, %c0_26] : memref<1x8x128xf32, #tpu.memory_space<vmem>>, vector<1x8x16xf32>
    %25 = vector.shape_cast %24 : vector<1x8x16xf32> to vector<8x16xf32>
    %26 = vector.shape_cast %23 : vector<8x16xf32> to vector<1x8x16xf32>
    tpu.vector_store %arg10[%c0_24, %c0_25, %c0_26], %26 {strides = array<i32>} : memref<1x8x128xf32, #tpu.memory_space<vmem>>, vector<1x8x16xf32>,
    %27 = vector.extract_strided_slice %20 {offsets = [8, 16], sizes = [8, 16], strides = [1, 1]} : vector<16x32xf32> to vector<8x16xf32>
    %28 = vector.broadcast %17 : vector<8x1xf32> to vector<8x16xf32>
    %29 = arith.addf %27, %28 : vector<8x16xf32>
    %c0_27 = arith.constant 0 : index
    %c0_28 = arith.constant 0 : index
    %c0_29 = arith.constant 0 : index
    %30 = vector.load %arg9[%c0_27, %c0_28, %c0_29] : memref<1x8x128xf32, #tpu.memory_space<vmem>>, vector<1x8x16xf32>
    %31 = vector.shape_cast %30 : vector<1x8x16xf32> to vector<8x16xf32>
    %32 = vector.shape_cast %29 : vector<8x16xf32> to vector<1x8x16xf32>
    tpu.vector_store %arg9[%c0_27, %c0_28, %c0_29], %32 {strides = array<i32>} : memref<1x8x128xf32, #tpu.memory_space<vmem>>, vector<1x8x16xf32>,
    %c0_30 = arith.constant 0 : index
    %c1 = arith.constant 1 : index
    %c0_31 = arith.constant 0 : index
    %33 = vector.load %arg13[%c0_30, %c1, %c0_31] : memref<4x8x32xf32, #tpu.memory_space<vmem>>, vector<4x1x32xf32>
    %34 = vector.shape_cast %33 : vector<4x1x32xf32> to vector<4x32xf32>
    %cst_32 = arith.constant dense<0.000000e+00> : vector<16x32xf32>
    %35 = tpu.matmul %15, %34, %cst_32 {dimension_numbers = #tpu.dot_dimension_numbers<[1], [0], [0], [1], [0, 0, 1, 1], [], []>} : vector<16x4xf32>, vector<4x32xf32>, vector<16x32xf32> -> vector<16x32xf32>
    %36 = vector.extract_strided_slice %35 {offsets = [0, 0], sizes = [8, 16], strides = [1, 1]} : vector<16x32xf32> to vector<8x16xf32>
    %37 = vector.broadcast %16 : vector<8x1xf32> to vector<8x16xf32>
    %38 = arith.addf %36, %37 : vector<8x16xf32>
    %c0_33 = arith.constant 0 : index
    %c0_34 = arith.constant 0 : index
    %c16 = arith.constant 16 : index
    %39 = vector.load %arg10[%c0_33, %c0_34, %c16] : memref<1x8x128xf32, #tpu.memory_space<vmem>>, vector<1x8x16xf32>
    %40 = vector.shape_cast %39 : vector<1x8x16xf32> to vector<8x16xf32>
    %41 = vector.shape_cast %38 : vector<8x16xf32> to vector<1x8x16xf32>
    tpu.vector_store %arg10[%c0_33, %c0_34, %c16], %41 {strides = array<i32>} : memref<1x8x128xf32, #tpu.memory_space<vmem>>, vector<1x8x16xf32>,
    %42 = vector.extract_strided_slice %35 {offsets = [8, 16], sizes = [8, 16], strides = [1, 1]} : vector<16x32xf32> to vector<8x16xf32>
    %43 = vector.broadcast %17 : vector<8x1xf32> to vector<8x16xf32>
    %44 = arith.addf %42, %43 : vector<8x16xf32>
    %c0_35 = arith.constant 0 : index
    %c0_36 = arith.constant 0 : index
    %c16_37 = arith.constant 16 : index
    %45 = vector.load %arg9[%c0_35, %c0_36, %c16_37] : memref<1x8x128xf32, #tpu.memory_space<vmem>>, vector<1x8x16xf32>
    %46 = vector.shape_cast %45 : vector<1x8x16xf32> to vector<8x16xf32>
    %47 = vector.shape_cast %44 : vector<8x16xf32> to vector<1x8x16xf32>
    tpu.vector_store %arg9[%c0_35, %c0_36, %c16_37], %47 {strides = array<i32>} : memref<1x8x128xf32, #tpu.memory_space<vmem>>, vector<1x8x16xf32>,
    %c0_38 = arith.constant 0 : index
    %c2 = arith.constant 2 : index
    %c0_39 = arith.constant 0 : index
    %48 = vector.load %arg13[%c0_38, %c2, %c0_39] : memref<4x8x32xf32, #tpu.memory_space<vmem>>, vector<4x1x32xf32>
    %49 = vector.shape_cast %48 : vector<4x1x32xf32> to vector<4x32xf32>
    %cst_40 = arith.constant dense<0.000000e+00> : vector<16x32xf32>
    %50 = tpu.matmul %15, %49, %cst_40 {dimension_numbers = #tpu.dot_dimension_numbers<[1], [0], [0], [1], [0, 0, 1, 1], [], []>} : vector<16x4xf32>, vector<4x32xf32>, vector<16x32xf32> -> vector<16x32xf32>
    %51 = vector.extract_strided_slice %50 {offsets = [0, 0], sizes = [8, 16], strides = [1, 1]} : vector<16x32xf32> to vector<8x16xf32>
    %52 = vector.broadcast %16 : vector<8x1xf32> to vector<8x16xf32>
    %53 = arith.addf %51, %52 : vector<8x16xf32>
    %c0_41 = arith.constant 0 : index
    %c0_42 = arith.constant 0 : index
    %c32 = arith.constant 32 : index
    %54 = vector.load %arg10[%c0_41, %c0_42, %c32] : memref<1x8x128xf32, #tpu.memory_space<vmem>>, vector<1x8x16xf32>
    %55 = vector.shape_cast %54 : vector<1x8x16xf32> to vector<8x16xf32>
    %56 = vector.shape_cast %53 : vector<8x16xf32> to vector<1x8x16xf32>
    tpu.vector_store %arg10[%c0_41, %c0_42, %c32], %56 {strides = array<i32>} : memref<1x8x128xf32, #tpu.memory_space<vmem>>, vector<1x8x16xf32>,
    %57 = vector.extract_strided_slice %50 {offsets = [8, 16], sizes = [8, 16], strides = [1, 1]} : vector<16x32xf32> to vector<8x16xf32>
    %58 = vector.broadcast %17 : vector<8x1xf32> to vector<8x16xf32>
    %59 = arith.addf %57, %58 : vector<8x16xf32>
    %c0_43 = arith.constant 0 : index
    %c0_44 = arith.constant 0 : index
    %c32_45 = arith.constant 32 : index
    %60 = vector.load %arg9[%c0_43, %c0_44, %c32_45] : memref<1x8x128xf32, #tpu.memory_space<vmem>>, vector<1x8x16xf32>
    %61 = vector.shape_cast %60 : vector<1x8x16xf32> to vector<8x16xf32>
    %62 = vector.shape_cast %59 : vector<8x16xf32> to vector<1x8x16xf32>
    tpu.vector_store %arg9[%c0_43, %c0_44, %c32_45], %62 {strides = array<i32>} : memref<1x8x128xf32, #tpu.memory_space<vmem>>, vector<1x8x16xf32>,
    %c0_46 = arith.constant 0 : index
    %c3 = arith.constant 3 : index
    %c0_47 = arith.constant 0 : index
    %63 = vector.load %arg13[%c0_46, %c3, %c0_47] : memref<4x8x32xf32, #tpu.memory_space<vmem>>, vector<4x1x32xf32>
    %64 = vector.shape_cast %63 : vector<4x1x32xf32> to vector<4x32xf32>
    %cst_48 = arith.constant dense<0.000000e+00> : vector<16x32xf32>
    %65 = tpu.matmul %15, %64, %cst_48 {dimension_numbers = #tpu.dot_dimension_numbers<[1], [0], [0], [1], [0, 0, 1, 1], [], []>} : vector<16x4xf32>, vector<4x32xf32>, vector<16x32xf32> -> vector<16x32xf32>
    %66 = vector.extract_strided_slice %65 {offsets = [0, 0], sizes = [8, 16], strides = [1, 1]} : vector<16x32xf32> to vector<8x16xf32>
    %67 = vector.broadcast %16 : vector<8x1xf32> to vector<8x16xf32>
    %68 = arith.addf %66, %67 : vector<8x16xf32>
    %c0_49 = arith.constant 0 : index
    %c0_50 = arith.constant 0 : index
    %c48 = arith.constant 48 : index
    %69 = vector.load %arg10[%c0_49, %c0_50, %c48] : memref<1x8x128xf32, #tpu.memory_space<vmem>>, vector<1x8x16xf32>
    %70 = vector.shape_cast %69 : vector<1x8x16xf32> to vector<8x16xf32>
    %71 = vector.shape_cast %68 : vector<8x16xf32> to vector<1x8x16xf32>
    tpu.vector_store %arg10[%c0_49, %c0_50, %c48], %71 {strides = array<i32>} : memref<1x8x128xf32, #tpu.memory_space<vmem>>, vector<1x8x16xf32>,
    %72 = vector.extract_strided_slice %65 {offsets = [8, 16], sizes = [8, 16], strides = [1, 1]} : vector<16x32xf32> to vector<8x16xf32>
    %73 = vector.broadcast %17 : vector<8x1xf32> to vector<8x16xf32>
    %74 = arith.addf %72, %73 : vector<8x16xf32>
    %c0_51 = arith.constant 0 : index
    %c0_52 = arith.constant 0 : index
    %c48_53 = arith.constant 48 : index
    %75 = vector.load %arg9[%c0_51, %c0_52, %c48_53] : memref<1x8x128xf32, #tpu.memory_space<vmem>>, vector<1x8x16xf32>
    %76 = vector.shape_cast %75 : vector<1x8x16xf32> to vector<8x16xf32>
    %77 = vector.shape_cast %74 : vector<8x16xf32> to vector<1x8x16xf32>
    tpu.vector_store %arg9[%c0_51, %c0_52, %c48_53], %77 {strides = array<i32>} : memref<1x8x128xf32, #tpu.memory_space<vmem>>, vector<1x8x16xf32>,
    %c0_54 = arith.constant 0 : index
    %c4 = arith.constant 4 : index
    %c0_55 = arith.constant 0 : index
    %78 = vector.load %arg13[%c0_54, %c4, %c0_55] : memref<4x8x32xf32, #tpu.memory_space<vmem>>, vector<4x1x32xf32>
    %79 = vector.shape_cast %78 : vector<4x1x32xf32> to vector<4x32xf32>
    %cst_56 = arith.constant dense<0.000000e+00> : vector<16x32xf32>
    %80 = tpu.matmul %15, %79, %cst_56 {dimension_numbers = #tpu.dot_dimension_numbers<[1], [0], [0], [1], [0, 0, 1, 1], [], []>} : vector<16x4xf32>, vector<4x32xf32>, vector<16x32xf32> -> vector<16x32xf32>
    %81 = vector.extract_strided_slice %80 {offsets = [0, 0], sizes = [8, 16], strides = [1, 1]} : vector<16x32xf32> to vector<8x16xf32>
    %82 = vector.broadcast %16 : vector<8x1xf32> to vector<8x16xf32>
    %83 = arith.addf %81, %82 : vector<8x16xf32>
    %c0_57 = arith.constant 0 : index
    %c0_58 = arith.constant 0 : index
    %c64 = arith.constant 64 : index
    %84 = vector.load %arg10[%c0_57, %c0_58, %c64] : memref<1x8x128xf32, #tpu.memory_space<vmem>>, vector<1x8x16xf32>
    %85 = vector.shape_cast %84 : vector<1x8x16xf32> to vector<8x16xf32>
    %86 = vector.shape_cast %83 : vector<8x16xf32> to vector<1x8x16xf32>
    tpu.vector_store %arg10[%c0_57, %c0_58, %c64], %86 {strides = array<i32>} : memref<1x8x128xf32, #tpu.memory_space<vmem>>, vector<1x8x16xf32>,
    %87 = vector.extract_strided_slice %80 {offsets = [8, 16], sizes = [8, 16], strides = [1, 1]} : vector<16x32xf32> to vector<8x16xf32>
    %88 = vector.broadcast %17 : vector<8x1xf32> to vector<8x16xf32>
    %89 = arith.addf %87, %88 : vector<8x16xf32>
    %c0_59 = arith.constant 0 : index
    %c0_60 = arith.constant 0 : index
    %c64_61 = arith.constant 64 : index
    %90 = vector.load %arg9[%c0_59, %c0_60, %c64_61] : memref<1x8x128xf32, #tpu.memory_space<vmem>>, vector<1x8x16xf32>
    %91 = vector.shape_cast %90 : vector<1x8x16xf32> to vector<8x16xf32>
    %92 = vector.shape_cast %89 : vector<8x16xf32> to vector<1x8x16xf32>
    tpu.vector_store %arg9[%c0_59, %c0_60, %c64_61], %92 {strides = array<i32>} : memref<1x8x128xf32, #tpu.memory_space<vmem>>, vector<1x8x16xf32>,
    %c0_62 = arith.constant 0 : index
    %c5 = arith.constant 5 : index
    %c0_63 = arith.constant 0 : index
    %93 = vector.load %arg13[%c0_62, %c5, %c0_63] : memref<4x8x32xf32, #tpu.memory_space<vmem>>, vector<4x1x32xf32>
    %94 = vector.shape_cast %93 : vector<4x1x32xf32> to vector<4x32xf32>
    %cst_64 = arith.constant dense<0.000000e+00> : vector<16x32xf32>
    %95 = tpu.matmul %15, %94, %cst_64 {dimension_numbers = #tpu.dot_dimension_numbers<[1], [0], [0], [1], [0, 0, 1, 1], [], []>} : vector<16x4xf32>, vector<4x32xf32>, vector<16x32xf32> -> vector<16x32xf32>
    %96 = vector.extract_strided_slice %95 {offsets = [0, 0], sizes = [8, 16], strides = [1, 1]} : vector<16x32xf32> to vector<8x16xf32>
    %97 = vector.broadcast %16 : vector<8x1xf32> to vector<8x16xf32>
    %98 = arith.addf %96, %97 : vector<8x16xf32>
    %c0_65 = arith.constant 0 : index
    %c0_66 = arith.constant 0 : index
    %c80 = arith.constant 80 : index
    %99 = vector.load %arg10[%c0_65, %c0_66, %c80] : memref<1x8x128xf32, #tpu.memory_space<vmem>>, vector<1x8x16xf32>
    %100 = vector.shape_cast %99 : vector<1x8x16xf32> to vector<8x16xf32>
    %101 = vector.shape_cast %98 : vector<8x16xf32> to vector<1x8x16xf32>
    tpu.vector_store %arg10[%c0_65, %c0_66, %c80], %101 {strides = array<i32>} : memref<1x8x128xf32, #tpu.memory_space<vmem>>, vector<1x8x16xf32>,
    %102 = vector.extract_strided_slice %95 {offsets = [8, 16], sizes = [8, 16], strides = [1, 1]} : vector<16x32xf32> to vector<8x16xf32>
    %103 = vector.broadcast %17 : vector<8x1xf32> to vector<8x16xf32>
    %104 = arith.addf %102, %103 : vector<8x16xf32>
    %c0_67 = arith.constant 0 : index
    %c0_68 = arith.constant 0 : index
    %c80_69 = arith.constant 80 : index
    %105 = vector.load %arg9[%c0_67, %c0_68, %c80_69] : memref<1x8x128xf32, #tpu.memory_space<vmem>>, vector<1x8x16xf32>
    %106 = vector.shape_cast %105 : vector<1x8x16xf32> to vector<8x16xf32>
    %107 = vector.shape_cast %104 : vector<8x16xf32> to vector<1x8x16xf32>
    tpu.vector_store %arg9[%c0_67, %c0_68, %c80_69], %107 {strides = array<i32>} : memref<1x8x128xf32, #tpu.memory_space<vmem>>, vector<1x8x16xf32>,
    %c0_70 = arith.constant 0 : index
    %c6 = arith.constant 6 : index
    %c0_71 = arith.constant 0 : index
    %108 = vector.load %arg13[%c0_70, %c6, %c0_71] : memref<4x8x32xf32, #tpu.memory_space<vmem>>, vector<4x1x32xf32>
    %109 = vector.shape_cast %108 : vector<4x1x32xf32> to vector<4x32xf32>
    %cst_72 = arith.constant dense<0.000000e+00> : vector<16x32xf32>
    %110 = tpu.matmul %15, %109, %cst_72 {dimension_numbers = #tpu.dot_dimension_numbers<[1], [0], [0], [1], [0, 0, 1, 1], [], []>} : vector<16x4xf32>, vector<4x32xf32>, vector<16x32xf32> -> vector<16x32xf32>
    %111 = vector.extract_strided_slice %110 {offsets = [0, 0], sizes = [8, 16], strides = [1, 1]} : vector<16x32xf32> to vector<8x16xf32>
    %112 = vector.broadcast %16 : vector<8x1xf32> to vector<8x16xf32>
    %113 = arith.addf %111, %112 : vector<8x16xf32>
    %c0_73 = arith.constant 0 : index
    %c0_74 = arith.constant 0 : index
    %c96 = arith.constant 96 : index
    %114 = vector.load %arg10[%c0_73, %c0_74, %c96] : memref<1x8x128xf32, #tpu.memory_space<vmem>>, vector<1x8x16xf32>
    %115 = vector.shape_cast %114 : vector<1x8x16xf32> to vector<8x16xf32>
    %116 = vector.shape_cast %113 : vector<8x16xf32> to vector<1x8x16xf32>
    tpu.vector_store %arg10[%c0_73, %c0_74, %c96], %116 {strides = array<i32>} : memref<1x8x128xf32, #tpu.memory_space<vmem>>, vector<1x8x16xf32>,
    %117 = vector.extract_strided_slice %110 {offsets = [8, 16], sizes = [8, 16], strides = [1, 1]} : vector<16x32xf32> to vector<8x16xf32>
    %118 = vector.broadcast %17 : vector<8x1xf32> to vector<8x16xf32>
    %119 = arith.addf %117, %118 : vector<8x16xf32>
    %c0_75 = arith.constant 0 : index
    %c0_76 = arith.constant 0 : index
    %c96_77 = arith.constant 96 : index
    %120 = vector.load %arg9[%c0_75, %c0_76, %c96_77] : memref<1x8x128xf32, #tpu.memory_space<vmem>>, vector<1x8x16xf32>
    %121 = vector.shape_cast %120 : vector<1x8x16xf32> to vector<8x16xf32>
    %122 = vector.shape_cast %119 : vector<8x16xf32> to vector<1x8x16xf32>
    tpu.vector_store %arg9[%c0_75, %c0_76, %c96_77], %122 {strides = array<i32>} : memref<1x8x128xf32, #tpu.memory_space<vmem>>, vector<1x8x16xf32>,
    %c0_78 = arith.constant 0 : index
    %c7 = arith.constant 7 : index
    %c0_79 = arith.constant 0 : index
    %123 = vector.load %arg13[%c0_78, %c7, %c0_79] : memref<4x8x32xf32, #tpu.memory_space<vmem>>, vector<4x1x32xf32>
    %124 = vector.shape_cast %123 : vector<4x1x32xf32> to vector<4x32xf32>
    %cst_80 = arith.constant dense<0.000000e+00> : vector<16x32xf32>
    %125 = tpu.matmul %15, %124, %cst_80 {dimension_numbers = #tpu.dot_dimension_numbers<[1], [0], [0], [1], [0, 0, 1, 1], [], []>} : vector<16x4xf32>, vector<4x32xf32>, vector<16x32xf32> -> vector<16x32xf32>
    %126 = vector.extract_strided_slice %125 {offsets = [0, 0], sizes = [8, 16], strides = [1, 1]} : vector<16x32xf32> to vector<8x16xf32>
    %127 = vector.broadcast %16 : vector<8x1xf32> to vector<8x16xf32>
    %128 = arith.addf %126, %127 : vector<8x16xf32>
    %c0_81 = arith.constant 0 : index
    %c0_82 = arith.constant 0 : index
    %c112 = arith.constant 112 : index
    %129 = vector.load %arg10[%c0_81, %c0_82, %c112] : memref<1x8x128xf32, #tpu.memory_space<vmem>>, vector<1x8x16xf32>
    %130 = vector.shape_cast %129 : vector<1x8x16xf32> to vector<8x16xf32>
    %131 = vector.shape_cast %128 : vector<8x16xf32> to vector<1x8x16xf32>
    tpu.vector_store %arg10[%c0_81, %c0_82, %c112], %131 {strides = array<i32>} : memref<1x8x128xf32, #tpu.memory_space<vmem>>, vector<1x8x16xf32>,
    %132 = vector.extract_strided_slice %125 {offsets = [8, 16], sizes = [8, 16], strides = [1, 1]} : vector<16x32xf32> to vector<8x16xf32>
    %133 = vector.broadcast %17 : vector<8x1xf32> to vector<8x16xf32>
    %134 = arith.addf %132, %133 : vector<8x16xf32>
    %c0_83 = arith.constant 0 : index
    %c0_84 = arith.constant 0 : index
    %c112_85 = arith.constant 112 : index
    %135 = vector.load %arg9[%c0_83, %c0_84, %c112_85] : memref<1x8x128xf32, #tpu.memory_space<vmem>>, vector<1x8x16xf32>
    %136 = vector.shape_cast %135 : vector<1x8x16xf32> to vector<8x16xf32>
    %137 = vector.shape_cast %134 : vector<8x16xf32> to vector<1x8x16xf32>
    tpu.vector_store %arg9[%c0_83, %c0_84, %c112_85], %137 {strides = array<i32>} : memref<1x8x128xf32, #tpu.memory_space<vmem>>, vector<1x8x16xf32>,
    %c1_i32 = arith.constant 1 : i32
    %138 = arith.cmpi eq, %arg2, %c1_i32 : i32
    %139 = arith.extui %138 : i1 to i32
    %c0_i32_86 = arith.constant 0 : i32
    %140 = arith.cmpi ne, %139, %c0_i32_86 : i32
    scf.if %140 {
      %c0_87 = arith.constant 0 : index
      %c0_88 = arith.constant 0 : index
      %141 = vector.load %arg5[%c0_87, %c0_88] : memref<8x4xf32, #tpu.memory_space<vmem>>, vector<8x4xf32>
      %c0_89 = arith.constant 0 : index
      %c0_90 = arith.constant 0 : index
      %142 = vector.load %arg12[%c0_89, %c0_90] : memref<4x256xf32, #tpu.memory_space<vmem>>, vector<4x256xf32>
      %cst_91 = arith.constant dense<0.000000e+00> : vector<8x256xf32>
      %143 = tpu.matmul %141, %142, %cst_91 {dimension_numbers = #tpu.dot_dimension_numbers<[1], [0], [0], [1], [0, 0, 1, 1], [], []>} : vector<8x4xf32>, vector<4x256xf32>, vector<8x256xf32> -> vector<8x256xf32>
      %c0_92 = arith.constant 0 : index
      %c0_93 = arith.constant 0 : index
      %c0_94 = arith.constant 0 : index
      %c0_95 = arith.constant 0 : index
      %144 = vector.load %arg11[%c0_92, %c0_93, %c0_94, %c0_95] : memref<1x1x8x256xf32, #tpu.memory_space<vmem>>, vector<1x1x8x256xf32>
      %145 = vector.shape_cast %144 : vector<1x1x8x256xf32> to vector<8x256xf32>
      %146 = vector.shape_cast %143 : vector<8x256xf32> to vector<1x1x8x256xf32>
      tpu.vector_store %arg11[%c0_92, %c0_93, %c0_94, %c0_95], %146 {strides = array<i32>} : memref<1x1x8x256xf32, #tpu.memory_space<vmem>>, vector<1x1x8x256xf32>,
    } else {
    }
    return
  }
  func.func @transform_0(%arg0: i32, %arg1: i32, %arg2: i32) -> (i32, i32, i32, i32) {
    %c2_i32 = arith.constant 2 : i32
    %0 = arith.muli %arg1, %c2_i32 : i32
    %1 = arith.addi %0, %arg2 : i32
    %c0_i32 = arith.constant 0 : i32
    %c0_i32_0 = arith.constant 0 : i32
    %c0_i32_1 = arith.constant 0 : i32
    return %arg0, %c0_i32, %1, %c0_i32_0 : i32, i32, i32, i32
  }
  func.func @transform_1(%arg0: i32, %arg1: i32, %arg2: i32) -> (i32, i32) {
    %c0_i32 = arith.constant 0 : i32
    %c0_i32_0 = arith.constant 0 : i32
    %c0_i32_1 = arith.constant 0 : i32
    return %c0_i32, %c0_i32_0 : i32, i32
  }
  func.func @transform_2(%arg0: i32, %arg1: i32, %arg2: i32) -> (i32, i32) {
    %c0_i32 = arith.constant 0 : i32
    %c0_i32_0 = arith.constant 0 : i32
    %c0_i32_1 = arith.constant 0 : i32
    return %c0_i32, %c0_i32_0 : i32, i32
  }
  func.func @transform_3(%arg0: i32, %arg1: i32, %arg2: i32) -> (i32, i32) {
    %c0_i32 = arith.constant 0 : i32
    %c0_i32_0 = arith.constant 0 : i32
    %c0_i32_1 = arith.constant 0 : i32
    return %c0_i32, %c0_i32_0 : i32, i32
  }
  func.func @transform_4(%arg0: i32, %arg1: i32, %arg2: i32) -> (i32, i32) {
    %c0_i32 = arith.constant 0 : i32
    %c0_i32_0 = arith.constant 0 : i32
    %c0_i32_1 = arith.constant 0 : i32
    return %c0_i32, %c0_i32_0 : i32, i32
  }
  func.func @transform_5(%arg0: i32, %arg1: i32, %arg2: i32) -> (i32, i32) {
    %c0_i32 = arith.constant 0 : i32
    %c0_i32_0 = arith.constant 0 : i32
    %c0_i32_1 = arith.constant 0 : i32
    return %c0_i32, %c0_i32_0 : i32, i32
  }
  func.func @transform_6(%arg0: i32, %arg1: i32, %arg2: i32) -> (i32, i32, i32) {
    %c2_i32 = arith.constant 2 : i32
    %0 = arith.muli %arg1, %c2_i32 : i32
    %1 = arith.addi %0, %arg2 : i32
    %c0_i32 = arith.constant 0 : i32
    %c0_i32_0 = arith.constant 0 : i32
    return %arg0, %c0_i32, %1 : i32, i32, i32
  }
  func.func @transform_7(%arg0: i32, %arg1: i32, %arg2: i32) -> (i32, i32, i32) {
    %c2_i32 = arith.constant 2 : i32
    %0 = arith.muli %arg1, %c2_i32 : i32
    %1 = arith.addi %0, %arg2 : i32
    %c0_i32 = arith.constant 0 : i32
    %c0_i32_0 = arith.constant 0 : i32
    return %arg0, %c0_i32, %1 : i32, i32, i32
  }
  func.func @transform_8(%arg0: i32, %arg1: i32, %arg2: i32) -> (i32, i32, i32, i32) {
    %c0_i32 = arith.constant 0 : i32
    %c0_i32_0 = arith.constant 0 : i32
    %c0_i32_1 = arith.constant 0 : i32
    return %arg1, %arg0, %c0_i32, %c0_i32_0 : i32, i32, i32, i32
  }
}

</mosaic_0001>

<bundles_post_ra>
// kernel: tpu_custom_call.1
= control target key start
LH: loop header
LB: loop body
LE: loop exit
PB: predicated region body
PF: predicated region fallthrough
CT: control target
= control target key end

     0   :  { %s2957_s0 = inlined_call_operand.hbm [shape: f32[2,4,16,256], index: 0, kind: input, shape index: {}]   ;;  %s2958_s1 = inlined_call_operand.vmem [shape: bf16[256,32], index: 1, kind: input, shape index: {}]   ;;  %s2959_s2 = inlined_call_operand.vmem [shape: f32[8,4], index: 2, kind: input, shape index: {}]   ;;  %s2960_s3 = inlined_call_operand.vmem [shape: f32[16,4], index: 3, kind: input, shape index: {}]   ;;  %s2961_s4 = inlined_call_operand.vmem [shape: f32[8,1], index: 4, kind: input, shape index: {}]   ;;  %s2962_s5 = inlined_call_operand.vmem [shape: f32[8,1], index: 5, kind: input, shape index: {}]   ;;  %s2963_s6 = inlined_call_operand.hbm [shape: f32[2,8,256], index: 6, kind: output, shape index: {0}]   ;;  %s2964_s7 = inlined_call_operand.hbm [shape: f32[2,8,256], index: 7, kind: output, shape index: {1}]   ;;  %s2965_s8 = inlined_call_operand.hbm [shape: f32[1,2,8,256], index: 8, kind: output, shape index: {2}]  }
   0x1   :  { %2980 = sst [smem:[#allocation25_spill]] %s2957_s0 }
   0x2   :  { %2981 = sst [smem:[#allocation26_spill]] %s2958_s1 }
   0x3   :  { %2982 = sst [smem:[#allocation27_spill]] %s2959_s2 }
   0x4   :  { %2983 = sst [smem:[#allocation28_spill]] %s2960_s3 }
   0x5   :  { %2984 = sst [smem:[#allocation29_spill]] %s2963_s6 }
   0x6   :  { %2985 = sst [smem:[#allocation30_spill]] %s2964_s7 }
   0x7   :  { %2986 = sst [smem:[#allocation31_spill]] %s2965_s8 }
   0x8   :  { %14 = vsyncpa [#allocation5], 0 }
   0x9   :  { %16 = vsyncpa [#allocation5 + $0x1], 0 }
   0xa   :  { %17 = vsyncpa [#allocation6], 0 }
   0xb   :  { %19 = vsyncpa [#allocation6 + $0x1], 0 }
   0xc   :  { %20 = vsyncpa [#allocation9], 0 }
   0xd   :  { %22 = vsyncpa [#allocation9 + $0x1], 0  ;;  %s2433_s27 = smov 0   ;;  %s2435_s28 = smov 0  }
   0xe   :  { %s2437_s29 = smov 0   ;;  %s2439_s30 = smov 0  }
   0xf   :  { %s2441_s9 = smov 0   ;;  %s2443_s10 = smov 0  }
  0x10   :  { %s2445_s11 = smov 0   ;;  %s2447_s12 = smov 0  }
  0x11   :  { %s2449_s13 = smov 0   ;;  %s2451_s14 = smov 0  }
  0x12   :  { %s2453_s15 = smov 0  }
  0x13 LB: > { %2987 = sst [smem:[#allocation15_spill]] %s2337_s29  ;;  %s2489_s16 = sadd.s32 4294967295, %s2369_s15   ;;  %s2369_s15 = sphi %s2453_s15, %s28_s15   ;;  %s2365_s14 = sphi %s2451_s14, %s3026_s14   ;;  %s2361_s13 = sphi %s2449_s13, %s3032_s13   ;;  %s2357_s12 = sphi %s2447_s12, %s3024_s12   ;;  %s2353_s11 = sphi %s2445_s11, %s3031_s11   ;;  %s2349_s10 = sphi %s2443_s10, %s3023_s10   ;;  %s2345_s9 = sphi %s2441_s9, %s3030_s9   ;;  %s2341_s30 = sphi %s2439_s30, %s3029_s30   ;;  %s2337_s29 = sphi %s2437_s29, %s3021_s29   ;;  %s2333_s28 = sphi %s2435_s28, %s3028_s28   ;;  %s2329_s27 = sphi %s2433_s27, %s3027_s27  }
  0x14   : > { %2988 = sst [smem:[#allocation16_spill]] %s2341_s30  ;;  %s2971_s17 = sadd.s32 4294967294, %s2369_s15  }
  0x15   : > { %2989 = sst [smem:[#allocation17_spill]] %s2349_s10  ;;  %s40_s18 = sadd.s32 1, %s2361_s13 }
  0x16   : > { %2990 = sst [smem:[#allocation18_spill]] %s2365_s14  ;;  %s47_s19 = sadd.s32 1, %s2365_s14 }
  0x17   : > { %p41_p0 = scmp.ge.s32.totalorder %s40_s18, 2  ;;  %s60_s20 = sadd.s32 1, %s2349_s10 }
  0x18   : > { %p67_p1 = scmp.ne.s32.totalorder %s2349_s10, %s2345_s9  ;;  %p68_p2 = scmp.eq.s32.totalorder %s2369_s15, 0 }
  0x19   : > { %s3034_s18 = smov (%p41_p0, %s40_s18), 0  ;;  %s3036_s19 = smov (!%p41_p0, %s47_s19), %s2365_s14 }
  0x1a   : > { %2991 = sst [smem:[#allocation19_spill]] %s3034_s18  ;;  %s56_s21 = ssub.s32 %s2361_s13, %s3034_s18 }
  0x1b   : > { %p2503_p3 = por %p68_p2, %p67_p1  ;;  %p49_p4 = scmp.ge.s32.totalorder %s3036_s19, 2 }
  0x1c   : > { %p73_p5 = scmp.ne.s32.totalorder %s2345_s9, %s2341_s30  ;;  %p74_p6 = scmp.eq.s32.totalorder %s2489_s16, 0 }
  0x1d   : > { %p208_p7 = scmp.eq.s32.totalorder %s2489_s16, 3  ;;  %s3038_s19 = smov (%p49_p4, %s3036_s19), 0 }
  0x1e   : > { %2993 = sst [smem:[#allocation20_spill]] %s3038_s19  ;;  %p2513_p8 = por %p74_p6, %p73_p5 }
  0x1f   : > { %p2519_p9 = por %p208_p7, %p67_p1  ;;  %s55_s25 = ssub.s32 %s2365_s14, %s3038_s19 }
  0x20   : > { %p214_p10 = scmp.eq.s32.totalorder %s2971_s17, 3  ;;  %s57_s26 = sor.u32 %s56_s21, %s55_s25 }
  0x21   : > { %p255_p11 = scmp.eq.s32.totalorder %s55_s25, 0  ;;  %p58_p12 = scmp.eq.s32.totalorder %s57_s26, 0 }
  0x22   : > { %p2527_p13 = por %p214_p10, %p73_p5  ;;  %s257_s30 = sadd.s32 1, %s2337_s29 }
  0x23   : > { %p267_p0 = scmp.ne.s32.totalorder %s2337_s29, %s2333_s28  ;;  %p273_p2 = scmp.ne.s32.totalorder %s2333_s28, %s2329_s27 }
  0x24   : > { %s2996_s18 = scalar_select %p2527_p13, 1, 0 }
  0x25   : > { %s2535_s8 = scalar_select %p58_p12, %s2349_s10, %s60_s20  }
  0x26   : > { %2997 = sst [smem:[#allocation21_spill]] %s2996_s18  ;;  %p2542_p1 = por %p267_p0, %p208_p7 }
  0x27   : > { %2998 = sst [smem:[#allocation22_spill]] %s2535_s8  ;;  %p2056_p4 = scmp.lt.s32.totalorder %s2369_s15, 4 }
  0x28   : > { %s2538_s6 = scalar_select %p255_p11, %s2337_s29, %s257_s30  }
  0x29   : > { %s3000_s19 = scalar_select %p2542_p1, 1, 0 }
  0x2a   : > { %2999 = sst [smem:[#allocation23_spill]] %s2538_s6  ;;  %p2549_p6 = por %p273_p2, %p214_p10 }
  0x2b   : > { %3001 = sst [smem:[#allocation24_spill]] %s3000_s19  ;;  %s309_s25 = sand.u32 1, %s2349_s10  }
  0x2c   : > { %s3002_s21 = scalar_select %p2549_p6, 1, 0 }
  0x2d   : > { %s1797_s26 = sshll.u32 %s309_s25, 6  ;;  %s1798_s17 = sshll.u32 %s2361_s13, 1 }
  0x2e   : > { %s1799_s18 = sshll.u32 %s2365_s14, 4  ;;  %s313_s20 = scalar_lea.vmem [#allocation4], %s1797_s26 }
  0x2f   : > { %s324_s8 = sshll.u32 %s313_s20, 4  ;;  %s321_s30 = sadd.s32 %s1799_s18, %s1798_s17  ;;  %s325_s8 = int_to_ptr.vmem [resolvable:$true] %s324_s8 }
  0x30   : > { %s1800_s6 = sshll.u32 %s321_s30, 7  ;;  %p2558_p5 = pnand %p2056_p4, %p2503_p3 }
  0x31   : > { %s3004_s0 = sld [smem:[#allocation25_spill]]  ;;  %s310_s10 = scalar_lea.sflag [#allocation5], %s309_s25 }
  0x32   : > { %p2163_p10 = pneg %p2558_p5  ;;  %s2174_s14 = scalar_lea.vmem %s325_s8, 1024 }
  0x33   : > { %p2175_p11 = scmp.ne.s32.totalorder %s325_s8, %s2174_s14  ;;  %s2371_s17 = smov [#allocation4]  }
  0x34   : > { %s2179_s18 = sshll.u32 %s2371_s17, 4  ;;  %s2180_s18 = int_to_ptr.vmem [resolvable:$false] %s2179_s18 }
  0x35   : > { %p2177_p12 = pnand %p2175_p11, %p2163_p10  ;;  %s2181_s22 = scalar_lea.vmem %s2180_s18, 2048 }
  0x36   : > { %p2182_p3 = scmp.lt.s32.totalorder %s325_s8, %s2180_s18  ;;  %p2183_p2 = scmp.lt.s32.totalorder %s2181_s22, %s2174_s14 }
  0x37   : > { %s323_s7 = scalar_lea.hbm %s3004_s0, %s1800_s6  ;;  %p2178_p0 = pneg %p2177_p12 }
  0x38   : > { %p2184_p4 = por %p2183_p2, %p2182_p3 }
  0x3a   : > { %p2185_p6 = pnand %p2184_p4, %p2178_p0 }
  0x3c   : > { %2188 = shalt.err (!%p2185_p6)
}
  0x3d   : > { %s2372_s19 = smov 512   ;;  %s2373_s6 = smov 256  }
  0x3e   : > { %s2374_s25 = smov 16   ;;  %p332_p7 = scmp.lt.s32.totalorder %s2369_s15, 5 }
  0x3f   : > { %2045 = dma.hbm_to_vmem [thread:$0]  (!%p2558_p5), %s323_s7, 1024, %s325_s8, %s310_s10, %s2372_s19, %s2373_s6, %s2374_s25  }
  0x40   : > { %p3005_p10 = scmp.ge.s32.totalorder %s2369_s15, 1 }
  0x42   : > { %p333_p11 = pnand %p3005_p10, %p332_p7 }
  0x43   : > { %s2574_s26 = sand.u32 (!%p333_p11), 1, %s2345_s9  }
  0x44   : > { %336 = sbr.rel (%p333_p11) target bundleno = 963 (0x3c3), region = 44  ;;  %s1802_s14 = sshll.u32 (!%p333_p11), %s2574_s26, 6 }
  0x45   : > { %s339_s20 = scalar_lea.sflag (!%p333_p11), [#allocation5], %s2574_s26  ;;  %s2578_s30 = scalar_lea.vmem (!%p333_p11), [#allocation4], %s1802_s14 }
  0x49   : > { %2312 = dma.done.wait (%p2513_p8), %s339_s20, 1024  }
  0x4a   : > { %2314 = vsyncadd (%p2513_p8), %s339_s20, 4294966272  ;;  %s1803_s7 = sshll.u32 %s2574_s26, 3  ;;  %s382_s8 = sand.u32 1, %s2333_s28  }
  0x4b   : > { %s1805_s29 = sshll.u32 %s382_s8, 4  ;;  %s2586_s10 = scalar_lea.vmem [#allocation7], %s1803_s7 }
  0x4c   : > { %s2588_s27 = scalar_lea.vmem [#allocation8], %s1803_s7  ;;  %s2590_s17 = scalar_lea.vmem [#allocation10], %s1805_s29 }
  0x4d   : > { %p1806_p6 = scmp.ne.s32.totalorder %s2353_s11, 0 }
  0x4f   : > { %394 = sbr.rel (%p1806_p6) target bundleno = 86 (0x56), region = 52 }
  0x54   : > { %v2375_v0 = vmov 0.0  }
  0x55   : > { %395 = vst [vmem:[#allocation2] sm:$0xff] %v2375_v0 }
  0x56 PF: > { %s3006_s1 = sld [smem:[#allocation26_spill]]  ;;  %v397_v21 = vld [vmem:[%s2578_s30 + $0x8] sm:$0xff]  ;;  %v2648_v31 = vld [vmem:[%s2578_s30] sm:$0xff]  ;;  %v2655_v36 = vld [vmem:[%s2578_s30 + $0x18] sm:$0xff]  ;;  %vm468_vm0 = vcmask 1045509   ;;  %vm466_vm1 = vcmask 1041409  }
  0x57   : > { %611 = vmatprep.mubr.f32.mxu0 %v397_v21  ;;  %v2658_v37 = vld [vmem:[%s2578_s30 + $0x10] sm:$0xff]  ;;  %v2661_v38 = vld [vmem:[%s2578_s30 + $0x28] sm:$0xff]  ;;  %v411_v39 = vrot.slane %v397_v21, 4  ;;  %v405_v40 = vrot.slane %v2648_v31, 4  ;;  %v423_v41 = vrot.slane %v2655_v36, 4  ;;  %v2667_v43 = vld [vmem:[%s2578_s30 + $0x20] sm:$0xff] }
  0x58   : > { %v417_v42 = vrot.slane %v2658_v37, 4  ;;  %v2670_v44 = vld [vmem:[%s2578_s30 + $0x38] sm:$0xff]  ;;  %v435_v46 = vrot.slane %v2661_v38, 4  ;;  %v429_v47 = vrot.slane %v2667_v43, 4  ;;  %v2680_v53 = vld [vmem:[%s2578_s30 + $0x30] sm:$0xff]  ;;  %vm473_vm2 = vcmask 1046534  }
  0x59   : > { %v447_v48 = vrot.slane %v2670_v44, 4  ;;  %v412_v49 = vadd.f32 %v411_v39, %v397_v21  ;;  %v406_v50 = vadd.f32 %v405_v40, %v2648_v31  ;;  %v424_v51 = vadd.f32 %v423_v41, %v2655_v36  ;;  %s3007_s3 = sld [smem:[#allocation28_spill]]  ;;  %s2377_s25 = smov 112  }
  0x5a   : > { %v418_v52 = vadd.f32 %v417_v42, %v2658_v37  ;;  %v436_v54 = vadd.f32 %v435_v46, %v2661_v38  ;;  %v430_v55 = vadd.f32 %v429_v47, %v2667_v43  ;;  %v441_v57 = vrot.slane %v2680_v53, 4  ;;  %s2378_s14 = smov 16   ;;  %s2379_s20 = smov 32  }
  0x5b   : > { %v448_v56 = vadd.f32 %v447_v48, %v2670_v44  ;;  %v413_v58 = vrot.slane %v412_v49, 2  ;;  %v407_v59 = vrot.slane %v406_v50, 2  ;;  %v425_v60 = vrot.slane %v424_v51, 2  ;;  %s2380_s7 = smov 48   ;;  %s2381_s8 = smov 64  }
  0x5c   : > { %v1925_v1 = vld [vmem:[%s3006_s1 + $0x78] sm:$0xff]   ;;  %v1924_v3 = vld [vmem:[%s3006_s1 + $0x70] sm:$0xff]   ;;  %v1923_v9 = vld [vmem:[%s3006_s1 + $0x68] sm:$0xff]   ;;  %v419_v61 = vrot.slane %v418_v52, 2  ;;  %v437_v62 = vrot.slane %v436_v54, 2  ;;  %v431_v63 = vrot.slane %v430_v55, 2 }
  0x5d   : > { %v1917_v2 = vld [vmem:[%s3006_s1 + $0x38] sm:$0xff]   ;;  %v1909_v4 = vunpack.c.l.bf16 %v1925_v1  ;;  %v1910_v5 = vunpack.c.h.bf16 %v1925_v1  ;;  %v1916_v7 = vld [vmem:[%s3006_s1 + $0x30] sm:$0xff]   ;;  %v1906_v10 = vunpack.c.h.bf16 %v1924_v3  ;;  %v1915_v11 = vld [vmem:[%s3006_s1 + $0x28] sm:$0xff]   ;;  %v1905_v16 = vunpack.c.l.bf16 %v1924_v3  ;;  %s2382_s29 = smov 80   ;;  %s2383_s18 = smov 96  }
  0x5e   : > { %v1878_v6 = vunpack.c.h.bf16 %v1917_v2  ;;  %v1877_v8 = vunpack.c.l.bf16 %v1917_v2  ;;  %v2614_v12 = vld [vmem:[%s3006_s1 + $0x60] sm:$0xff]   ;;  %v1874_v13 = vunpack.c.h.bf16 %v1916_v7  ;;  %v2624_v15 = vld [vmem:[%s3006_s1 + $0x58] sm:$0xff]   ;;  %v1873_v17 = vunpack.c.l.bf16 %v1916_v7  ;;  %v2634_v20 = vld [vmem:[%s3006_s1 + $0x50] sm:$0xff]   ;;  %p1831_p8 = scmp.ne.s32.totalorder %s2353_s11, 1 }
  0x5f   : > { %1926 = vmatprep.subr.mxu0 %v1910_v5  ;;  %v2619_v14 = vld [vmem:[%s3006_s1 + $0x20] sm:$0xff]   ;;  %v1902_v18 = vunpack.c.h.bf16 %v1923_v9  ;;  %v2629_v19 = vld [vmem:[%s3006_s1 + $0x18] sm:$0xff]   ;;  %v1870_v22 = vunpack.c.h.bf16 %v1915_v11  ;;  %v1901_v23 = vunpack.c.l.bf16 %v1923_v9  ;;  %v1869_v24 = vunpack.c.l.bf16 %v1915_v11  ;;  %v2645_v30 = vld [vmem:[%s3006_s1 + $0x10] sm:$0xff]   ;;  %s3008_s2 = sld [smem:[#allocation27_spill]] (!%p1831_p8) }
  0x60   : > { %1927 = vmatpush3.msra.mxu0 %v1878_v6  ;;  %v1898_v25 = vunpack.c.h.bf16 %v2614_v12  ;;  %v1866_v26 = vunpack.c.h.bf16 %v2619_v14  ;;  %v1897_v27 = vunpack.c.l.bf16 %v2614_v12  ;;  %v1865_v28 = vunpack.c.l.bf16 %v2619_v14  ;;  %v1911_v40 = vld [vmem:[%s3006_s1 + $0x8] sm:$0xff]  }
  0x61   : > { %1928 = vmatprep.subr.mxu0 %v1909_v4  ;;  %v1894_v29 = vunpack.c.h.bf16 %v2624_v15  ;;  %v1862_v32 = vunpack.c.h.bf16 %v2629_v19  ;;  %v1893_v33 = vunpack.c.l.bf16 %v2624_v15  ;;  %v1861_v34 = vunpack.c.l.bf16 %v2629_v19 }
  0x62   : > { %1929 = vmatpush3.msra.mxu0 %v1877_v8  ;;  %v1890_v35 = vunpack.c.h.bf16 %v2634_v20  ;;  %v1858_v45 = vunpack.c.h.bf16 %v2645_v30  ;;  %v449_v0 = vrot.slane %v448_v56, 2  ;;  %v442_v1 = vadd.f32 %v441_v57, %v2680_v53  ;;  %v404_v57 = vld [vmem:[#allocation2] sm:$0xff] }
  0x63   : > { %1930 = vmatprep.subr.mxu0 %v1906_v10  ;;  %v414_v2 = vadd.f32 %v413_v58, %v412_v49  ;;  %v408_v3 = vadd.f32 %v407_v59, %v406_v50  ;;  %v426_v4 = vadd.f32 %v425_v60, %v424_v51  ;;  %v420_v5 = vadd.f32 %v419_v61, %v418_v52  ;;  %v1918_v49 = vld [vmem:[%s3006_s1 + $0x40] sm:$0xff]  }
  0x64   : > { %1931 = vmatpush3.msra.mxu0 %v1874_v13  ;;  %v438_v6 = vadd.f32 %v437_v62, %v436_v54  ;;  %v432_v7 = vadd.f32 %v431_v63, %v430_v55  ;;  %v450_v8 = vadd.f32 %v449_v0, %v448_v56  ;;  %v443_v9 = vrot.slane %v442_v1, 2  ;;  %v2726_v63 = vld [vmem:[%s3007_s3] sm:$0xff] }
  0x65   : > { %1932 = vmatprep.subr.mxu0 %v1905_v16  ;;  %v415_v10 = vrot.slane %v414_v2, 1  ;;  %v409_v11 = vrot.slane %v408_v3, 1  ;;  %v427_v12 = vrot.slane %v426_v4, 1  ;;  %v421_v13 = vrot.slane %v420_v5, 1 }
  0x66   : > { %1933 = vmatpush3.msra.mxu0 %v1873_v17  ;;  %v439_v14 = vrot.slane %v438_v6, 1  ;;  %v433_v16 = vrot.slane %v432_v7, 1  ;;  %v451_v17 = vrot.slane %v450_v8, 1  ;;  %v1854_v48 = vunpack.c.h.bf16 %v1911_v40 }
  0x67   : > { %1934 = vmatprep.subr.mxu0 %v1902_v18  ;;  %v444_v18 = vadd.f32 %v443_v9, %v442_v1  ;;  %v416_v21 = vadd.f32 %v415_v10, %v414_v2  ;;  %vm471_vm3 = vcmask 1042434   ;;  %v1882_v52 = vunpack.c.h.bf16 %v1918_v49 }
  0x68   : > { %1935 = vmatpush3.msra.mxu0 %v1870_v22  ;;  %v410_v22 = vadd.f32 %v409_v11, %v408_v3  ;;  %vm478_vm4 = vcmask 1047559   ;;  %vm476_vm5 = vcmask 1043459   ;;  %v1881_v58 = vunpack.c.l.bf16 %v1918_v49 }
  0x69   : > { %1936 = vmatprep.subr.mxu0 %v1901_v23  ;;  %v428_v23 = vadd.f32 %v427_v12, %v426_v4  ;;  %v445_v39 = vrot.slane %v444_v18, 1  ;;  %vm655_vm6 = vcmask 31744   ;;  %vm632_vm7 = vcmask 261120  }
  0x6a   : > { %1937 = vmatpush3.msra.mxu0 %v1869_v24  ;;  %v422_v24 = vadd.f32 %v421_v13, %v420_v5  ;;  %v461_v41 = vcombine.low %v410_v22, %v416_v21  ;;  %1996 = vmatprep.mubr.msk.f32.mxu1 %vm655_vm6, %v2726_v63  ;;  %vm662_vm8 = vcmask 1043456   ;;  %vm746_vm9 = vcmask 130048  }
  0x6b   : > { %1938 = vmatprep.subr.mxu0 %v1898_v25  ;;  %v1919_v25 = vld [vmem:[%s3006_s1 + $0x48] sm:$0xff]   ;;  %v446_v47 = vadd.f32 %v445_v39, %v444_v18  ;;  %vm855_vm10 = vcmask 261248   ;;  %vm955_vm11 = vcmask 392448   ;;  %vm1059_vm12 = vcmask 523648  }
  0x6c   : > { %1939 = vmatpush3.msra.mxu0 %v1866_v26  ;;  %v440_v26 = vadd.f32 %v439_v14, %v438_v6  ;;  %v462_v42 = vcombine.low %v422_v24, %v428_v23  ;;  %v1886_v15 = vunpack.c.h.bf16 %v1919_v25  ;;  %v1885_v50 = vunpack.c.l.bf16 %v1919_v25 }
  0x6d   : > { %1940 = vmatprep.subr.mxu0 %v1897_v27  ;;  %v434_v27 = vadd.f32 %v433_v16, %v432_v7  ;;  %vm1163_vm13 = vcmask 654848   ;;  %vm1267_vm14 = vcmask 786048   ;;  %vm1371_vm15 = vcmask 917248  }
  0x6e   : > { %1941 = vmatpush3.msra.mxu0 %v1865_v28  ;;  %v452_v28 = vadd.f32 %v451_v17, %v450_v8 }
  0x6f   : > { %1942 = vmatprep.subr.mxu0 %v1894_v29  ;;  %v1889_v29 = vunpack.c.l.bf16 %v2634_v20  ;;  %v463_v46 = vcombine.low %v434_v27, %v440_v26  ;;  %v1848_v20 = vld [vmem:[%s3006_s1] sm:$0xff]  }
  0x70   : > { %1943 = vmatpush3.msra.mxu0 %v1862_v32  ;;  %v1857_v32 = vunpack.c.l.bf16 %v2645_v30  ;;  %v1853_v30 = vunpack.c.l.bf16 %v1911_v40  ;;  %v1850_v55 = vunpack.c.h.bf16 %v1848_v20  ;;  %v1849_v60 = vunpack.c.l.bf16 %v1848_v20 }
  0x71   : > { %1944 = vmatprep.subr.mxu0 %v1893_v33  ;;  %v465_v33 = vrot.slane %v462_v42, 7  ;;  %v470_v19 = vrot.slane %v463_v46, 6 }
  0x72   : > { %1945 = vmatpush3.msra.mxu0 %v1861_v34  ;;  %v464_v34 = vcombine.low %v446_v47, %v452_v28 }
  0x73   : > { %1946 = vmatprep.subr.mxu0 %v1890_v35  ;;  %v467_v35 = vsel %vm466_vm1, %v465_v33, %v461_v41 }
  0x74   : > { %1947 = vmatpush3.msra.mxu0 %v1858_v45  ;;  %v469_v45 = vsel %vm468_vm0, %v465_v33, %v467_v35  ;;  %v475_v51 = vrot.slane %v464_v34, 5  ;;  %vm1475_vm0 = vcmask 1048448  }
  0x75   : > { %1948 = vmatprep.subr.mxu0 %v1889_v29  ;;  %v472_v54 = vsel %vm471_vm3, %v470_v19, %v469_v45 }
  0x76   : > { %1949 = vmatpush3.msra.mxu0 %v1857_v32  ;;  %v474_v56 = vsel %vm473_vm2, %v470_v19, %v472_v54  ;;  %v2742_v32 = vld [vmem:[%s3007_s3 + $0x8] sm:$0xff] }
  0x77   : > { %1950 = vmatprep.subr.mxu0 %v1886_v15  ;;  %v477_v59 = vsel %vm476_vm5, %v475_v51, %v474_v56 }
  0x78   : > { %1951 = vmatpush3.msra.mxu0 %v1854_v48  ;;  %v479_v61 = vsel %vm478_vm4, %v475_v51, %v477_v59 }
  0x79   : > { %1952 = vmatprep.subr.mxu0 %v1885_v50  ;;  %v481_v62 = vadd.f32 %v479_v61, %v404_v57 }
  0x7a   : > { %1953 = vmatpush3.msra.mxu0 %v1853_v30 }
  0x7b   : > { %1954 = vmatprep.subr.mxu0 %v1882_v52  ;;  %482 = vst [vmem:[#allocation2] sm:$0xff] %v481_v62 }
  0x7c   : > { %1955 = vmatpush3.msra.mxu0 %v1850_v55 }
  0x7d   : > { %1956 = vmatprep.subr.mxu0 %v1881_v58 }
  0x7e   : > { %1957 = vmatpush3.msra.mxu0 %v1849_v60 }
  0x7f   : > { %612 = vmatmul.mubr.f32.vlgmr.msra.gmra.mxu0 %v2648_v31  ;;  %v640_v31 = vld [vmem:[%s2962_s5] sm:$0xff] }
  0x80   : > { %616 = vmatprep.mubr.f32.mxu0 %v2655_v36  ;;  %v2376_v36 = vmov 0  }
  0x81   : > { %2159 = vset.pattern.permute.xlu0 %v2376_v36 }
  0x82   : > { %750 = vperm.xlu0 %2159, %v640_v31  }
  0x83   : > { %617 = vmatmul.mubr.f32.gmra.mxu0 %v2658_v37  ;;  %v639_v37 = vld [vmem:[%s2961_s4] sm:$0xff] }
  0x84   : > { %621 = vmatprep.mubr.f32.mxu0 %v2661_v38 }
  0x86   : > { %742 = vperm.xlu0 %2159, %v639_v37  }
  0x87   : > { %622 = vmatmul.mubr.f32.gmra.mxu0 %v2667_v43 }
  0x88   : > { %626 = vmatprep.mubr.f32.mxu0 %v2670_v44 }
  0x8b   : > { %627 = vmatmul.mubr.f32.gmra.mxu0 %v2680_v53 }
 0x13f   : > { %v1958_v38 = vpop.f32.mrf.mxu0 }
 0x141   : > { %v1959_v43 = vpop.f32.mrf.mxu0 }
 0x142   : > { %v1960_v44 = vadd.f32 %v1959_v43, %v1958_v38 }
 0x143   : > { %v1961_v53 = vpop.f32.mrf.mxu0 }
 0x144   : > { %633 = vst.msk [vmem:[#allocation3] sm:$0xff] %vm632_vm7, %v1960_v44 }
 0x145   : > { %v1962_v0 = vpop.f32.mrf.mxu0 }
 0x146   : > { %v1963_v1 = vadd.f32 %v1962_v0, %v1961_v53 }
 0x147   : > { %v1964_v2 = vpop.f32.mrf.mxu0 }
 0x148   : > { %634 = vst.msk [vmem:[#allocation3 + $0x8] sm:$0xff] %vm632_vm7, %v1963_v1 }
 0x149   : > { %v1965_v3 = vpop.f32.mrf.mxu0 }
 0x14a   : > { %v1966_v4 = vadd.f32 %v1965_v3, %v1964_v2 }
 0x14b   : > { %v1967_v5 = vpop.f32.mrf.mxu0  ;;  %v641_v16 = vld [vmem:[#allocation3] sm:$0x1]  ;;  %v759_v29 = vld [vmem:[#allocation3 + $0x1] sm:$0x1]  ;;  %v859_v48 = vld [vmem:[#allocation3 + $0x2] sm:$0x1] }
 0x14c   : > { %635 = vst.msk [vmem:[#allocation3 + $0x10] sm:$0xff] %vm632_vm7, %v1966_v4  ;;  %v963_v54 = vld [vmem:[#allocation3 + $0x3] sm:$0x1]  ;;  %v1067_v36 = vld [vmem:[#allocation3 + $0x4] sm:$0x1] }
 0x14d   : > { %v1968_v6 = vpop.f32.mrf.mxu0  ;;  %v1171_v4 = vld [vmem:[#allocation3 + $0x5] sm:$0x1] }
 0x14e   : > { %v1969_v7 = vadd.f32 %v1968_v6, %v1967_v5 }
 0x14f   : > { %v642_v8 = vld [vmem:[#allocation3 + $0x8] sm:$0x1]  ;;  %v760_v10 = vld [vmem:[#allocation3 + $0x9] sm:$0x1]  ;;  %v860_v14 = vld [vmem:[#allocation3 + $0xa] sm:$0x1] }
 0x150   : > { %636 = vst.msk [vmem:[#allocation3 + $0x18] sm:$0xff] %vm632_vm7, %v1969_v7  ;;  %v649_v12 = vrot.slane %v642_v8, 7  ;;  %v767_v17 = vrot.slane %v760_v10, 7  ;;  %v867_v28 = vrot.slane %v860_v14, 7  ;;  %v964_v41 = vld [vmem:[#allocation3 + $0xb] sm:$0x1] }
 0x151   : > { %v971_v50 = vrot.slane %v964_v41, 7  ;;  %v1068_v30 = vld [vmem:[#allocation3 + $0xc] sm:$0x1]  ;;  %v1172_v60 = vld [vmem:[#allocation3 + $0xd] sm:$0x1] }
 0x152   : > { %v650_v25 = vsel %vm466_vm1, %v649_v12, %v641_v16  ;;  %v768_v46 = vsel %vm466_vm1, %v767_v17, %v759_v29  ;;  %v868_v34 = vsel %vm466_vm1, %v867_v28, %v859_v48  ;;  %v1075_v57 = vrot.slane %v1068_v30, 7  ;;  %v1276_v0 = vld [vmem:[#allocation3 + $0xe] sm:$0x1]  ;;  %v1380_v10 = vld [vmem:[#allocation3 + $0xf] sm:$0x1] }
 0x153   : > { %v643_v9 = vld [vmem:[#allocation3 + $0x10] sm:$0x1]  ;;  %v761_v11 = vld [vmem:[#allocation3 + $0x11] sm:$0x1]  ;;  %v861_v21 = vld [vmem:[#allocation3 + $0x12] sm:$0x1]  ;;  %v972_v56 = vsel %vm466_vm1, %v971_v50, %v963_v54 }
 0x154   : > { %v651_v13 = vrot.slane %v643_v9, 6  ;;  %v769_v18 = vrot.slane %v761_v11, 6  ;;  %v869_v40 = vrot.slane %v861_v21, 6  ;;  %v965_v15 = vld [vmem:[#allocation3 + $0x13] sm:$0x1]  ;;  %v1076_v38 = vsel %vm466_vm1, %v1075_v57, %v1067_v36 }
 0x155   : > { %v973_v35 = vrot.slane %v965_v15, 6  ;;  %v1069_v52 = vld [vmem:[#allocation3 + $0x14] sm:$0x1]  ;;  %v1173_v31 = vld [vmem:[#allocation3 + $0x15] sm:$0x1]  ;;  %v1179_v43 = vrot.slane %v1172_v60, 7 }
 0x156   : > { %v652_v39 = vsel %vm471_vm3, %v651_v13, %v650_v25  ;;  %v770_v33 = vsel %vm471_vm3, %v769_v18, %v768_v46  ;;  %v870_v20 = vsel %vm471_vm3, %v869_v40, %v868_v34  ;;  %v1077_v59 = vrot.slane %v1069_v52, 6  ;;  %v1277_v3 = vld [vmem:[#allocation3 + $0x16] sm:$0x1]  ;;  %v1381_v13 = vld [vmem:[#allocation3 + $0x17] sm:$0x1] }
 0x157   : > { %v644_v22 = vld [vmem:[#allocation3 + $0x18] sm:$0x1]  ;;  %v762_v23 = vld [vmem:[#allocation3 + $0x19] sm:$0x1]  ;;  %v862_v24 = vld [vmem:[#allocation3 + $0x1a] sm:$0x1]  ;;  %v974_v58 = vsel %vm471_vm3, %v973_v35, %v972_v56  ;;  %v1180_v6 = vsel %vm466_vm1, %v1179_v43, %v1171_v4 }
 0x158   : > { %v653_v26 = vrot.slane %v644_v22, 5  ;;  %v771_v27 = vrot.slane %v762_v23, 5  ;;  %v871_v47 = vrot.slane %v862_v24, 5  ;;  %v966_v49 = vld [vmem:[#allocation3 + $0x1b] sm:$0x1]  ;;  %v1078_v44 = vsel %vm471_vm3, %v1077_v59, %v1076_v38 }
 0x159   : > { %v975_v51 = vrot.slane %v966_v49, 5  ;;  %v1070_v55 = vld [vmem:[#allocation3 + $0x1c] sm:$0x1]  ;;  %v1174_v37 = vld [vmem:[#allocation3 + $0x1d] sm:$0x1]  ;;  %v1181_v53 = vrot.slane %v1173_v31, 6 }
 0x15a   : > { %v654_v42 = vsel %vm476_vm5, %v653_v26, %v652_v39  ;;  %v772_v19 = vsel %vm476_vm5, %v771_v27, %v770_v33  ;;  %v872_v45 = vsel %vm476_vm5, %v871_v47, %v870_v20  ;;  %v1079_v62 = vrot.slane %v1070_v55, 5  ;;  %v1278_v5 = vld [vmem:[#allocation3 + $0x1e] sm:$0x1]  ;;  %v1275_v14 = vld [vmem:[#allocation3 + $0x6] sm:$0x1]  ;;  %v751_v39 = vpop.permute.xlu0 %750 }
 0x15b   : > { %1994 = vmatprep.subr.msk.mxu1 %vm662_vm8, %v654_v42  ;;  %v976_v61 = vsel %vm476_vm5, %v975_v51, %v974_v58  ;;  %v1183_v2 = vrot.slane %v1174_v37, 5  ;;  %v1283_v7 = vrot.slane %v1276_v0, 7  ;;  %v1182_v8 = vsel %vm471_vm3, %v1181_v53, %v1180_v6  ;;  %v1382_v16 = vld [vmem:[#allocation3 + $0x1f] sm:$0x1]  ;;  %v1379_v25 = vld [vmem:[#allocation3 + $0x7] sm:$0x1] }
 0x15c   : > { %1995 = vmatpush3.msk.msra.mxu1 %vm662_vm8, %v654_v42  ;;  %v1080_v1 = vsel %vm476_vm5, %v1079_v62, %v1078_v44  ;;  %v1285_v9 = vrot.slane %v1277_v3, 6  ;;  %v1287_v12 = vrot.slane %v1278_v5, 5  ;;  %v1387_v18 = vrot.slane %v1380_v10, 7 }
 0x15d   : > { %1997 = vmatmul.mubr.msk.f32.vlgmr.msra.gmra.mxu1 %vm655_vm6, %v2742_v32  ;;  %1999 = vmatprep.subr.msk.mxu1 %vm662_vm8, %v772_v19  ;;  %v1184_v11 = vsel %vm476_vm5, %v1183_v2, %v1182_v8  ;;  %v1284_v17 = vsel %vm466_vm1, %v1283_v7, %v1275_v14  ;;  %v1389_v22 = vrot.slane %v1381_v13, 6  ;;  %v1391_v24 = vrot.slane %v1382_v16, 5 }
 0x15e   : > { %2000 = vmatpush3.msk.msra.mxu1 %vm662_vm8, %v772_v19  ;;  %2001 = vmatprep.mubr.msk.f32.mxu1 %vm655_vm6, %v2726_v63  ;;  %v1286_v21 = vsel %vm471_vm3, %v1285_v9, %v1284_v17  ;;  %v1388_v26 = vsel %vm466_vm1, %v1387_v18, %v1379_v25  ;;  %v743_v40 = vpop.permute.xlu0 %742 }
 0x15f   : > { %2004 = vmatprep.subr.msk.mxu1 %vm662_vm8, %v872_v45  ;;  %v1288_v23 = vsel %vm476_vm5, %v1287_v12, %v1286_v21  ;;  %v1390_v27 = vsel %vm471_vm3, %v1389_v22, %v1388_v26 }
 0x160   : > { %v1392_v28 = vsel %vm476_vm5, %v1391_v24, %v1390_v27 }
 0x161   : > { %2002 = vmatmul.mubr.msk.f32.vlgmr.msra.gmra.mxu1 %vm655_vm6, %v2742_v32 }
 0x162   : > { %2005 = vmatpush3.msk.msra.mxu1 %vm662_vm8, %v872_v45  ;;  %2006 = vmatprep.mubr.msk.f32.mxu1 %vm655_vm6, %v2726_v63 }
 0x163   : > { %2009 = vmatprep.subr.msk.mxu1 %vm662_vm8, %v976_v61 }
 0x165   : > { %2007 = vmatmul.mubr.msk.f32.vlgmr.msra.gmra.mxu1 %vm655_vm6, %v2742_v32 }
 0x166   : > { %2010 = vmatpush3.msk.msra.mxu1 %vm662_vm8, %v976_v61  ;;  %2011 = vmatprep.mubr.msk.f32.mxu1 %vm655_vm6, %v2726_v63 }
 0x167   : > { %2014 = vmatprep.subr.msk.mxu1 %vm662_vm8, %v1080_v1 }
 0x169   : > { %2012 = vmatmul.mubr.msk.f32.vlgmr.msra.gmra.mxu1 %vm655_vm6, %v2742_v32 }
 0x16a   : > { %2015 = vmatpush3.msk.msra.mxu1 %vm662_vm8, %v1080_v1  ;;  %2016 = vmatprep.mubr.msk.f32.mxu1 %vm655_vm6, %v2726_v63 }
 0x16b   : > { %2019 = vmatprep.subr.msk.mxu1 %vm662_vm8, %v1184_v11 }
 0x16d   : > { %2017 = vmatmul.mubr.msk.f32.vlgmr.msra.gmra.mxu1 %vm655_vm6, %v2742_v32 }
 0x16e   : > { %2020 = vmatpush3.msk.msra.mxu1 %vm662_vm8, %v1184_v11  ;;  %2021 = vmatprep.mubr.msk.f32.mxu1 %vm655_vm6, %v2726_v63 }
 0x16f   : > { %2024 = vmatprep.subr.msk.mxu1 %vm662_vm8, %v1288_v23 }
 0x171   : > { %2022 = vmatmul.mubr.msk.f32.vlgmr.msra.gmra.mxu1 %vm655_vm6, %v2742_v32 }
 0x172   : > { %2025 = vmatpush3.msk.msra.mxu1 %vm662_vm8, %v1288_v23  ;;  %2026 = vmatprep.mubr.msk.f32.mxu1 %vm655_vm6, %v2726_v63 }
 0x173   : > { %2029 = vmatprep.subr.msk.mxu1 %vm662_vm8, %v1392_v28 }
 0x175   : > { %2027 = vmatmul.mubr.msk.f32.vlgmr.msra.gmra.mxu1 %vm655_vm6, %v2742_v32 }
 0x176   : > { %2030 = vmatpush3.msk.msra.mxu1 %vm662_vm8, %v1392_v28  ;;  %2031 = vmatprep.mubr.msk.f32.mxu1 %vm655_vm6, %v2726_v63 }
 0x179   : > { %2032 = vmatmul.mubr.msk.f32.vlgmr.msra.gmra.mxu1 %vm655_vm6, %v2742_v32 }
 0x21d   : > { %v1998_v29 = vpop.f32.mrf.mxu1 }
 0x21e   : > { %v753_v41 = vadd.f32 %v1998_v29, %v751_v39 }
 0x21f   : > { %v731_v42 = vpop.f32.mrf.mxu1 }
 0x220   : > { %v745_v46 = vadd.f32 %v743_v40, %v731_v42  ;;  %755 = vrot.lane.b32.xlu1 %v753_v41, %s2377_s25 }
 0x221   : > { %v2003_v47 = vpop.f32.mrf.mxu1 }
 0x222   : > { %747 = vst.msk [vmem:[%s2588_s27] sm:$0xff] %vm746_vm9, %v745_v46  ;;  %v857_v37 = vadd.f32 %v2003_v47, %v751_v39 }
 0x223   : > { %v841_v15 = vpop.f32.mrf.mxu1 }
 0x224   : > { %v850_v33 = vadd.f32 %v841_v15, %v743_v40 }
 0x225   : > { %v2008_v48 = vpop.f32.mrf.mxu1 }
 0x226   : > { %852 = vrot.lane.b32.xlu1 %v850_v33, %s2378_s14  ;;  %v957_v32 = vadd.f32 %v2008_v48, %v751_v39 }
 0x227   : > { %v941_v63 = vpop.f32.mrf.mxu1 }
 0x228   : > { %v950_v49 = vadd.f32 %v941_v63, %v743_v40 }
 0x229   : > { %v2013_v19 = vpop.f32.mrf.mxu1 }
 0x22a   : > { %952 = vrot.lane.b32.xlu0 %v950_v49, %s2379_s20  ;;  %959 = vrot.lane.b32.xlu1 %v957_v32, %s2378_s14  ;;  %v1061_v50 = vadd.f32 %v2013_v19, %v751_v39 }
 0x22b   : > { %v1045_v34 = vpop.f32.mrf.mxu1 }
 0x22c   : > { %v1054_v20 = vadd.f32 %v1045_v34, %v743_v40 }
 0x22d   : > { %v2018_v35 = vpop.f32.mrf.mxu1 }
 0x22e   : > { %1056 = vrot.lane.b32.xlu0 %v1054_v20, %s2380_s7  ;;  %1063 = vrot.lane.b32.xlu1 %v1061_v50, %s2379_s20  ;;  %v1165_v45 = vadd.f32 %v2018_v35, %v751_v39 }
 0x22f   : > { %v1149_v30 = vpop.f32.mrf.mxu1 }
 0x230   : > { %v1158_v51 = vadd.f32 %v1149_v30, %v743_v40 }
 0x231   : > { %v2023_v52 = vpop.f32.mrf.mxu1 }
 0x232   : > { %1160 = vrot.lane.b32.xlu0 %v1158_v51, %s2381_s8  ;;  %1167 = vrot.lane.b32.xlu1 %v1165_v45, %s2380_s7  ;;  %v1269_v55 = vadd.f32 %v2023_v52, %v751_v39 }
 0x233   : > { %v1253_v54 = vpop.f32.mrf.mxu1 }
 0x234   : > { %v1262_v56 = vadd.f32 %v1253_v54, %v743_v40 }
 0x235   : > { %v2028_v57 = vpop.f32.mrf.mxu1 }
 0x236   : > { %1264 = vrot.lane.b32.xlu0 %v1262_v56, %s2382_s29  ;;  %1271 = vrot.lane.b32.xlu1 %v1269_v55, %s2381_s8  ;;  %v1373_v59 = vadd.f32 %v2028_v57, %v751_v39 }
 0x237   : > { %v1357_v58 = vpop.f32.mrf.mxu1 }
 0x238   : > { %v1366_v60 = vadd.f32 %v1357_v58, %v743_v40 }
 0x239   : > { %v2033_v61 = vpop.f32.mrf.mxu1 }
 0x23a   : > { %1368 = vrot.lane.b32.xlu0 %v1366_v60, %s2383_s18  ;;  %1375 = vrot.lane.b32.xlu1 %v1373_v59, %s2382_s29  ;;  %v1477_v31 = vadd.f32 %v2033_v61, %v751_v39 }
 0x23b   : > { %v1461_v62 = vpop.f32.mrf.mxu1 }
 0x23c   : > { %v1470_v36 = vadd.f32 %v1461_v62, %v743_v40 }
 0x23e   : > { %1472 = vrot.lane.b32.xlu0 %v1470_v36, %s2377_s25  ;;  %1479 = vrot.lane.b32.xlu1 %v1477_v31, %s2383_s18 }
 0x292   : > { %v756_v38 = vpop.permute.xlu1 %755 }
 0x293   : > { %758 = vst.msk [vmem:[%s2586_s10] sm:$0xff] %vm746_vm9, %v756_v38 }
 0x294   : > { %858 = vst.msk [vmem:[%s2586_s10] sm:$0xff] %vm855_vm10, %v857_v37 }
 0x298   : > { %v853_v43 = vpop.permute.xlu1 %852 }
 0x299   : > { %856 = vst.msk [vmem:[%s2588_s27] sm:$0xff] %vm855_vm10, %v853_v43 }
 0x29c   : > { %v953_v44 = vpop.permute.xlu0 %952  ;;  %v960_v53 = vpop.permute.xlu1 %959 }
 0x29d   : > { %956 = vst.msk [vmem:[%s2588_s27] sm:$0xff] %vm955_vm11, %v953_v44  ;;  %962 = vst.msk [vmem:[%s2586_s10] sm:$0xff] %vm955_vm11, %v960_v53 }
 0x2a0   : > { %v1057_v0 = vpop.permute.xlu0 %1056  ;;  %v1064_v1 = vpop.permute.xlu1 %1063 }
 0x2a1   : > { %1060 = vst.msk [vmem:[%s2588_s27] sm:$0xff] %vm1059_vm12, %v1057_v0  ;;  %1066 = vst.msk [vmem:[%s2586_s10] sm:$0xff] %vm1059_vm12, %v1064_v1 }
 0x2a4   : > { %v1161_v2 = vpop.permute.xlu0 %1160  ;;  %v1168_v3 = vpop.permute.xlu1 %1167 }
 0x2a5   : > { %1164 = vst.msk [vmem:[%s2588_s27] sm:$0xff] %vm1163_vm13, %v1161_v2  ;;  %1170 = vst.msk [vmem:[%s2586_s10] sm:$0xff] %vm1163_vm13, %v1168_v3 }
 0x2a8   : > { %v1265_v4 = vpop.permute.xlu0 %1264  ;;  %v1272_v5 = vpop.permute.xlu1 %1271 }
 0x2a9   : > { %1268 = vst.msk [vmem:[%s2588_s27] sm:$0xff] %vm1267_vm14, %v1265_v4  ;;  %1274 = vst.msk [vmem:[%s2586_s10] sm:$0xff] %vm1267_vm14, %v1272_v5 }
 0x2ac   : > { %v1369_v6 = vpop.permute.xlu0 %1368  ;;  %v1376_v7 = vpop.permute.xlu1 %1375 }
 0x2ad   : > { %1372 = vst.msk [vmem:[%s2588_s27] sm:$0xff] %vm1371_vm15, %v1369_v6  ;;  %1378 = vst.msk [vmem:[%s2586_s10] sm:$0xff] %vm1371_vm15, %v1376_v7  ;;  %1486 = sbr.rel (%p1831_p8) target bundleno = 891 (0x37b), region = 56 }
 0x2b0   : > { %v1473_v8 = vpop.permute.xlu0 %1472  ;;  %v1480_v9 = vpop.permute.xlu1 %1479 }
 0x2b1   : > { %1476 = vst.msk [vmem:[%s2588_s27] sm:$0xff] %vm1475_vm0, %v1473_v8  ;;  %1482 = vst.msk [vmem:[%s2586_s10] sm:$0xff] %vm1475_vm0, %v1480_v9 }
 0x2b2   : > { %v1488_v10 = vld [vmem:[#allocation2] sm:$0xff]  ;;  %v2384_v12 = vmov 0.0  }
 0x2b3   : > { %v1490_v11 = vcombine.high %v1488_v10, %v1488_v10  ;;  %1562 = vmatprep.mubr.f32.mxu0 %v2384_v12  ;;  %v1487_v13 = vld [vmem:[%s3008_s2] sm:$0xff] }
 0x2b5   : > { %1832 = vmatprep.subr.msk.mxu0 %vm662_vm8, %v1490_v11 }
 0x2b6   : > { %1833 = vmatpush1.msk.msra.mxu0 %vm662_vm8, %v1488_v10 }
 0x2b7   : > { %1834 = vmatmul.mubr.msk.f32.vlgmr.msra.gmra.mxu0 %vm655_vm6, %v1487_v13 }
 0x377   : > { %v1564_v14 = vpop.f32.mrf.mxu0 }
 0x378   : > { %1569 = vst [vmem:[%s2590_s17] sm:$0xff] %v1564_v14 }
 0x379   : > { %v1566_v16 = vpop.f32.mrf.mxu0 }
 0x37a   : > { %1570 = vst [vmem:[%s2590_s17 + $0x8] sm:$0xff] %v1566_v16 }
 0x37b PF: > { %s1576_s22 = sand.u32 1, %s2489_s16   ;;  %s1838_s19 = sshll.u32 %s2357_s12, 1 }
 0x37c   : > { %s2843_s6 = sadd.s32 %s2353_s11, %s1838_s19  ;;  %s1616_s14 = sshll.u32 %s2588_s27, 4  ;;  %s1617_s14 = int_to_ptr.vmem [resolvable:$true] %s1616_s14 }
 0x37d   : > { %s2979_s25 = sshll.u32 %s2843_s6, 7  ;;  %s3009_s8 = sld [smem:[#allocation30_spill]] }
 0x37e   : > { %s2852_s18 = scalar_lea.sflag [#allocation9], %s1576_s22  ;;  %s2189_s23 = scalar_lea.vmem %s1617_s14, 128 }
 0x37f   : > { %p2190_p5 = scmp.ne.s32.totalorder %s1617_s14, %s2189_s23  ;;  %s2385_s16 = smov [#allocation8]  }
 0x380   : > { %s2193_s11 = sshll.u32 %s2385_s16, 4  ;;  %s2194_s11 = int_to_ptr.vmem [resolvable:$false] %s2193_s11 }
 0x381   : > { %p2191_p7 = pnand %p2190_p5, %p2519_p9  ;;  %s2195_s30 = scalar_lea.vmem %s2194_s11, 256 }
 0x382   : > { %p2196_p0 = scmp.lt.s32.totalorder %s1617_s14, %s2194_s11  ;;  %p2197_p3 = scmp.lt.s32.totalorder %s2195_s30, %s2189_s23 }
 0x383   : > { %s1614_s29 = scalar_lea.hbm %s3009_s8, %s2979_s25  ;;  %p2192_p12 = pneg %p2191_p7 }
 0x384   : > { %p2198_p2 = por %p2197_p3, %p2196_p0 }
 0x386   : > { %p2199_p4 = pnand %p2198_p2, %p2192_p12 }
 0x388   : > { %2202 = shalt.err (!%p2199_p4)
}
 0x389   : > { %s2203_s27 = scalar_lea.hbm %s1614_s29, 128  ;;  %s2207_s20 = scalar_lea.hbm %s3009_s8, 512 }
 0x38a   : > { %p2204_p10 = scmp.ne.s32.totalorder %s1614_s29, %s2203_s27  ;;  %p2208_p8 = scmp.lt.s32.totalorder %s1614_s29, %s3009_s8 }
 0x38b   : > { %p2209_p5 = scmp.lt.s32.totalorder %s2207_s20, %s2203_s27 }
 0x38c   : > { %p2205_p11 = pnand %p2204_p10, %p2519_p9 }
 0x38d   : > { %p2210_p7 = por %p2209_p5, %p2208_p8 }
 0x38e   : > { %p2206_p6 = pneg %p2205_p11 }
 0x390   : > { %p2211_p13 = pnand %p2210_p7, %p2206_p6 }
 0x392   : > { %2214 = shalt.err (!%p2211_p13)
}
 0x393   : > { %2037 = dma.vmem_to_hbm [thread:$0]  (%p2519_p9), %s1617_s14, 128, %s1614_s29, %s2852_s18  }
 0x394   : > { %s3010_s23 = sshll.u32 %s2843_s6, 7  ;;  %s3011_s30 = sld [smem:[#allocation29_spill]] }
 0x395   : > { %s1599_s25 = sshll.u32 %s2586_s10, 4  ;;  %s1846_s27 = sshll.u32 %s2357_s12, 8  ;;  %s1600_s25 = int_to_ptr.vmem [resolvable:$true] %s1599_s25 }
 0x396   : > { %s3013_s0 = sld [smem:[#allocation31_spill]]  ;;  %s1572_s2 = scalar_lea.sflag [#allocation6], %s2574_s26 }
 0x397   : > { %s2215_s3 = scalar_lea.vmem %s1600_s25, 128  ;;  %s2386_s6 = smov [#allocation7]  }
 0x398   : > { %p2216_p13 = scmp.ne.s32.totalorder %s1600_s25, %s2215_s3  ;;  %s2219_s14 = sshll.u32 %s2386_s6, 4  ;;  %s2220_s14 = int_to_ptr.vmem [resolvable:$false] %s2219_s14 }
 0x399   : > { %s2221_s29 = scalar_lea.vmem %s2220_s14, 256  ;;  %p2222_p3 = scmp.lt.s32.totalorder %s1600_s25, %s2220_s14 }
 0x39a   : > { %s3012_s22 = smov %s3011_s30  ;;  %s2872_s19 = scalar_lea.hbm %s3011_s30, %s3010_s23 }
 0x39b   : > { %p2217_p12 = pnand %p2216_p13, %p2519_p9  ;;  %p2223_p2 = scmp.lt.s32.totalorder %s2221_s29, %s2215_s3 }
 0x39c   : > { %s2879_s1 = scalar_lea.hbm %s3013_s0, %s1846_s27 }
 0x39d   : > { %p2218_p0 = pneg %p2217_p12  ;;  %p2224_p4 = por %p2223_p2, %p2222_p3 }
 0x39f   : > { %p2225_p10 = pnand %p2224_p4, %p2218_p0 }
 0x3a1   : > { %2228 = shalt.err (!%p2225_p10)
}
 0x3a2   : > { %s2229_s12 = scalar_lea.hbm %s2872_s19, 128  ;;  %s2233_s23 = scalar_lea.hbm %s3012_s22, 512 }
 0x3a3   : > { %p2230_p11 = scmp.ne.s32.totalorder %s2872_s19, %s2229_s12  ;;  %p2234_p5 = scmp.lt.s32.totalorder %s2872_s19, %s3012_s22 }
 0x3a4   : > { %p2235_p7 = scmp.lt.s32.totalorder %s2233_s23, %s2229_s12 }
 0x3a5   : > { %p2231_p6 = pnand %p2230_p11, %p2519_p9 }
 0x3a6   : > { %p2236_p13 = por %p2235_p7, %p2234_p5 }
 0x3a7   : > { %p2232_p8 = pneg %p2231_p6 }
 0x3a9   : > { %p2237_p12 = pnand %p2236_p13, %p2232_p8 }
 0x3ab   : > { %2240 = shalt.err (!%p2237_p12)
}
 0x3ac   : > { %2036 = dma.vmem_to_hbm [thread:$0]  (%p2519_p9), %s1600_s25, 128, %s2872_s19, %s1572_s2  }
 0x3ad   : > { %s1632_s30 = sshll.u32 %s2590_s17, 4  ;;  %s2387_s20 = smov [#allocation10]   ;;  %s1633_s30 = int_to_ptr.vmem [resolvable:$true] %s1632_s30 }
 0x3ae   : > { %s2241_s27 = scalar_lea.vmem %s1633_s30, 256  ;;  %s2245_s7 = sshll.u32 %s2387_s20, 4  ;;  %s2246_s7 = int_to_ptr.vmem [resolvable:$false] %s2245_s7 }
 0x3af   : > { %p2242_p0 = scmp.ne.s32.totalorder %s1633_s30, %s2241_s27  ;;  %s2247_s6 = scalar_lea.vmem %s2246_s7, 512 }
 0x3b0   : > { %p2248_p4 = scmp.lt.s32.totalorder %s1633_s30, %s2246_s7  ;;  %p2249_p10 = scmp.lt.s32.totalorder %s2247_s6, %s2241_s27 }
 0x3b1   : > { %p2243_p3 = pnand %p2242_p0, %p2542_p1 }
 0x3b2   : > { %p2250_p11 = por %p2249_p10, %p2248_p4 }
 0x3b3   : > { %p2244_p2 = pneg %p2243_p3 }
 0x3b5   : > { %p2251_p6 = pnand %p2250_p11, %p2244_p2 }
 0x3b7   : > { %2254 = shalt.err (!%p2251_p6)
}
 0x3b8   : > { %s2255_s2 = scalar_lea.hbm %s2879_s1, 256  ;;  %s2259_s19 = scalar_lea.hbm %s3013_s0, 512 }
 0x3b9   : > { %p2256_p9 = scmp.ne.s32.totalorder %s2879_s1, %s2255_s2  ;;  %p2260_p7 = scmp.lt.s32.totalorder %s2879_s1, %s3013_s0 }
 0x3ba   : > { %p2261_p13 = scmp.lt.s32.totalorder %s2259_s19, %s2255_s2 }
 0x3bb   : > { %p2257_p8 = pnand %p2256_p9, %p2542_p1 }
 0x3bc   : > { %p2262_p12 = por %p2261_p13, %p2260_p7 }
 0x3bd   : > { %p2258_p5 = pneg %p2257_p8 }
 0x3bf   : > { %p2263_p0 = pnand %p2262_p12, %p2258_p5 }
 0x3c1   : > { %2266 = shalt.err (!%p2263_p0)
}
 0x3c2   : > { %2038 = dma.vmem_to_hbm [thread:$0]  (%p2542_p1), %s1633_s30, 256, %s2879_s1, %s2852_s18  }
 0x3c3 PF: > { %s3015_s29 = sld [smem:[#allocation16_spill]]  ;;  %p2057_p3 = scmp.ge.s32.totalorder %s2369_s15, 2 }
 0x3c4   : > { %s3016_s12 = sld [smem:[#allocation21_spill]] }
 0x3c9   : > { %s1644_s26 = sand.u32 1, %s3015_s29  }
 0x3ca   : > { %p3017_p2 = scmp.ne.s32.totalorder %s3016_s12, 0  ;;  %s1645_s10 = scalar_lea.sflag [#allocation6], %s1644_s26 }
 0x3cc   : > { %p2047_p4 = pnand %p2057_p3, %p3017_p2 }
 0x3ce   : > { %p2048_p10 = pneg %p2047_p4 }
 0x3d0   : > { %2316 = dma.done.wait (%p2048_p10), %s1645_s10, 128  }
 0x3d1   : > { %2318 = vsyncadd (%p2048_p10), %s1645_s10, 4294967168  ;;  %s3018_s23 = sadd.s32 4294967294, %s2369_s15  }
 0x3d2   : > { %s1653_s16 = sand.u32 1, %s3018_s23  }
 0x3d3   : > { %s1654_s11 = scalar_lea.sflag [#allocation9], %s1653_s16 }
 0x3d4   : > { %2320 = dma.done.wait (%p2048_p10), %s1654_s11, 128  }
 0x3d5   : > { %2322 = vsyncadd (%p2048_p10), %s1654_s11, 4294967168  ;;  %p3019_p1 = scmp.ne.s32.totalorder %s3002_s21, 0 }
 0x3d7   : > { %p2053_p11 = pnand %p2057_p3, %p3019_p1 }
 0x3d9   : > { %p2054_p6 = pneg %p2053_p11 }
 0x3db   : > { %2324 = dma.done.wait (%p2054_p6), %s1654_s11, 256  }
 0x3dc   : > { %2326 = vsyncadd (%p2054_p6), %s1654_s11, 4294967040  ;;  %s28_s15 = sadd.s32 1, %s2369_s15   ;;  %s3020_s1 = sld [smem:[#allocation15_spill]] }
 0x3dd   : > { %p25_p9 = scmp.ge.s32.totalorder %s28_s15, 6   ;;  %s3021_s29 = sld [smem:[#allocation23_spill]] }
 0x3de   : > { %s3022_s18 = sld [smem:[#allocation17_spill]]  ;;  %s3027_s27 = smov %s2333_s28 }
 0x3df   : > { %s3023_s10 = sld [smem:[#allocation22_spill]]  ;;  %s3029_s30 = smov %s2345_s9 }
 0x3e0   : > { %s3024_s12 = sld [smem:[#allocation18_spill]]  ;;  %s3031_s11 = smov %s2361_s13 }
 0x3e1   : > { %s3025_s3 = sld [smem:[#allocation19_spill]] }
 0x3e2   : > { %s3026_s14 = sld [smem:[#allocation20_spill]]  ;;  %s3028_s28 = smov %s3020_s1 }
 0x3e3   :  { %27 = sbr.rel (!%p25_p9) target bundleno = 19 (0x13), region = 129 }
 0x3e4   : > { %s3030_s9 = smov %s3022_s18 }
 0x3e7   : > { %s3032_s13 = smov %s3025_s3 }
 0x3e8   :  { %1668 = vsyncpa [#allocation5], 1 }
 0x3e9   :  { %1670 = vsyncpa [#allocation5 + $0x1], 1 }
 0x3ea   :  { %1671 = vsyncpa [#allocation6], 1 }
 0x3eb   :  { %1673 = vsyncpa [#allocation6 + $0x1], 1 }
 0x3ec   :  { %1674 = vsyncpa [#allocation9], 1 }
 0x3ed   :  { %1676 = vsyncpa [#allocation9 + $0x1], 1 }

// kernel: tpu_custom_call.1
= control target key start
LH: loop header
LB: loop body
LE: loop exit
PB: predicated region body
PF: predicated region fallthrough
CT: control target
= control target key end

     0   :  { %s2957_s0 = inlined_call_operand.hbm [shape: f32[2,4,16,256], index: 0, kind: input, shape index: {}]   ;;  %s2958_s1 = inlined_call_operand.vmem [shape: bf16[256,32], index: 1, kind: input, shape index: {}]   ;;  %s2959_s2 = inlined_call_operand.vmem [shape: f32[8,4], index: 2, kind: input, shape index: {}]   ;;  %s2960_s3 = inlined_call_operand.vmem [shape: f32[16,4], index: 3, kind: input, shape index: {}]   ;;  %s2961_s4 = inlined_call_operand.vmem [shape: f32[8,1], index: 4, kind: input, shape index: {}]   ;;  %s2962_s5 = inlined_call_operand.vmem [shape: f32[8,1], index: 5, kind: input, shape index: {}]   ;;  %s2963_s6 = inlined_call_operand.hbm [shape: f32[2,8,256], index: 6, kind: output, shape index: {0}]   ;;  %s2964_s7 = inlined_call_operand.hbm [shape: f32[2,8,256], index: 7, kind: output, shape index: {1}]   ;;  %s2965_s8 = inlined_call_operand.hbm [shape: f32[1,2,8,256], index: 8, kind: output, shape index: {2}]  }
   0x1   :  { %2980 = sst [smem:[#allocation25_spill]] %s2957_s0 }
   0x2   :  { %2981 = sst [smem:[#allocation26_spill]] %s2958_s1 }
   0x3   :  { %2982 = sst [smem:[#allocation27_spill]] %s2959_s2 }
   0x4   :  { %2983 = sst [smem:[#allocation28_spill]] %s2960_s3 }
   0x5   :  { %2984 = sst [smem:[#allocation29_spill]] %s2963_s6 }
   0x6   :  { %2985 = sst [smem:[#allocation30_spill]] %s2964_s7 }
   0x7   :  { %2986 = sst [smem:[#allocation31_spill]] %s2965_s8 }
   0x8   :  { %14 = vsyncpa [#allocation5], 0 }
   0x9   :  { %16 = vsyncpa [#allocation5 + $0x1], 0 }
   0xa   :  { %17 = vsyncpa [#allocation6], 0 }
   0xb   :  { %19 = vsyncpa [#allocation6 + $0x1], 0 }
   0xc   :  { %20 = vsyncpa [#allocation9], 0 }
   0xd   :  { %22 = vsyncpa [#allocation9 + $0x1], 0  ;;  %s2433_s27 = smov 0   ;;  %s2435_s28 = smov 0  }
   0xe   :  { %s2437_s29 = smov 0   ;;  %s2439_s30 = smov 0  }
   0xf   :  { %s2441_s9 = smov 0   ;;  %s2443_s10 = smov 0  }
  0x10   :  { %s2445_s11 = smov 0   ;;  %s2447_s12 = smov 0  }
  0x11   :  { %s2449_s13 = smov 0   ;;  %s2451_s14 = smov 0  }
  0x12   :  { %s2453_s15 = smov 0  }
  0x13 LB: > { %2987 = sst [smem:[#allocation15_spill]] %s2337_s29  ;;  %s2489_s16 = sadd.s32 4294967295, %s2369_s15   ;;  %s2369_s15 = sphi %s2453_s15, %s28_s15   ;;  %s2365_s14 = sphi %s2451_s14, %s3026_s14   ;;  %s2361_s13 = sphi %s2449_s13, %s3032_s13   ;;  %s2357_s12 = sphi %s2447_s12, %s3024_s12   ;;  %s2353_s11 = sphi %s2445_s11, %s3031_s11   ;;  %s2349_s10 = sphi %s2443_s10, %s3023_s10   ;;  %s2345_s9 = sphi %s2441_s9, %s3030_s9   ;;  %s2341_s30 = sphi %s2439_s30, %s3029_s30   ;;  %s2337_s29 = sphi %s2437_s29, %s3021_s29   ;;  %s2333_s28 = sphi %s2435_s28, %s3028_s28   ;;  %s2329_s27 = sphi %s2433_s27, %s3027_s27  }
  0x14   : > { %2988 = sst [smem:[#allocation16_spill]] %s2341_s30  ;;  %s2971_s17 = sadd.s32 4294967294, %s2369_s15  }
  0x15   : > { %2989 = sst [smem:[#allocation17_spill]] %s2349_s10  ;;  %s40_s18 = sadd.s32 1, %s2361_s13 }
  0x16   : > { %2990 = sst [smem:[#allocation18_spill]] %s2365_s14  ;;  %s47_s19 = sadd.s32 1, %s2365_s14 }
  0x17   : > { %p41_p0 = scmp.ge.s32.totalorder %s40_s18, 2  ;;  %s60_s20 = sadd.s32 1, %s2349_s10 }
  0x18   : > { %p67_p1 = scmp.ne.s32.totalorder %s2349_s10, %s2345_s9  ;;  %p68_p2 = scmp.eq.s32.totalorder %s2369_s15, 0 }
  0x19   : > { %s3034_s18 = smov (%p41_p0, %s40_s18), 0  ;;  %s3036_s19 = smov (!%p41_p0, %s47_s19), %s2365_s14 }
  0x1a   : > { %2991 = sst [smem:[#allocation19_spill]] %s3034_s18  ;;  %s56_s21 = ssub.s32 %s2361_s13, %s3034_s18 }
  0x1b   : > { %p2503_p3 = por %p68_p2, %p67_p1  ;;  %p49_p4 = scmp.ge.s32.totalorder %s3036_s19, 2 }
  0x1c   : > { %p73_p5 = scmp.ne.s32.totalorder %s2345_s9, %s2341_s30  ;;  %p74_p6 = scmp.eq.s32.totalorder %s2489_s16, 0 }
  0x1d   : > { %p208_p7 = scmp.eq.s32.totalorder %s2489_s16, 3  ;;  %s3038_s19 = smov (%p49_p4, %s3036_s19), 0 }
  0x1e   : > { %2993 = sst [smem:[#allocation20_spill]] %s3038_s19  ;;  %p2513_p8 = por %p74_p6, %p73_p5 }
  0x1f   : > { %p2519_p9 = por %p208_p7, %p67_p1  ;;  %s55_s25 = ssub.s32 %s2365_s14, %s3038_s19 }
  0x20   : > { %p214_p10 = scmp.eq.s32.totalorder %s2971_s17, 3  ;;  %s57_s26 = sor.u32 %s56_s21, %s55_s25 }
  0x21   : > { %p255_p11 = scmp.eq.s32.totalorder %s55_s25, 0  ;;  %p58_p12 = scmp.eq.s32.totalorder %s57_s26, 0 }
  0x22   : > { %p2527_p13 = por %p214_p10, %p73_p5  ;;  %s257_s30 = sadd.s32 1, %s2337_s29 }
  0x23   : > { %p267_p0 = scmp.ne.s32.totalorder %s2337_s29, %s2333_s28  ;;  %p273_p2 = scmp.ne.s32.totalorder %s2333_s28, %s2329_s27 }
  0x24   : > { %s2996_s18 = scalar_select %p2527_p13, 1, 0 }
  0x25   : > { %s2535_s8 = scalar_select %p58_p12, %s2349_s10, %s60_s20  }
  0x26   : > { %2997 = sst [smem:[#allocation21_spill]] %s2996_s18  ;;  %p2542_p1 = por %p267_p0, %p208_p7 }
  0x27   : > { %2998 = sst [smem:[#allocation22_spill]] %s2535_s8  ;;  %p2056_p4 = scmp.lt.s32.totalorder %s2369_s15, 4 }
  0x28   : > { %s2538_s6 = scalar_select %p255_p11, %s2337_s29, %s257_s30  }
  0x29   : > { %s3000_s19 = scalar_select %p2542_p1, 1, 0 }
  0x2a   : > { %2999 = sst [smem:[#allocation23_spill]] %s2538_s6  ;;  %p2549_p6 = por %p273_p2, %p214_p10 }
  0x2b   : > { %3001 = sst [smem:[#allocation24_spill]] %s3000_s19  ;;  %s309_s25 = sand.u32 1, %s2349_s10  }
  0x2c   : > { %s3002_s21 = scalar_select %p2549_p6, 1, 0 }
  0x2d   : > { %s1797_s26 = sshll.u32 %s309_s25, 6  ;;  %s1798_s17 = sshll.u32 %s2361_s13, 1 }
  0x2e   : > { %s1799_s18 = sshll.u32 %s2365_s14, 4  ;;  %s313_s20 = scalar_lea.vmem [#allocation4], %s1797_s26 }
  0x2f   : > { %s324_s8 = sshll.u32 %s313_s20, 4  ;;  %s321_s30 = sadd.s32 %s1799_s18, %s1798_s17  ;;  %s325_s8 = int_to_ptr.vmem [resolvable:$true] %s324_s8 }
  0x30   : > { %s1800_s6 = sshll.u32 %s321_s30, 7  ;;  %p2558_p5 = pnand %p2056_p4, %p2503_p3 }
  0x31   : > { %s3004_s0 = sld [smem:[#allocation25_spill]]  ;;  %s310_s10 = scalar_lea.sflag [#allocation5], %s309_s25 }
  0x32   : > { %p2163_p10 = pneg %p2558_p5  ;;  %s2174_s14 = scalar_lea.vmem %s325_s8, 1024 }
  0x33   : > { %p2175_p11 = scmp.ne.s32.totalorder %s325_s8, %s2174_s14  ;;  %s2371_s17 = smov [#allocation4]  }
  0x34   : > { %s2179_s18 = sshll.u32 %s2371_s17, 4  ;;  %s2180_s18 = int_to_ptr.vmem [resolvable:$false] %s2179_s18 }
  0x35   : > { %p2177_p12 = pnand %p2175_p11, %p2163_p10  ;;  %s2181_s22 = scalar_lea.vmem %s2180_s18, 2048 }
  0x36   : > { %p2182_p3 = scmp.lt.s32.totalorder %s325_s8, %s2180_s18  ;;  %p2183_p2 = scmp.lt.s32.totalorder %s2181_s22, %s2174_s14 }
  0x37   : > { %s323_s7 = scalar_lea.hbm %s3004_s0, %s1800_s6  ;;  %p2178_p0 = pneg %p2177_p12 }
  0x38   : > { %p2184_p4 = por %p2183_p2, %p2182_p3 }
  0x3a   : > { %p2185_p6 = pnand %p2184_p4, %p2178_p0 }
  0x3c   : > { %2188 = shalt.err (!%p2185_p6)
}
  0x3d   : > { %s2372_s19 = smov 512   ;;  %s2373_s6 = smov 256  }
  0x3e   : > { %s2374_s25 = smov 16   ;;  %p332_p7 = scmp.lt.s32.totalorder %s2369_s15, 5 }
  0x3f   : > { %2045 = dma.hbm_to_vmem [thread:$0]  (!%p2558_p5), %s323_s7, 1024, %s325_s8, %s310_s10, %s2372_s19, %s2373_s6, %s2374_s25  }
  0x40   : > { %p3005_p10 = scmp.ge.s32.totalorder %s2369_s15, 1 }
  0x42   : > { %p333_p11 = pnand %p3005_p10, %p332_p7 }
  0x43   : > { %s2574_s26 = sand.u32 (!%p333_p11), 1, %s2345_s9  }
  0x44   : > { %336 = sbr.rel (%p333_p11) target bundleno = 963 (0x3c3), region = 44  ;;  %s1802_s14 = sshll.u32 (!%p333_p11), %s2574_s26, 6 }
  0x45   : > { %s339_s20 = scalar_lea.sflag (!%p333_p11), [#allocation5], %s2574_s26  ;;  %s2578_s30 = scalar_lea.vmem (!%p333_p11), [#allocation4], %s1802_s14 }
  0x49   : > { %2312 = dma.done.wait (%p2513_p8), %s339_s20, 1024  }
  0x4a   : > { %2314 = vsyncadd (%p2513_p8), %s339_s20, 4294966272  ;;  %s1803_s7 = sshll.u32 %s2574_s26, 3  ;;  %s382_s8 = sand.u32 1, %s2333_s28  }
  0x4b   : > { %s1805_s29 = sshll.u32 %s382_s8, 4  ;;  %s2586_s10 = scalar_lea.vmem [#allocation7], %s1803_s7 }
  0x4c   : > { %s2588_s27 = scalar_lea.vmem [#allocation8], %s1803_s7  ;;  %s2590_s17 = scalar_lea.vmem [#allocation10], %s1805_s29 }
  0x4d   : > { %p1806_p6 = scmp.ne.s32.totalorder %s2353_s11, 0 }
  0x4f   : > { %394 = sbr.rel (%p1806_p6) target bundleno = 86 (0x56), region = 52 }
  0x54   : > { %v2375_v0 = vmov 0.0  }
  0x55   : > { %395 = vst [vmem:[#allocation2] sm:$0xff] %v2375_v0 }
  0x56 PF: > { %s3006_s1 = sld [smem:[#allocation26_spill]]  ;;  %v397_v21 = vld [vmem:[%s2578_s30 + $0x8] sm:$0xff]  ;;  %v2648_v31 = vld [vmem:[%s2578_s30] sm:$0xff]  ;;  %v2655_v36 = vld [vmem:[%s2578_s30 + $0x18] sm:$0xff]  ;;  %vm468_vm0 = vcmask 1045509   ;;  %vm466_vm1 = vcmask 1041409  }
  0x57   : > { %611 = vmatprep.mubr.f32.mxu0 %v397_v21  ;;  %v2658_v37 = vld [vmem:[%s2578_s30 + $0x10] sm:$0xff]  ;;  %v2661_v38 = vld [vmem:[%s2578_s30 + $0x28] sm:$0xff]  ;;  %v411_v39 = vrot.slane %v397_v21, 4  ;;  %v405_v40 = vrot.slane %v2648_v31, 4  ;;  %v423_v41 = vrot.slane %v2655_v36, 4  ;;  %v2667_v43 = vld [vmem:[%s2578_s30 + $0x20] sm:$0xff] }
  0x58   : > { %v417_v42 = vrot.slane %v2658_v37, 4  ;;  %v2670_v44 = vld [vmem:[%s2578_s30 + $0x38] sm:$0xff]  ;;  %v435_v46 = vrot.slane %v2661_v38, 4  ;;  %v429_v47 = vrot.slane %v2667_v43, 4  ;;  %v2680_v53 = vld [vmem:[%s2578_s30 + $0x30] sm:$0xff]  ;;  %vm473_vm2 = vcmask 1046534  }
  0x59   : > { %v447_v48 = vrot.slane %v2670_v44, 4  ;;  %v412_v49 = vadd.f32 %v411_v39, %v397_v21  ;;  %v406_v50 = vadd.f32 %v405_v40, %v2648_v31  ;;  %v424_v51 = vadd.f32 %v423_v41, %v2655_v36  ;;  %s3007_s3 = sld [smem:[#allocation28_spill]]  ;;  %s2377_s25 = smov 112  }
  0x5a   : > { %v418_v52 = vadd.f32 %v417_v42, %v2658_v37  ;;  %v436_v54 = vadd.f32 %v435_v46, %v2661_v38  ;;  %v430_v55 = vadd.f32 %v429_v47, %v2667_v43  ;;  %v441_v57 = vrot.slane %v2680_v53, 4  ;;  %s2378_s14 = smov 16   ;;  %s2379_s20 = smov 32  }
  0x5b   : > { %v448_v56 = vadd.f32 %v447_v48, %v2670_v44  ;;  %v413_v58 = vrot.slane %v412_v49, 2  ;;  %v407_v59 = vrot.slane %v406_v50, 2  ;;  %v425_v60 = vrot.slane %v424_v51, 2  ;;  %s2380_s7 = smov 48   ;;  %s2381_s8 = smov 64  }
  0x5c   : > { %v1925_v1 = vld [vmem:[%s3006_s1 + $0x78] sm:$0xff]   ;;  %v1924_v3 = vld [vmem:[%s3006_s1 + $0x70] sm:$0xff]   ;;  %v1923_v9 = vld [vmem:[%s3006_s1 + $0x68] sm:$0xff]   ;;  %v419_v61 = vrot.slane %v418_v52, 2  ;;  %v437_v62 = vrot.slane %v436_v54, 2  ;;  %v431_v63 = vrot.slane %v430_v55, 2 }
  0x5d   : > { %v1917_v2 = vld [vmem:[%s3006_s1 + $0x38] sm:$0xff]   ;;  %v1909_v4 = vunpack.c.l.bf16 %v1925_v1  ;;  %v1910_v5 = vunpack.c.h.bf16 %v1925_v1  ;;  %v1916_v7 = vld [vmem:[%s3006_s1 + $0x30] sm:$0xff]   ;;  %v1906_v10 = vunpack.c.h.bf16 %v1924_v3  ;;  %v1915_v11 = vld [vmem:[%s3006_s1 + $0x28] sm:$0xff]   ;;  %v1905_v16 = vunpack.c.l.bf16 %v1924_v3  ;;  %s2382_s29 = smov 80   ;;  %s2383_s18 = smov 96  }
  0x5e   : > { %v1878_v6 = vunpack.c.h.bf16 %v1917_v2  ;;  %v1877_v8 = vunpack.c.l.bf16 %v1917_v2  ;;  %v2614_v12 = vld [vmem:[%s3006_s1 + $0x60] sm:$0xff]   ;;  %v1874_v13 = vunpack.c.h.bf16 %v1916_v7  ;;  %v2624_v15 = vld [vmem:[%s3006_s1 + $0x58] sm:$0xff]   ;;  %v1873_v17 = vunpack.c.l.bf16 %v1916_v7  ;;  %v2634_v20 = vld [vmem:[%s3006_s1 + $0x50] sm:$0xff]   ;;  %p1831_p8 = scmp.ne.s32.totalorder %s2353_s11, 1 }
  0x5f   : > { %1926 = vmatprep.subr.mxu0 %v1910_v5  ;;  %v2619_v14 = vld [vmem:[%s3006_s1 + $0x20] sm:$0xff]   ;;  %v1902_v18 = vunpack.c.h.bf16 %v1923_v9  ;;  %v2629_v19 = vld [vmem:[%s3006_s1 + $0x18] sm:$0xff]   ;;  %v1870_v22 = vunpack.c.h.bf16 %v1915_v11  ;;  %v1901_v23 = vunpack.c.l.bf16 %v1923_v9  ;;  %v1869_v24 = vunpack.c.l.bf16 %v1915_v11  ;;  %v2645_v30 = vld [vmem:[%s3006_s1 + $0x10] sm:$0xff]   ;;  %s3008_s2 = sld [smem:[#allocation27_spill]] (!%p1831_p8) }
  0x60   : > { %1927 = vmatpush3.msra.mxu0 %v1878_v6  ;;  %v1898_v25 = vunpack.c.h.bf16 %v2614_v12  ;;  %v1866_v26 = vunpack.c.h.bf16 %v2619_v14  ;;  %v1897_v27 = vunpack.c.l.bf16 %v2614_v12  ;;  %v1865_v28 = vunpack.c.l.bf16 %v2619_v14  ;;  %v1911_v40 = vld [vmem:[%s3006_s1 + $0x8] sm:$0xff]  }
  0x61   : > { %1928 = vmatprep.subr.mxu0 %v1909_v4  ;;  %v1894_v29 = vunpack.c.h.bf16 %v2624_v15  ;;  %v1862_v32 = vunpack.c.h.bf16 %v2629_v19  ;;  %v1893_v33 = vunpack.c.l.bf16 %v2624_v15  ;;  %v1861_v34 = vunpack.c.l.bf16 %v2629_v19 }
  0x62   : > { %1929 = vmatpush3.msra.mxu0 %v1877_v8  ;;  %v1890_v35 = vunpack.c.h.bf16 %v2634_v20  ;;  %v1858_v45 = vunpack.c.h.bf16 %v2645_v30  ;;  %v449_v0 = vrot.slane %v448_v56, 2  ;;  %v442_v1 = vadd.f32 %v441_v57, %v2680_v53  ;;  %v404_v57 = vld [vmem:[#allocation2] sm:$0xff] }
  0x63   : > { %1930 = vmatprep.subr.mxu0 %v1906_v10  ;;  %v414_v2 = vadd.f32 %v413_v58, %v412_v49  ;;  %v408_v3 = vadd.f32 %v407_v59, %v406_v50  ;;  %v426_v4 = vadd.f32 %v425_v60, %v424_v51  ;;  %v420_v5 = vadd.f32 %v419_v61, %v418_v52  ;;  %v1918_v49 = vld [vmem:[%s3006_s1 + $0x40] sm:$0xff]  }
  0x64   : > { %1931 = vmatpush3.msra.mxu0 %v1874_v13  ;;  %v438_v6 = vadd.f32 %v437_v62, %v436_v54  ;;  %v432_v7 = vadd.f32 %v431_v63, %v430_v55  ;;  %v450_v8 = vadd.f32 %v449_v0, %v448_v56  ;;  %v443_v9 = vrot.slane %v442_v1, 2  ;;  %v2726_v63 = vld [vmem:[%s3007_s3] sm:$0xff] }
  0x65   : > { %1932 = vmatprep.subr.mxu0 %v1905_v16  ;;  %v415_v10 = vrot.slane %v414_v2, 1  ;;  %v409_v11 = vrot.slane %v408_v3, 1  ;;  %v427_v12 = vrot.slane %v426_v4, 1  ;;  %v421_v13 = vrot.slane %v420_v5, 1 }
  0x66   : > { %1933 = vmatpush3.msra.mxu0 %v1873_v17  ;;  %v439_v14 = vrot.slane %v438_v6, 1  ;;  %v433_v16 = vrot.slane %v432_v7, 1  ;;  %v451_v17 = vrot.slane %v450_v8, 1  ;;  %v1854_v48 = vunpack.c.h.bf16 %v1911_v40 }
  0x67   : > { %1934 = vmatprep.subr.mxu0 %v1902_v18  ;;  %v444_v18 = vadd.f32 %v443_v9, %v442_v1  ;;  %v416_v21 = vadd.f32 %v415_v10, %v414_v2  ;;  %vm471_vm3 = vcmask 1042434   ;;  %v1882_v52 = vunpack.c.h.bf16 %v1918_v49 }
  0x68   : > { %1935 = vmatpush3.msra.mxu0 %v1870_v22  ;;  %v410_v22 = vadd.f32 %v409_v11, %v408_v3  ;;  %vm478_vm4 = vcmask 1047559   ;;  %vm476_vm5 = vcmask 1043459   ;;  %v1881_v58 = vunpack.c.l.bf16 %v1918_v49 }
  0x69   : > { %1936 = vmatprep.subr.mxu0 %v1901_v23  ;;  %v428_v23 = vadd.f32 %v427_v12, %v426_v4  ;;  %v445_v39 = vrot.slane %v444_v18, 1  ;;  %vm655_vm6 = vcmask 31744   ;;  %vm632_vm7 = vcmask 261120  }
  0x6a   : > { %1937 = vmatpush3.msra.mxu0 %v1869_v24  ;;  %v422_v24 = vadd.f32 %v421_v13, %v420_v5  ;;  %v461_v41 = vcombine.low %v410_v22, %v416_v21  ;;  %1996 = vmatprep.mubr.msk.f32.mxu1 %vm655_vm6, %v2726_v63  ;;  %vm662_vm8 = vcmask 1043456   ;;  %vm746_vm9 = vcmask 130048  }
  0x6b   : > { %1938 = vmatprep.subr.mxu0 %v1898_v25  ;;  %v1919_v25 = vld [vmem:[%s3006_s1 + $0x48] sm:$0xff]   ;;  %v446_v47 = vadd.f32 %v445_v39, %v444_v18  ;;  %vm855_vm10 = vcmask 261248   ;;  %vm955_vm11 = vcmask 392448   ;;  %vm1059_vm12 = vcmask 523648  }
  0x6c   : > { %1939 = vmatpush3.msra.mxu0 %v1866_v26  ;;  %v440_v26 = vadd.f32 %v439_v14, %v438_v6  ;;  %v462_v42 = vcombine.low %v422_v24, %v428_v23  ;;  %v1886_v15 = vunpack.c.h.bf16 %v1919_v25  ;;  %v1885_v50 = vunpack.c.l.bf16 %v1919_v25 }
  0x6d   : > { %1940 = vmatprep.subr.mxu0 %v1897_v27  ;;  %v434_v27 = vadd.f32 %v433_v16, %v432_v7  ;;  %vm1163_vm13 = vcmask 654848   ;;  %vm1267_vm14 = vcmask 786048   ;;  %vm1371_vm15 = vcmask 917248  }
  0x6e   : > { %1941 = vmatpush3.msra.mxu0 %v1865_v28  ;;  %v452_v28 = vadd.f32 %v451_v17, %v450_v8 }
  0x6f   : > { %1942 = vmatprep.subr.mxu0 %v1894_v29  ;;  %v1889_v29 = vunpack.c.l.bf16 %v2634_v20  ;;  %v463_v46 = vcombine.low %v434_v27, %v440_v26  ;;  %v1848_v20 = vld [vmem:[%s3006_s1] sm:$0xff]  }
  0x70   : > { %1943 = vmatpush3.msra.mxu0 %v1862_v32  ;;  %v1857_v32 = vunpack.c.l.bf16 %v2645_v30  ;;  %v1853_v30 = vunpack.c.l.bf16 %v1911_v40  ;;  %v1850_v55 = vunpack.c.h.bf16 %v1848_v20  ;;  %v1849_v60 = vunpack.c.l.bf16 %v1848_v20 }
  0x71   : > { %1944 = vmatprep.subr.mxu0 %v1893_v33  ;;  %v465_v33 = vrot.slane %v462_v42, 7  ;;  %v470_v19 = vrot.slane %v463_v46, 6 }
  0x72   : > { %1945 = vmatpush3.msra.mxu0 %v1861_v34  ;;  %v464_v34 = vcombine.low %v446_v47, %v452_v28 }
  0x73   : > { %1946 = vmatprep.subr.mxu0 %v1890_v35  ;;  %v467_v35 = vsel %vm466_vm1, %v465_v33, %v461_v41 }
  0x74   : > { %1947 = vmatpush3.msra.mxu0 %v1858_v45  ;;  %v469_v45 = vsel %vm468_vm0, %v465_v33, %v467_v35  ;;  %v475_v51 = vrot.slane %v464_v34, 5  ;;  %vm1475_vm0 = vcmask 1048448  }
  0x75   : > { %1948 = vmatprep.subr.mxu0 %v1889_v29  ;;  %v472_v54 = vsel %vm471_vm3, %v470_v19, %v469_v45 }
  0x76   : > { %1949 = vmatpush3.msra.mxu0 %v1857_v32  ;;  %v474_v56 = vsel %vm473_vm2, %v470_v19, %v472_v54  ;;  %v2742_v32 = vld [vmem:[%s3007_s3 + $0x8] sm:$0xff] }
  0x77   : > { %1950 = vmatprep.subr.mxu0 %v1886_v15  ;;  %v477_v59 = vsel %vm476_vm5, %v475_v51, %v474_v56 }
  0x78   : > { %1951 = vmatpush3.msra.mxu0 %v1854_v48  ;;  %v479_v61 = vsel %vm478_vm4, %v475_v51, %v477_v59 }
  0x79   : > { %1952 = vmatprep.subr.mxu0 %v1885_v50  ;;  %v481_v62 = vadd.f32 %v479_v61, %v404_v57 }
  0x7a   : > { %1953 = vmatpush3.msra.mxu0 %v1853_v30 }
  0x7b   : > { %1954 = vmatprep.subr.mxu0 %v1882_v52  ;;  %482 = vst [vmem:[#allocation2] sm:$0xff] %v481_v62 }
  0x7c   : > { %1955 = vmatpush3.msra.mxu0 %v1850_v55 }
  0x7d   : > { %1956 = vmatprep.subr.mxu0 %v1881_v58 }
  0x7e   : > { %1957 = vmatpush3.msra.mxu0 %v1849_v60 }
  0x7f   : > { %612 = vmatmul.mubr.f32.vlgmr.msra.gmra.mxu0 %v2648_v31  ;;  %v640_v31 = vld [vmem:[%s2962_s5] sm:$0xff] }
  0x80   : > { %616 = vmatprep.mubr.f32.mxu0 %v2655_v36  ;;  %v2376_v36 = vmov 0  }
  0x81   : > { %2159 = vset.pattern.permute.xlu0 %v2376_v36 }
  0x82   : > { %750 = vperm.xlu0 %2159, %v640_v31  }
  0x83   : > { %617 = vmatmul.mubr.f32.gmra.mxu0 %v2658_v37  ;;  %v639_v37 = vld [vmem:[%s2961_s4] sm:$0xff] }
  0x84   : > { %621 = vmatprep.mubr.f32.mxu0 %v2661_v38 }
  0x86   : > { %742 = vperm.xlu0 %2159, %v639_v37  }
  0x87   : > { %622 = vmatmul.mubr.f32.gmra.mxu0 %v2667_v43 }
  0x88   : > { %626 = vmatprep.mubr.f32.mxu0 %v2670_v44 }
  0x8b   : > { %627 = vmatmul.mubr.f32.gmra.mxu0 %v2680_v53 }
 0x13f   : > { %v1958_v38 = vpop.f32.mrf.mxu0 }
 0x141   : > { %v1959_v43 = vpop.f32.mrf.mxu0 }
 0x142   : > { %v1960_v44 = vadd.f32 %v1959_v43, %v1958_v38 }
 0x143   : > { %v1961_v53 = vpop.f32.mrf.mxu0 }
 0x144   : > { %633 = vst.msk [vmem:[#allocation3] sm:$0xff] %vm632_vm7, %v1960_v44 }
 0x145   : > { %v1962_v0 = vpop.f32.mrf.mxu0 }
 0x146   : > { %v1963_v1 = vadd.f32 %v1962_v0, %v1961_v53 }
 0x147   : > { %v1964_v2 = vpop.f32.mrf.mxu0 }
 0x148   : > { %634 = vst.msk [vmem:[#allocation3 + $0x8] sm:$0xff] %vm632_vm7, %v1963_v1 }
 0x149   : > { %v1965_v3 = vpop.f32.mrf.mxu0 }
 0x14a   : > { %v1966_v4 = vadd.f32 %v1965_v3, %v1964_v2 }
 0x14b   : > { %v1967_v5 = vpop.f32.mrf.mxu0  ;;  %v641_v16 = vld [vmem:[#allocation3] sm:$0x1]  ;;  %v759_v29 = vld [vmem:[#allocation3 + $0x1] sm:$0x1]  ;;  %v859_v48 = vld [vmem:[#allocation3 + $0x2] sm:$0x1] }
 0x14c   : > { %635 = vst.msk [vmem:[#allocation3 + $0x10] sm:$0xff] %vm632_vm7, %v1966_v4  ;;  %v963_v54 = vld [vmem:[#allocation3 + $0x3] sm:$0x1]  ;;  %v1067_v36 = vld [vmem:[#allocation3 + $0x4] sm:$0x1] }
 0x14d   : > { %v1968_v6 = vpop.f32.mrf.mxu0  ;;  %v1171_v4 = vld [vmem:[#allocation3 + $0x5] sm:$0x1] }
 0x14e   : > { %v1969_v7 = vadd.f32 %v1968_v6, %v1967_v5 }
 0x14f   : > { %v642_v8 = vld [vmem:[#allocation3 + $0x8] sm:$0x1]  ;;  %v760_v10 = vld [vmem:[#allocation3 + $0x9] sm:$0x1]  ;;  %v860_v14 = vld [vmem:[#allocation3 + $0xa] sm:$0x1] }
 0x150   : > { %636 = vst.msk [vmem:[#allocation3 + $0x18] sm:$0xff] %vm632_vm7, %v1969_v7  ;;  %v649_v12 = vrot.slane %v642_v8, 7  ;;  %v767_v17 = vrot.slane %v760_v10, 7  ;;  %v867_v28 = vrot.slane %v860_v14, 7  ;;  %v964_v41 = vld [vmem:[#allocation3 + $0xb] sm:$0x1] }
 0x151   : > { %v971_v50 = vrot.slane %v964_v41, 7  ;;  %v1068_v30 = vld [vmem:[#allocation3 + $0xc] sm:$0x1]  ;;  %v1172_v60 = vld [vmem:[#allocation3 + $0xd] sm:$0x1] }
 0x152   : > { %v650_v25 = vsel %vm466_vm1, %v649_v12, %v641_v16  ;;  %v768_v46 = vsel %vm466_vm1, %v767_v17, %v759_v29  ;;  %v868_v34 = vsel %vm466_vm1, %v867_v28, %v859_v48  ;;  %v1075_v57 = vrot.slane %v1068_v30, 7  ;;  %v1276_v0 = vld [vmem:[#allocation3 + $0xe] sm:$0x1]  ;;  %v1380_v10 = vld [vmem:[#allocation3 + $0xf] sm:$0x1] }
 0x153   : > { %v643_v9 = vld [vmem:[#allocation3 + $0x10] sm:$0x1]  ;;  %v761_v11 = vld [vmem:[#allocation3 + $0x11] sm:$0x1]  ;;  %v861_v21 = vld [vmem:[#allocation3 + $0x12] sm:$0x1]  ;;  %v972_v56 = vsel %vm466_vm1, %v971_v50, %v963_v54 }
 0x154   : > { %v651_v13 = vrot.slane %v643_v9, 6  ;;  %v769_v18 = vrot.slane %v761_v11, 6  ;;  %v869_v40 = vrot.slane %v861_v21, 6  ;;  %v965_v15 = vld [vmem:[#allocation3 + $0x13] sm:$0x1]  ;;  %v1076_v38 = vsel %vm466_vm1, %v1075_v57, %v1067_v36 }
 0x155   : > { %v973_v35 = vrot.slane %v965_v15, 6  ;;  %v1069_v52 = vld [vmem:[#allocation3 + $0x14] sm:$0x1]  ;;  %v1173_v31 = vld [vmem:[#allocation3 + $0x15] sm:$0x1]  ;;  %v1179_v43 = vrot.slane %v1172_v60, 7 }
 0x156   : > { %v652_v39 = vsel %vm471_vm3, %v651_v13, %v650_v25  ;;  %v770_v33 = vsel %vm471_vm3, %v769_v18, %v768_v46  ;;  %v870_v20 = vsel %vm471_vm3, %v869_v40, %v868_v34  ;;  %v1077_v59 = vrot.slane %v1069_v52, 6  ;;  %v1277_v3 = vld [vmem:[#allocation3 + $0x16] sm:$0x1]  ;;  %v1381_v13 = vld [vmem:[#allocation3 + $0x17] sm:$0x1] }
 0x157   : > { %v644_v22 = vld [vmem:[#allocation3 + $0x18] sm:$0x1]  ;;  %v762_v23 = vld [vmem:[#allocation3 + $0x19] sm:$0x1]  ;;  %v862_v24 = vld [vmem:[#allocation3 + $0x1a] sm:$0x1]  ;;  %v974_v58 = vsel %vm471_vm3, %v973_v35, %v972_v56  ;;  %v1180_v6 = vsel %vm466_vm1, %v1179_v43, %v1171_v4 }
 0x158   : > { %v653_v26 = vrot.slane %v644_v22, 5  ;;  %v771_v27 = vrot.slane %v762_v23, 5  ;;  %v871_v47 = vrot.slane %v862_v24, 5  ;;  %v966_v49 = vld [vmem:[#allocation3 + $0x1b] sm:$0x1]  ;;  %v1078_v44 = vsel %vm471_vm3, %v1077_v59, %v1076_v38 }
 0x159   : > { %v975_v51 = vrot.slane %v966_v49, 5  ;;  %v1070_v55 = vld [vmem:[#allocation3 + $0x1c] sm:$0x1]  ;;  %v1174_v37 = vld [vmem:[#allocation3 + $0x1d] sm:$0x1]  ;;  %v1181_v53 = vrot.slane %v1173_v31, 6 }
 0x15a   : > { %v654_v42 = vsel %vm476_vm5, %v653_v26, %v652_v39  ;;  %v772_v19 = vsel %vm476_vm5, %v771_v27, %v770_v33  ;;  %v872_v45 = vsel %vm476_vm5, %v871_v47, %v870_v20  ;;  %v1079_v62 = vrot.slane %v1070_v55, 5  ;;  %v1278_v5 = vld [vmem:[#allocation3 + $0x1e] sm:$0x1]  ;;  %v1275_v14 = vld [vmem:[#allocation3 + $0x6] sm:$0x1]  ;;  %v751_v39 = vpop.permute.xlu0 %750 }
 0x15b   : > { %1994 = vmatprep.subr.msk.mxu1 %vm662_vm8, %v654_v42  ;;  %v976_v61 = vsel %vm476_vm5, %v975_v51, %v974_v58  ;;  %v1183_v2 = vrot.slane %v1174_v37, 5  ;;  %v1283_v7 = vrot.slane %v1276_v0, 7  ;;  %v1182_v8 = vsel %vm471_vm3, %v1181_v53, %v1180_v6  ;;  %v1382_v16 = vld [vmem:[#allocation3 + $0x1f] sm:$0x1]  ;;  %v1379_v25 = vld [vmem:[#allocation3 + $0x7] sm:$0x1] }
 0x15c   : > { %1995 = vmatpush3.msk.msra.mxu1 %vm662_vm8, %v654_v42  ;;  %v1080_v1 = vsel %vm476_vm5, %v1079_v62, %v1078_v44  ;;  %v1285_v9 = vrot.slane %v1277_v3, 6  ;;  %v1287_v12 = vrot.slane %v1278_v5, 5  ;;  %v1387_v18 = vrot.slane %v1380_v10, 7 }
 0x15d   : > { %1997 = vmatmul.mubr.msk.f32.vlgmr.msra.gmra.mxu1 %vm655_vm6, %v2742_v32  ;;  %1999 = vmatprep.subr.msk.mxu1 %vm662_vm8, %v772_v19  ;;  %v1184_v11 = vsel %vm476_vm5, %v1183_v2, %v1182_v8  ;;  %v1284_v17 = vsel %vm466_vm1, %v1283_v7, %v1275_v14  ;;  %v1389_v22 = vrot.slane %v1381_v13, 6  ;;  %v1391_v24 = vrot.slane %v1382_v16, 5 }
 0x15e   : > { %2000 = vmatpush3.msk.msra.mxu1 %vm662_vm8, %v772_v19  ;;  %2001 = vmatprep.mubr.msk.f32.mxu1 %vm655_vm6, %v2726_v63  ;;  %v1286_v21 = vsel %vm471_vm3, %v1285_v9, %v1284_v17  ;;  %v1388_v26 = vsel %vm466_vm1, %v1387_v18, %v1379_v25  ;;  %v743_v40 = vpop.permute.xlu0 %742 }
 0x15f   : > { %2004 = vmatprep.subr.msk.mxu1 %vm662_vm8, %v872_v45  ;;  %v1288_v23 = vsel %vm476_vm5, %v1287_v12, %v1286_v21  ;;  %v1390_v27 = vsel %vm471_vm3, %v1389_v22, %v1388_v26 }
 0x160   : > { %v1392_v28 = vsel %vm476_vm5, %v1391_v24, %v1390_v27 }
 0x161   : > { %2002 = vmatmul.mubr.msk.f32.vlgmr.msra.gmra.mxu1 %vm655_vm6, %v2742_v32 }
 0x162   : > { %2005 = vmatpush3.msk.msra.mxu1 %vm662_vm8, %v872_v45  ;;  %2006 = vmatprep.mubr.msk.f32.mxu1 %vm655_vm6, %v2726_v63 }
 0x163   : > { %2009 = vmatprep.subr.msk.mxu1 %vm662_vm8, %v976_v61 }
 0x165   : > { %2007 = vmatmul.mubr.msk.f32.vlgmr.msra.gmra.mxu1 %vm655_vm6, %v2742_v32 }
 0x166   : > { %2010 = vmatpush3.msk.msra.mxu1 %vm662_vm8, %v976_v61  ;;  %2011 = vmatprep.mubr.msk.f32.mxu1 %vm655_vm6, %v2726_v63 }
 0x167   : > { %2014 = vmatprep.subr.msk.mxu1 %vm662_vm8, %v1080_v1 }
 0x169   : > { %2012 = vmatmul.mubr.msk.f32.vlgmr.msra.gmra.mxu1 %vm655_vm6, %v2742_v32 }
 0x16a   : > { %2015 = vmatpush3.msk.msra.mxu1 %vm662_vm8, %v1080_v1  ;;  %2016 = vmatprep.mubr.msk.f32.mxu1 %vm655_vm6, %v2726_v63 }
 0x16b   : > { %2019 = vmatprep.subr.msk.mxu1 %vm662_vm8, %v1184_v11 }
 0x16d   : > { %2017 = vmatmul.mubr.msk.f32.vlgmr.msra.gmra.mxu1 %vm655_vm6, %v2742_v32 }
 0x16e   : > { %2020 = vmatpush3.msk.msra.mxu1 %vm662_vm8, %v1184_v11  ;;  %2021 = vmatprep.mubr.msk.f32.mxu1 %vm655_vm6, %v2726_v63 }
 0x16f   : > { %2024 = vmatprep.subr.msk.mxu1 %vm662_vm8, %v1288_v23 }
 0x171   : > { %2022 = vmatmul.mubr.msk.f32.vlgmr.msra.gmra.mxu1 %vm655_vm6, %v2742_v32 }
 0x172   : > { %2025 = vmatpush3.msk.msra.mxu1 %vm662_vm8, %v1288_v23  ;;  %2026 = vmatprep.mubr.msk.f32.mxu1 %vm655_vm6, %v2726_v63 }
 0x173   : > { %2029 = vmatprep.subr.msk.mxu1 %vm662_vm8, %v1392_v28 }
 0x175   : > { %2027 = vmatmul.mubr.msk.f32.vlgmr.msra.gmra.mxu1 %vm655_vm6, %v2742_v32 }
 0x176   : > { %2030 = vmatpush3.msk.msra.mxu1 %vm662_vm8, %v1392_v28  ;;  %2031 = vmatprep.mubr.msk.f32.mxu1 %vm655_vm6, %v2726_v63 }
 0x179   : > { %2032 = vmatmul.mubr.msk.f32.vlgmr.msra.gmra.mxu1 %vm655_vm6, %v2742_v32 }
 0x21d   : > { %v1998_v29 = vpop.f32.mrf.mxu1 }
 0x21e   : > { %v753_v41 = vadd.f32 %v1998_v29, %v751_v39 }
 0x21f   : > { %v731_v42 = vpop.f32.mrf.mxu1 }
 0x220   : > { %v745_v46 = vadd.f32 %v743_v40, %v731_v42  ;;  %755 = vrot.lane.b32.xlu1 %v753_v41, %s2377_s25 }
 0x221   : > { %v2003_v47 = vpop.f32.mrf.mxu1 }
 0x222   : > { %747 = vst.msk [vmem:[%s2588_s27] sm:$0xff] %vm746_vm9, %v745_v46  ;;  %v857_v37 = vadd.f32 %v2003_v47, %v751_v39 }
 0x223   : > { %v841_v15 = vpop.f32.mrf.mxu1 }
 0x224   : > { %v850_v33 = vadd.f32 %v841_v15, %v743_v40 }
 0x225   : > { %v2008_v48 = vpop.f32.mrf.mxu1 }
 0x226   : > { %852 = vrot.lane.b32.xlu1 %v850_v33, %s2378_s14  ;;  %v957_v32 = vadd.f32 %v2008_v48, %v751_v39 }
 0x227   : > { %v941_v63 = vpop.f32.mrf.mxu1 }
 0x228   : > { %v950_v49 = vadd.f32 %v941_v63, %v743_v40 }
 0x229   : > { %v2013_v19 = vpop.f32.mrf.mxu1 }
 0x22a   : > { %952 = vrot.lane.b32.xlu0 %v950_v49, %s2379_s20  ;;  %959 = vrot.lane.b32.xlu1 %v957_v32, %s2378_s14  ;;  %v1061_v50 = vadd.f32 %v2013_v19, %v751_v39 }
 0x22b   : > { %v1045_v34 = vpop.f32.mrf.mxu1 }
 0x22c   : > { %v1054_v20 = vadd.f32 %v1045_v34, %v743_v40 }
 0x22d   : > { %v2018_v35 = vpop.f32.mrf.mxu1 }
 0x22e   : > { %1056 = vrot.lane.b32.xlu0 %v1054_v20, %s2380_s7  ;;  %1063 = vrot.lane.b32.xlu1 %v1061_v50, %s2379_s20  ;;  %v1165_v45 = vadd.f32 %v2018_v35, %v751_v39 }
 0x22f   : > { %v1149_v30 = vpop.f32.mrf.mxu1 }
 0x230   : > { %v1158_v51 = vadd.f32 %v1149_v30, %v743_v40 }
 0x231   : > { %v2023_v52 = vpop.f32.mrf.mxu1 }
 0x232   : > { %1160 = vrot.lane.b32.xlu0 %v1158_v51, %s2381_s8  ;;  %1167 = vrot.lane.b32.xlu1 %v1165_v45, %s2380_s7  ;;  %v1269_v55 = vadd.f32 %v2023_v52, %v751_v39 }
 0x233   : > { %v1253_v54 = vpop.f32.mrf.mxu1 }
 0x234   : > { %v1262_v56 = vadd.f32 %v1253_v54, %v743_v40 }
 0x235   : > { %v2028_v57 = vpop.f32.mrf.mxu1 }
 0x236   : > { %1264 = vrot.lane.b32.xlu0 %v1262_v56, %s2382_s29  ;;  %1271 = vrot.lane.b32.xlu1 %v1269_v55, %s2381_s8  ;;  %v1373_v59 = vadd.f32 %v2028_v57, %v751_v39 }
 0x237   : > { %v1357_v58 = vpop.f32.mrf.mxu1 }
 0x238   : > { %v1366_v60 = vadd.f32 %v1357_v58, %v743_v40 }
 0x239   : > { %v2033_v61 = vpop.f32.mrf.mxu1 }
 0x23a   : > { %1368 = vrot.lane.b32.xlu0 %v1366_v60, %s2383_s18  ;;  %1375 = vrot.lane.b32.xlu1 %v1373_v59, %s2382_s29  ;;  %v1477_v31 = vadd.f32 %v2033_v61, %v751_v39 }
 0x23b   : > { %v1461_v62 = vpop.f32.mrf.mxu1 }
 0x23c   : > { %v1470_v36 = vadd.f32 %v1461_v62, %v743_v40 }
 0x23e   : > { %1472 = vrot.lane.b32.xlu0 %v1470_v36, %s2377_s25  ;;  %1479 = vrot.lane.b32.xlu1 %v1477_v31, %s2383_s18 }
 0x292   : > { %v756_v38 = vpop.permute.xlu1 %755 }
 0x293   : > { %758 = vst.msk [vmem:[%s2586_s10] sm:$0xff] %vm746_vm9, %v756_v38 }
 0x294   : > { %858 = vst.msk [vmem:[%s2586_s10] sm:$0xff] %vm855_vm10, %v857_v37 }
 0x298   : > { %v853_v43 = vpop.permute.xlu1 %852 }
 0x299   : > { %856 = vst.msk [vmem:[%s2588_s27] sm:$0xff] %vm855_vm10, %v853_v43 }
 0x29c   : > { %v953_v44 = vpop.permute.xlu0 %952  ;;  %v960_v53 = vpop.permute.xlu1 %959 }
 0x29d   : > { %956 = vst.msk [vmem:[%s2588_s27] sm:$0xff] %vm955_vm11, %v953_v44  ;;  %962 = vst.msk [vmem:[%s2586_s10] sm:$0xff] %vm955_vm11, %v960_v53 }
 0x2a0   : > { %v1057_v0 = vpop.permute.xlu0 %1056  ;;  %v1064_v1 = vpop.permute.xlu1 %1063 }
 0x2a1   : > { %1060 = vst.msk [vmem:[%s2588_s27] sm:$0xff] %vm1059_vm12, %v1057_v0  ;;  %1066 = vst.msk [vmem:[%s2586_s10] sm:$0xff] %vm1059_vm12, %v1064_v1 }
 0x2a4   : > { %v1161_v2 = vpop.permute.xlu0 %1160  ;;  %v1168_v3 = vpop.permute.xlu1 %1167 }
 0x2a5   : > { %1164 = vst.msk [vmem:[%s2588_s27] sm:$0xff] %vm1163_vm13, %v1161_v2  ;;  %1170 = vst.msk [vmem:[%s2586_s10] sm:$0xff] %vm1163_vm13, %v1168_v3 }
 0x2a8   : > { %v1265_v4 = vpop.permute.xlu0 %1264  ;;  %v1272_v5 = vpop.permute.xlu1 %1271 }
 0x2a9   : > { %1268 = vst.msk [vmem:[%s2588_s27] sm:$0xff] %vm1267_vm14, %v1265_v4  ;;  %1274 = vst.msk [vmem:[%s2586_s10] sm:$0xff] %vm1267_vm14, %v1272_v5 }
 0x2ac   : > { %v1369_v6 = vpop.permute.xlu0 %1368  ;;  %v1376_v7 = vpop.permute.xlu1 %1375 }
 0x2ad   : > { %1372 = vst.msk [vmem:[%s2588_s27] sm:$0xff] %vm1371_vm15, %v1369_v6  ;;  %1378 = vst.msk [vmem:[%s2586_s10] sm:$0xff] %vm1371_vm15, %v1376_v7  ;;  %1486 = sbr.rel (%p1831_p8) target bundleno = 891 (0x37b), region = 56 }
 0x2b0   : > { %v1473_v8 = vpop.permute.xlu0 %1472  ;;  %v1480_v9 = vpop.permute.xlu1 %1479 }
 0x2b1   : > { %1476 = vst.msk [vmem:[%s2588_s27] sm:$0xff] %vm1475_vm0, %v1473_v8  ;;  %1482 = vst.msk [vmem:[%s2586_s10] sm:$0xff] %vm1475_vm0, %v1480_v9 }
 0x2b2   : > { %v1488_v10 = vld [vmem:[#allocation2] sm:$0xff]  ;;  %v2384_v12 = vmov 0.0  }
 0x2b3   : > { %v1490_v11 = vcombine.high %v1488_v10, %v1488_v10  ;;  %1562 = vmatprep.mubr.f32.mxu0 %v2384_v12  ;;  %v1487_v13 = vld [vmem:[%s3008_s2] sm:$0xff] }
 0x2b5   : > { %1832 = vmatprep.subr.msk.mxu0 %vm662_vm8, %v1490_v11 }
 0x2b6   : > { %1833 = vmatpush1.msk.msra.mxu0 %vm662_vm8, %v1488_v10 }
 0x2b7   : > { %1834 = vmatmul.mubr.msk.f32.vlgmr.msra.gmra.mxu0 %vm655_vm6, %v1487_v13 }
 0x377   : > { %v1564_v14 = vpop.f32.mrf.mxu0 }
 0x378   : > { %1569 = vst [vmem:[%s2590_s17] sm:$0xff] %v1564_v14 }
 0x379   : > { %v1566_v16 = vpop.f32.mrf.mxu0 }
 0x37a   : > { %1570 = vst [vmem:[%s2590_s17 + $0x8] sm:$0xff] %v1566_v16 }
 0x37b PF: > { %s1576_s22 = sand.u32 1, %s2489_s16   ;;  %s1838_s19 = sshll.u32 %s2357_s12, 1 }
 0x37c   : > { %s2843_s6 = sadd.s32 %s2353_s11, %s1838_s19  ;;  %s1616_s14 = sshll.u32 %s2588_s27, 4  ;;  %s1617_s14 = int_to_ptr.vmem [resolvable:$true] %s1616_s14 }
 0x37d   : > { %s2979_s25 = sshll.u32 %s2843_s6, 7  ;;  %s3009_s8 = sld [smem:[#allocation30_spill]] }
 0x37e   : > { %s2852_s18 = scalar_lea.sflag [#allocation9], %s1576_s22  ;;  %s2189_s23 = scalar_lea.vmem %s1617_s14, 128 }
 0x37f   : > { %p2190_p5 = scmp.ne.s32.totalorder %s1617_s14, %s2189_s23  ;;  %s2385_s16 = smov [#allocation8]  }
 0x380   : > { %s2193_s11 = sshll.u32 %s2385_s16, 4  ;;  %s2194_s11 = int_to_ptr.vmem [resolvable:$false] %s2193_s11 }
 0x381   : > { %p2191_p7 = pnand %p2190_p5, %p2519_p9  ;;  %s2195_s30 = scalar_lea.vmem %s2194_s11, 256 }
 0x382   : > { %p2196_p0 = scmp.lt.s32.totalorder %s1617_s14, %s2194_s11  ;;  %p2197_p3 = scmp.lt.s32.totalorder %s2195_s30, %s2189_s23 }
 0x383   : > { %s1614_s29 = scalar_lea.hbm %s3009_s8, %s2979_s25  ;;  %p2192_p12 = pneg %p2191_p7 }
 0x384   : > { %p2198_p2 = por %p2197_p3, %p2196_p0 }
 0x386   : > { %p2199_p4 = pnand %p2198_p2, %p2192_p12 }
 0x388   : > { %2202 = shalt.err (!%p2199_p4)
}
 0x389   : > { %s2203_s27 = scalar_lea.hbm %s1614_s29, 128  ;;  %s2207_s20 = scalar_lea.hbm %s3009_s8, 512 }
 0x38a   : > { %p2204_p10 = scmp.ne.s32.totalorder %s1614_s29, %s2203_s27  ;;  %p2208_p8 = scmp.lt.s32.totalorder %s1614_s29, %s3009_s8 }
 0x38b   : > { %p2209_p5 = scmp.lt.s32.totalorder %s2207_s20, %s2203_s27 }
 0x38c   : > { %p2205_p11 = pnand %p2204_p10, %p2519_p9 }
 0x38d   : > { %p2210_p7 = por %p2209_p5, %p2208_p8 }
 0x38e   : > { %p2206_p6 = pneg %p2205_p11 }
 0x390   : > { %p2211_p13 = pnand %p2210_p7, %p2206_p6 }
 0x392   : > { %2214 = shalt.err (!%p2211_p13)
}
 0x393   : > { %2037 = dma.vmem_to_hbm [thread:$0]  (%p2519_p9), %s1617_s14, 128, %s1614_s29, %s2852_s18  }
 0x394   : > { %s3010_s23 = sshll.u32 %s2843_s6, 7  ;;  %s3011_s30 = sld [smem:[#allocation29_spill]] }
 0x395   : > { %s1599_s25 = sshll.u32 %s2586_s10, 4  ;;  %s1846_s27 = sshll.u32 %s2357_s12, 8  ;;  %s1600_s25 = int_to_ptr.vmem [resolvable:$true] %s1599_s25 }
 0x396   : > { %s3013_s0 = sld [smem:[#allocation31_spill]]  ;;  %s1572_s2 = scalar_lea.sflag [#allocation6], %s2574_s26 }
 0x397   : > { %s2215_s3 = scalar_lea.vmem %s1600_s25, 128  ;;  %s2386_s6 = smov [#allocation7]  }
 0x398   : > { %p2216_p13 = scmp.ne.s32.totalorder %s1600_s25, %s2215_s3  ;;  %s2219_s14 = sshll.u32 %s2386_s6, 4  ;;  %s2220_s14 = int_to_ptr.vmem [resolvable:$false] %s2219_s14 }
 0x399   : > { %s2221_s29 = scalar_lea.vmem %s2220_s14, 256  ;;  %p2222_p3 = scmp.lt.s32.totalorder %s1600_s25, %s2220_s14 }
 0x39a   : > { %s3012_s22 = smov %s3011_s30  ;;  %s2872_s19 = scalar_lea.hbm %s3011_s30, %s3010_s23 }
 0x39b   : > { %p2217_p12 = pnand %p2216_p13, %p2519_p9  ;;  %p2223_p2 = scmp.lt.s32.totalorder %s2221_s29, %s2215_s3 }
 0x39c   : > { %s2879_s1 = scalar_lea.hbm %s3013_s0, %s1846_s27 }
 0x39d   : > { %p2218_p0 = pneg %p2217_p12  ;;  %p2224_p4 = por %p2223_p2, %p2222_p3 }
 0x39f   : > { %p2225_p10 = pnand %p2224_p4, %p2218_p0 }
 0x3a1   : > { %2228 = shalt.err (!%p2225_p10)
}
 0x3a2   : > { %s2229_s12 = scalar_lea.hbm %s2872_s19, 128  ;;  %s2233_s23 = scalar_lea.hbm %s3012_s22, 512 }
 0x3a3   : > { %p2230_p11 = scmp.ne.s32.totalorder %s2872_s19, %s2229_s12  ;;  %p2234_p5 = scmp.lt.s32.totalorder %s2872_s19, %s3012_s22 }
 0x3a4   : > { %p2235_p7 = scmp.lt.s32.totalorder %s2233_s23, %s2229_s12 }
 0x3a5   : > { %p2231_p6 = pnand %p2230_p11, %p2519_p9 }
 0x3a6   : > { %p2236_p13 = por %p2235_p7, %p2234_p5 }
 0x3a7   : > { %p2232_p8 = pneg %p2231_p6 }
 0x3a9   : > { %p2237_p12 = pnand %p2236_p13, %p2232_p8 }
 0x3ab   : > { %2240 = shalt.err (!%p2237_p12)
}
 0x3ac   : > { %2036 = dma.vmem_to_hbm [thread:$0]  (%p2519_p9), %s1600_s25, 128, %s2872_s19, %s1572_s2  }
 0x3ad   : > { %s1632_s30 = sshll.u32 %s2590_s17, 4  ;;  %s2387_s20 = smov [#allocation10]   ;;  %s1633_s30 = int_to_ptr.vmem [resolvable:$true] %s1632_s30 }
 0x3ae   : > { %s2241_s27 = scalar_lea.vmem %s1633_s30, 256  ;;  %s2245_s7 = sshll.u32 %s2387_s20, 4  ;;  %s2246_s7 = int_to_ptr.vmem [resolvable:$false] %s2245_s7 }
 0x3af   : > { %p2242_p0 = scmp.ne.s32.totalorder %s1633_s30, %s2241_s27  ;;  %s2247_s6 = scalar_lea.vmem %s2246_s7, 512 }
 0x3b0   : > { %p2248_p4 = scmp.lt.s32.totalorder %s1633_s30, %s2246_s7  ;;  %p2249_p10 = scmp.lt.s32.totalorder %s2247_s6, %s2241_s27 }
 0x3b1   : > { %p2243_p3 = pnand %p2242_p0, %p2542_p1 }
 0x3b2   : > { %p2250_p11 = por %p2249_p10, %p2248_p4 }
 0x3b3   : > { %p2244_p2 = pneg %p2243_p3 }
 0x3b5   : > { %p2251_p6 = pnand %p2250_p11, %p2244_p2 }
 0x3b7   : > { %2254 = shalt.err (!%p2251_p6)
}
 0x3b8   : > { %s2255_s2 = scalar_lea.hbm %s2879_s1, 256  ;;  %s2259_s19 = scalar_lea.hbm %s3013_s0, 512 }
 0x3b9   : > { %p2256_p9 = scmp.ne.s32.totalorder %s2879_s1, %s2255_s2  ;;  %p2260_p7 = scmp.lt.s32.totalorder %s2879_s1, %s3013_s0 }
 0x3ba   : > { %p2261_p13 = scmp.lt.s32.totalorder %s2259_s19, %s2255_s2 }
 0x3bb   : > { %p2257_p8 = pnand %p2256_p9, %p2542_p1 }
 0x3bc   : > { %p2262_p12 = por %p2261_p13, %p2260_p7 }
 0x3bd   : > { %p2258_p5 = pneg %p2257_p8 }
 0x3bf   : > { %p2263_p0 = pnand %p2262_p12, %p2258_p5 }
 0x3c1   : > { %2266 = shalt.err (!%p2263_p0)
}
 0x3c2   : > { %2038 = dma.vmem_to_hbm [thread:$0]  (%p2542_p1), %s1633_s30, 256, %s2879_s1, %s2852_s18  }
 0x3c3 PF: > { %s3015_s29 = sld [smem:[#allocation16_spill]]  ;;  %p2057_p3 = scmp.ge.s32.totalorder %s2369_s15, 2 }
 0x3c4   : > { %s3016_s12 = sld [smem:[#allocation21_spill]] }
 0x3c9   : > { %s1644_s26 = sand.u32 1, %s3015_s29  }
 0x3ca   : > { %p3017_p2 = scmp.ne.s32.totalorder %s3016_s12, 0  ;;  %s1645_s10 = scalar_lea.sflag [#allocation6], %s1644_s26 }
 0x3cc   : > { %p2047_p4 = pnand %p2057_p3, %p3017_p2 }
 0x3ce   : > { %p2048_p10 = pneg %p2047_p4 }
 0x3d0   : > { %2316 = dma.done.wait (%p2048_p10), %s1645_s10, 128  }
 0x3d1   : > { %2318 = vsyncadd (%p2048_p10), %s1645_s10, 4294967168  ;;  %s3018_s23 = sadd.s32 4294967294, %s2369_s15  }
 0x3d2   : > { %s1653_s16 = sand.u32 1, %s3018_s23  }
 0x3d3   : > { %s1654_s11 = scalar_lea.sflag [#allocation9], %s1653_s16 }
 0x3d4   : > { %2320 = dma.done.wait (%p2048_p10), %s1654_s11, 128  }
 0x3d5   : > { %2322 = vsyncadd (%p2048_p10), %s1654_s11, 4294967168  ;;  %p3019_p1 = scmp.ne.s32.totalorder %s3002_s21, 0 }
 0x3d7   : > { %p2053_p11 = pnand %p2057_p3, %p3019_p1 }
 0x3d9   : > { %p2054_p6 = pneg %p2053_p11 }
 0x3db   : > { %2324 = dma.done.wait (%p2054_p6), %s1654_s11, 256  }
 0x3dc   : > { %2326 = vsyncadd (%p2054_p6), %s1654_s11, 4294967040  ;;  %s28_s15 = sadd.s32 1, %s2369_s15   ;;  %s3020_s1 = sld [smem:[#allocation15_spill]] }
 0x3dd   : > { %p25_p9 = scmp.ge.s32.totalorder %s28_s15, 6   ;;  %s3021_s29 = sld [smem:[#allocation23_spill]] }
 0x3de   : > { %s3022_s18 = sld [smem:[#allocation17_spill]]  ;;  %s3027_s27 = smov %s2333_s28 }
 0x3df   : > { %s3023_s10 = sld [smem:[#allocation22_spill]]  ;;  %s3029_s30 = smov %s2345_s9 }
 0x3e0   : > { %s3024_s12 = sld [smem:[#allocation18_spill]]  ;;  %s3031_s11 = smov %s2361_s13 }
 0x3e1   : > { %s3025_s3 = sld [smem:[#allocation19_spill]] }
 0x3e2   : > { %s3026_s14 = sld [smem:[#allocation20_spill]]  ;;  %s3028_s28 = smov %s3020_s1 }
 0x3e3   :  { %27 = sbr.rel (!%p25_p9) target bundleno = 19 (0x13), region = 129 }
 0x3e4   : > { %s3030_s9 = smov %s3022_s18 }
 0x3e7   : > { %s3032_s13 = smov %s3025_s3 }
 0x3e8   :  { %1668 = vsyncpa [#allocation5], 1 }
 0x3e9   :  { %1670 = vsyncpa [#allocation5 + $0x1], 1 }
 0x3ea   :  { %1671 = vsyncpa [#allocation6], 1 }
 0x3eb   :  { %1673 = vsyncpa [#allocation6 + $0x1], 1 }
 0x3ec   :  { %1674 = vsyncpa [#allocation9], 1 }
 0x3ed   :  { %1676 = vsyncpa [#allocation9 + $0x1], 1 }

</bundles_post_ra>
